<compile_context>
chip_gen: v7x
topology: tpu7x:2x2x1
jax: 0.10.0
libtpu: 0.0.40
codegen_flags: <defaults>
</compile_context>

<pallas_src>
import functools
import math

import jax
import jax.numpy as jnp
import numpy as np
from jax.experimental import pallas as pl
from jax.experimental.pallas import tpu as pltpu

EPS = 1e-5          # nn.InstanceNorm3d default eps
NEG_SLOPE = 0.02
K_TILE_MAX = 1024   # only used by the generic tiled im2col fallback


def _round_up(x, m):
    return (x + m - 1) // m * m


def _default_vmem_limit():
    """Generation-aware VMEM budget (v7x has only 64 MiB per TensorCore)."""
    cap = 128 * 1024 * 1024
    try:
        info = pltpu.get_tpu_info()
        cap = int(getattr(info, "vmem_capacity_bytes", cap) or cap)
    except Exception:
        pass
    return int(min(100 * 1024 * 1024, max(32 * 1024 * 1024, (cap * 3) // 4)))


VMEM_LIMIT = _default_vmem_limit()


def _choose_cout_split(cout):
    """Split Cout in two (exactly valid for InstanceNorm) when it keeps >=8 sublanes/block."""
    if cout % 2 == 0 and (cout // 2) % 8 == 0:
        return 2
    return 1


def _choose_k_tile(K, kt_max=K_TILE_MAX):
    """K tile for the generic tiled im2col fallback (only reached for small-K layers here)."""
    if K <= kt_max:
        return K
    for kt in range(kt_max, 0, -128):
        if kt % 128 == 0 and K % kt == 0:
            return kt
    return K


# ---------------------------------------------------------------------------
# Pallas kernels
# ---------------------------------------------------------------------------
def _conv_in_lrelu_single_kernel(w_ref, a_ref, o_ref):
    """Single-K-tile fused conv + InstanceNorm + LeakyReLU (im2col operands).

    w_ref: (Cb, K) bf16 ; a_ref: (1, K, S) bf16 ; o_ref: (1, Cb, S) bf16
    """
    x = jnp.dot(w_ref[...], a_ref[0], preferred_element_type=jnp.float32)
    inv = 1.0 / x.shape[-1]
    mean = jnp.sum(x, axis=-1, keepdims=True) * inv
    var = jnp.sum(x * x, axis=-1, keepdims=True) * inv - mean * mean
    y = (x - mean) * jax.lax.rsqrt(var + EPS)
    o_ref[0] = jnp.where(y >= 0.0, y, NEG_SLOPE * y).astype(o_ref.dtype)


def _conv_in_lrelu_tiled_kernel(w_ref, a_ref, o_ref, acc_ref):
    """K-tiled fallback of the above (grid = (n, k))."""
    k = pl.program_id(1)

    @pl.when(k == 0)
    def _():
        acc_ref[...] = jnp.zeros_like(acc_ref)

    acc_ref[...] += jnp.dot(w_ref[...], a_ref[0], preferred_element_type=jnp.float32)

    @pl.when(k == pl.num_programs(1) - 1)
    def _():
        x = acc_ref[...]
        inv = 1.0 / x.shape[-1]
        mean = jnp.sum(x, axis=-1, keepdims=True) * inv
        var = jnp.sum(x * x, axis=-1, keepdims=True) * inv - mean * mean
        y = (x - mean) * jax.lax.rsqrt(var + EPS)
        o_ref[0] = jnp.where(y >= 0.0, y, NEG_SLOPE * y).astype(o_ref.dtype)


def _conv_ps_in_lrelu_kernel(w_ref, m_ref, y_ref, o_ref, acc_ref, *,
                             offsets, sv_pad, inv_count):
    """Phase-split conv + InstanceNorm + LeakyReLU, no im2col in HBM.

    w_ref  : (8, Cb, 8*Cin) bf16  -- one (Cout x 8Cin) matrix per spatial shift
    m_ref  : (1, Sv_pad)    f32   -- valid-column mask for the IN statistics
    y_ref  : (1, 8*Cin, Sp_pad) bf16 -- flattened phase-split input for batch n
    o_ref  : (1, Cb, Sv_pad) bf16
    acc_ref: (Cb, Sv_pad)    f32  scratch accumulator
    """
    acc_ref[...] = jnp.dot(w_ref[0],
                           y_ref[0, :, offsets[0]:offsets[0] + sv_pad],
                           preferred_element_type=jnp.float32)
    for s in range(1, 8):
        o = offsets[s]
        acc_ref[...] += jnp.dot(w_ref[s], y_ref[0, :, o:o + sv_pad],
                                preferred_element_type=jnp.float32)

    x = acc_ref[...]
    mask = m_ref[...]                                   # (1, Sv_pad)
    xm = x * mask
    mean = jnp.sum(xm, axis=-1, keepdims=True) * inv_count
    var = jnp.sum(xm * x, axis=-1, keepdims=True) * inv_count - mean * mean
    y = (x - mean) * jax.lax.rsqrt(var + EPS)
    o_ref[0] = jnp.where(y >= 0.0, y, NEG_SLOPE * y).astype(o_ref.dtype)


def _matmul_bias_sigmoid_kernel(a_ref, w_ref, b_ref, o_ref):
    """Final conv layer: out = sigmoid(a @ w + b)."""
    acc = jnp.dot(a_ref[...], w_ref[...], preferred_element_type=jnp.float32)
    acc = acc + b_ref[...]
    o_ref[...] = jax.nn.sigmoid(acc).astype(o_ref.dtype)


# ---------------------------------------------------------------------------
# im2col (pure JAX slicing) -- only used for conv_1 (Cin=1) and conv_4 (S=1),
# where the patch tensor is small and the single big-K matmul keeps the MXU busy.
# ---------------------------------------------------------------------------
def im2col_3d_T(x, k, stride, pad):
    """x: (N, C, D, H, W) -> patches (N, C*k^3, Do*Ho*Wo); row order (C, kd, kh, kw)."""
    N, C, D, H, W = x.shape
    if pad:
        x = jnp.pad(x, ((0, 0), (0, 0), (pad, pad), (pad, pad), (pad, pad)))
    Do = (D + 2 * pad - k) // stride + 1
    Ho = (H + 2 * pad - k) // stride + 1
    Wo = (W + 2 * pad - k) // stride + 1
    cols = []
    for kd in range(k):
        for kh in range(k):
            for kw in range(k):
                cols.append(x[:, :, kd:kd + stride * Do:stride,
                                    kh:kh + stride * Ho:stride,
                                    kw:kw + stride * Wo:stride])
    p = jnp.stack(cols, axis=2)                       # (N, C, k^3, Do, Ho, Wo)
    return p.reshape(N, C * k * k * k, Do * Ho * Wo), (Do, Ho, Wo)


# ---------------------------------------------------------------------------
# Layer wrappers
# ---------------------------------------------------------------------------
def conv3d_in_lrelu_im2col_pallas(x, w, *, stride, pad):
    """Fused Conv3d(bias=False)+InstanceNorm3d+LeakyReLU via im2col. NCDHW in / NCDHW out."""
    Cout, Cin, k, _, _ = w.shape
    N = x.shape[0]
    K = Cin * k * k * k

    a_t, (Do, Ho, Wo) = im2col_3d_T(x.astype(jnp.bfloat16), k, stride, pad)  # (N, K, S)
    S = Do * Ho * Wo
    w2d = w.reshape(Cout, K).astype(jnp.bfloat16)                            # (Cout, K)

    kt = _choose_k_tile(K)
    nk = K // kt

    if nk == 1:
        # Specialized path: no accumulator scratch, optional Cout-parallel split.
        cb = Cout // _choose_cout_split(Cout)
        n_cb = Cout // cb
        out = pl.pallas_call(
            _conv_in_lrelu_single_kernel,
            out_shape=jax.ShapeDtypeStruct((N, Cout, S), jnp.bfloat16),
            grid=(N, n_cb),
            in_specs=[
                pl.BlockSpec((cb, K), lambda n, c: (c, 0)),
                pl.BlockSpec((1, K, S), lambda n, c: (n, 0, 0)),
            ],
            out_specs=pl.BlockSpec((1, cb, S), lambda n, c: (n, c, 0)),
            compiler_params=pltpu.CompilerParams(
                dimension_semantics=("parallel", "parallel"),
                vmem_limit_bytes=VMEM_LIMIT),
        )(w2d, a_t)
    else:
        out = pl.pallas_call(
            _conv_in_lrelu_tiled_kernel,
            out_shape=jax.ShapeDtypeStruct((N, Cout, S), jnp.bfloat16),
            grid=(N, nk),
            in_specs=[
                pl.BlockSpec((Cout, kt), lambda n, kk: (0, kk)),
                pl.BlockSpec((1, kt, S), lambda n, kk: (n, kk, 0)),
            ],
            out_specs=pl.BlockSpec((1, Cout, S), lambda n, kk: (n, 0, 0)),
            scratch_shapes=[pltpu.VMEM((Cout, S), jnp.float32)],
            compiler_params=pltpu.CompilerParams(
                dimension_semantics=("parallel", "arbitrary"),
                vmem_limit_bytes=VMEM_LIMIT),
        )(w2d, a_t)

    return out.reshape(N, Cout, Do, Ho, Wo)            # free view, no transpose


def conv3d_ps_in_lrelu_pallas(x, w):
    """Fused Conv3d(k=4,s=2,p=1,bias=False)+InstanceNorm3d+LeakyReLU via a phase-split
    (space-to-depth) input and 8 in-kernel shift-matmuls -- no im2col tensor in HBM."""
    Cout, Cin, k, _, _ = w.shape
    assert k == 4, "phase-split path is specialized to k=4, stride=2, pad=1"
    N, Cin_x, D, H, W = x.shape
    assert Cin_x == Cin and D % 2 == 0 and H % 2 == 0 and W % 2 == 0
    Do, Ho, Wo = D // 2, H // 2, W // 2

    # ---- phase split: Y[n, pd,ph,pw, ci, i, j, l] = x_pad[n, ci, 2i+pd, 2j+ph, 2l+pw]
    xp = jnp.pad(x.astype(jnp.bfloat16),
                 ((0, 0), (0, 0), (1, 1), (1, 1), (1, 1)))
    yf = xp.reshape(N, Cin, Do + 1, 2, Ho + 1, 2, Wo + 1, 2)
    yf = yf.transpose(0, 3, 5, 7, 1, 2, 4, 6)          # (N, pd, ph, pw, ci, i, j, l)
    sp = (Do + 1) * (Ho + 1) * (Wo + 1)
    yf = yf.reshape(N, 8 * Cin, sp)

    sv = Do * (Ho + 1) * (Wo + 1)                      # over-sized (junk-column) output width
    sv_pad = _round_up(sv, 128)                        # lane-dense output stores
    o_max = (Ho + 1) * (Wo + 1) + (Wo + 1) + 1
    sp_pad = _round_up(o_max + sv_pad, 128)
    yf = jnp.pad(yf, ((0, 0), (0, 0), (0, sp_pad - sp)))

    # ---- weights: W_ps[(sd,sh,sw), co, (pd,ph,pw,ci)] = W[co, ci, 2sd+pd, 2sh+ph, 2sw+pw]
    w8 = w.reshape(Cout, Cin, 2, 2, 2, 2, 2, 2)        # (co, ci, sd, pd, sh, ph, sw, pw)
    w_ps = w8.transpose(2, 4, 6, 0, 3, 5, 7, 1).reshape(8, Cout, 8 * Cin)
    w_ps = w_ps.astype(jnp.bfloat16)

    # ---- valid-column mask for the InstanceNorm statistics
    r = jnp.arange(sv_pad)
    ll = r % (Wo + 1)
    jj = (r // (Wo + 1)) % (Ho + 1)
    ii = r // ((Wo + 1) * (Ho + 1))
    mask = ((ll < Wo) & (jj < Ho) & (ii < Do)).astype(jnp.float32)[None, :]

    offsets = tuple(sd * (Ho + 1) * (Wo + 1) + sh * (Wo + 1) + sw
                    for sd in (0, 1) for sh in (0, 1) for sw in (0, 1))

    cb = Cout // _choose_cout_split(Cout)
    n_cb = Cout // cb
    kern = functools.partial(_conv_ps_in_lrelu_kernel, offsets=offsets,
                             sv_pad=sv_pad, inv_count=1.0 / (Do * Ho * Wo))

    out = pl.pallas_call(
        kern,
        out_shape=jax.ShapeDtypeStruct((N, Cout, sv_pad), jnp.bfloat16),
        grid=(N, n_cb),
        in_specs=[
            pl.BlockSpec((8, cb, 8 * Cin), lambda n, c: (0, c, 0)),
            pl.BlockSpec((1, sv_pad), lambda n, c: (0, 0)),
            pl.BlockSpec((1, 8 * Cin, sp_pad), lambda n, c: (n, 0, 0)),
        ],
        out_specs=pl.BlockSpec((1, cb, sv_pad), lambda n, c: (n, c, 0)),
        scratch_shapes=[pltpu.VMEM((cb, sv_pad), jnp.float32)],
        compiler_params=pltpu.CompilerParams(
            dimension_semantics=("parallel", "parallel"),
            vmem_limit_bytes=VMEM_LIMIT),
    )(w_ps, mask, yf)

    # drop the junk columns and un-flatten (cheap, ~1x output traffic)
    out = out[:, :, :sv].reshape(N, Cout, Do, Ho + 1, Wo + 1)[:, :, :, :Ho, :Wo]
    return out


def conv3d_sigmoid_pallas(x, w, b, *, stride, pad):
    """Final Conv3d(bias=True)+sigmoid.  Returns the PyTorch `view(-1, z_dim)` layout."""
    Cout, Cin, k, _, _ = w.shape
    N = x.shape[0]
    K = Cin * k * k * k

    a_t, (Do, Ho, Wo) = im2col_3d_T(x.astype(jnp.bfloat16), k, stride, pad)  # (N, K, S)
    S = Do * Ho * Wo
    a = a_t.transpose(0, 2, 1).reshape(N * S, K)                             # rows = (n, s)
    w2d = w.reshape(Cout, K).T.astype(jnp.bfloat16)                          # (K, Cout)
    b2d = b.reshape(1, Cout).astype(jnp.float32)
    M = N * S

    out = pl.pallas_call(
        _matmul_bias_sigmoid_kernel,
        out_shape=jax.ShapeDtypeStruct((M, Cout), jnp.float32),
        grid=(1,),
        in_specs=[
            pl.BlockSpec((M, K), lambda i: (0, 0)),
            pl.BlockSpec((K, Cout), lambda i: (0, 0)),
            pl.BlockSpec((1, Cout), lambda i: (0, 0)),
        ],
        out_specs=pl.BlockSpec((M, Cout), lambda i: (0, 0)),
        compiler_params=pltpu.CompilerParams(
            dimension_semantics=("arbitrary",),
            vmem_limit_bytes=VMEM_LIMIT),
    )(a, w2d, b2d)

    # Reproduce PyTorch's `view(-1, z_dim)` on an NCDHW tensor for any Do*Ho*Wo
    # (rows -> (n, c, spatial) flat order regrouped by z_dim; identity when S == 1).
    out = out.reshape(N, S, Cout).transpose(0, 2, 1).reshape(-1, Cout)
    return out


# ---------------------------------------------------------------------------
# Encoder forward (Pallas path)
# ---------------------------------------------------------------------------
def encoder_forward(params, x):
    d = conv3d_in_lrelu_im2col_pallas(x, params["w1"], stride=2, pad=1)   # Cin = 1
    d = conv3d_ps_in_lrelu_pallas(d, params["w2"])
    d = conv3d_ps_in_lrelu_pallas(d, params["w3"])
    out = conv3d_sigmoid_pallas(d, params["w4"], params["b4"], stride=2, pad=0)
    return out


# ---------------------------------------------------------------------------
# Pure-JAX references
# ---------------------------------------------------------------------------
def _conv3d_ref(x, w, stride, pad, bias=None):
    out = jax.lax.conv_general_dilated(
        x, w, window_strides=(stride,) * 3, padding=[(pad, pad)] * 3,
        dimension_numbers=("NCDHW", "OIDHW", "NCDHW"),
        preferred_element_type=jnp.float32)
    if bias is not None:
        out = out + bias.reshape(1, -1, 1, 1, 1).astype(jnp.float32)
    return out


def _in_lrelu_ref(x):
    mean = x.mean(axis=(2, 3, 4), keepdims=True)
    var = ((x - mean) ** 2).mean(axis=(2, 3, 4), keepdims=True)
    y = (x - mean) / jnp.sqrt(var + EPS)
    return jnp.where(y >= 0, y, NEG_SLOPE * y)


def encoder_ref(params, x, quantize=False):
    """quantize=True applies the same bf16 rounding of conv inputs/weights and layer
    activations as the kernel (isolates kernel structure from the bf16 dtype choice)."""
    cast = (lambda t: t.astype(jnp.bfloat16)) if quantize else (lambda t: t)
    act = (lambda t: t.astype(jnp.bfloat16).astype(jnp.float32)) if quantize else (lambda t: t)

    def conv(h, w, stride, pad, bias=None):
        return _conv3d_ref(cast(h), cast(w), stride, pad, bias)

    d = act(_in_lrelu_ref(conv(x, params["w1"], 2, 1)))
    d = act(_in_lrelu_ref(conv(d, params["w2"], 2, 1)))
    d = act(_in_lrelu_ref(conv(d, params["w3"], 2, 1)))
    d = jax.nn.sigmoid(conv(d, params["w4"], 2, 0, params["b4"]))
    z_dim = params["w4"].shape[0]
    return d.reshape(-1, z_dim)


# ---------------------------------------------------------------------------
# Parameter init (xavier_uniform_ weights, zero bias on conv_4 -- as in __init__)
# ---------------------------------------------------------------------------
def xavier_uniform(key, shape):
    cout, cin, k, _, _ = shape
    fan_in, fan_out = cin * k * k * k, cout * k * k * k
    bound = math.sqrt(6.0 / (fan_in + fan_out))
    return jax.random.uniform(key, shape, jnp.float32, -bound, bound)


def init_params(key, ef_dim, z_dim):
    k1, k2, k3, k4 = jax.random.split(key, 4)
    return {
        "w1": xavier_uniform(k1, (ef_dim, 1, 4, 4, 4)),
        "w2": xavier_uniform(k2, (ef_dim * 2, ef_dim, 4, 4, 4)),
        "w3": xavier_uniform(k3, (ef_dim * 4, ef_dim * 2, 4, 4, 4)),
        "w4": xavier_uniform(k4, (z_dim, ef_dim * 4, 4, 4, 4)),
        "b4": jnp.zeros((z_dim,), jnp.float32),   # nn.init.constant_(conv_4.bias, 0)
    }


if __name__ == "__main__":
    ef_dim, z_dim = 4, 8
    batch, spatial = 2, 32  # 32^3 -> 16 -> 8 -> 4 -> 1 through the stride-2 stack

    key = jax.random.PRNGKey(0)
    kx, kp = jax.random.split(key)
    x = jax.random.uniform(kx, (batch, 1, spatial, spatial, spatial), jnp.float32)
    params = init_params(kp, ef_dim, z_dim)

    out = jax.block_until_ready(jax.jit(encoder_forward)(params, x))
    assert out.shape == (batch, z_dim), out.shape

    # Tight check against a reference with identical bf16 quantization points.
    ref_bf16 = jax.block_until_ready(
        jax.jit(functools.partial(encoder_ref, quantize=True))(params, x))
    np.testing.assert_allclose(np.asarray(out), np.asarray(ref_bf16), rtol=3e-3, atol=3e-3)

    # Loose end-to-end check against the full-f32 PyTorch-semantics reference
    # (the gap is only the bf16 rounding of matmul inputs/activations through 4 layers).
    ref_f32 = jax.block_until_ready(jax.jit(encoder_ref)(params, x))
    np.testing.assert_allclose(np.asarray(out), np.asarray(ref_f32), rtol=6e-2, atol=6e-2)

    print("KERNEL_OK")
</pallas_src>

<mosaic_0001>
module attributes {stable_mosaic.version = 11 : i64} {
  func.func @_conv_in_lrelu_single_kernel(%arg0: i32, %arg1: i32, %arg2: memref<4x64xbf16, #tpu.memory_space<vmem>>, %arg3: memref<1x64x4096xbf16, #tpu.memory_space<vmem>>, %arg4: memref<1x4x4096xbf16, #tpu.memory_space<vmem>>) attributes {dimension_semantics = [#tpu.dimension_semantics<parallel>, #tpu.dimension_semantics<parallel>], iteration_bounds = array<i64: 2, 1>, scalar_prefetch = 0 : i64, scratch_operands = 0 : i64, tpu.core_type = #tpu.core_type<tc>, window_params = [{transform_indices = @transform_0, window_bounds = array<i64: 4, 64>}, {transform_indices = @transform_1, window_bounds = array<i64: 1, 64, 4096>}, {transform_indices = @transform_2, window_bounds = array<i64: 1, 4, 4096>}]} {
    %c0 = arith.constant 0 : index
    %c0_0 = arith.constant 0 : index
    %0 = vector.load %arg2[%c0, %c0_0] : memref<4x64xbf16, #tpu.memory_space<vmem>>, vector<4x64xbf16>
    %c0_1 = arith.constant 0 : index
    %c0_2 = arith.constant 0 : index
    %c0_3 = arith.constant 0 : index
    %1 = vector.load %arg3[%c0_1, %c0_2, %c0_3] : memref<1x64x4096xbf16, #tpu.memory_space<vmem>>, vector<1x64x4096xbf16>
    %2 = vector.shape_cast %1 : vector<1x64x4096xbf16> to vector<64x4096xbf16>
    %cst = arith.constant dense<0.000000e+00> : vector<4x4096xf32>
    %3 = tpu.matmul %0, %2, %cst {dimension_numbers = #tpu.dot_dimension_numbers<[1], [0], [0], [1], [0, 0, 1, 1], [], []>} : vector<4x64xbf16>, vector<64x4096xbf16>, vector<4x4096xf32> -> vector<4x4096xf32>
    %cst_4 = arith.constant dense<0.000000e+00> : vector<4xf32>
    %4 = vector.multi_reduction <add>, %3, %cst_4 [1] : vector<4x4096xf32> to vector<4xf32>
    %5 = vector.shape_cast %4 : vector<4xf32> to vector<4x1xf32>
    %cst_5 = arith.constant 2.44140625E-4 : f32
    %6 = vector.broadcast %cst_5 : f32 to vector<4x1xf32>
    %7 = arith.mulf %5, %6 : vector<4x1xf32>
    %8 = arith.mulf %3, %3 : vector<4x4096xf32>
    %cst_6 = arith.constant dense<0.000000e+00> : vector<4xf32>
    %9 = vector.multi_reduction <add>, %8, %cst_6 [1] : vector<4x4096xf32> to vector<4xf32>
    %10 = vector.shape_cast %9 : vector<4xf32> to vector<4x1xf32>
    %cst_7 = arith.constant 2.44140625E-4 : f32
    %11 = vector.broadcast %cst_7 : f32 to vector<4x1xf32>
    %12 = arith.mulf %10, %11 : vector<4x1xf32>
    %13 = arith.mulf %7, %7 : vector<4x1xf32>
    %14 = arith.subf %12, %13 : vector<4x1xf32>
    %15 = vector.broadcast %7 : vector<4x1xf32> to vector<4x4096xf32>
    %16 = arith.subf %3, %15 : vector<4x4096xf32>
    %cst_8 = arith.constant 9.99999974E-6 : f32
    %17 = vector.broadcast %cst_8 : f32 to vector<4x1xf32>
    %18 = arith.addf %14, %17 : vector<4x1xf32>
    %19 = math.rsqrt %18 : vector<4x1xf32>
    %20 = vector.broadcast %19 : vector<4x1xf32> to vector<4x4096xf32>
    %21 = arith.mulf %16, %20 : vector<4x4096xf32>
    %cst_9 = arith.constant 0.000000e+00 : f32
    %22 = vector.broadcast %cst_9 : f32 to vector<4x4096xf32>
    %23 = arith.cmpf oge, %21, %22 : vector<4x4096xf32>
    %cst_10 = arith.constant 2.000000e-02 : f32
    %24 = vector.broadcast %cst_10 : f32 to vector<4x4096xf32>
    %25 = arith.mulf %24, %21 : vector<4x4096xf32>
    %26 = arith.select %23, %21, %25 : vector<4x4096xi1>, vector<4x4096xf32>
    %27 = arith.truncf %26 : vector<4x4096xf32> to vector<4x4096xbf16>
    %c0_11 = arith.constant 0 : index
    %c0_12 = arith.constant 0 : index
    %c0_13 = arith.constant 0 : index
    %28 = vector.load %arg4[%c0_11, %c0_12, %c0_13] : memref<1x4x4096xbf16, #tpu.memory_space<vmem>>, vector<1x4x4096xbf16>
    %29 = vector.shape_cast %28 : vector<1x4x4096xbf16> to vector<4x4096xbf16>
    %30 = vector.shape_cast %27 : vector<4x4096xbf16> to vector<1x4x4096xbf16>
    tpu.vector_store %arg4[%c0_11, %c0_12, %c0_13], %30 {strides = array<i32>} : memref<1x4x4096xbf16, #tpu.memory_space<vmem>>, vector<1x4x4096xbf16>,
    return
  }
  func.func @transform_0(%arg0: i32, %arg1: i32) -> (i32, i32) {
    %c0_i32 = arith.constant 0 : i32
    %c0_i32_0 = arith.constant 0 : i32
    return %arg1, %c0_i32 : i32, i32
  }
  func.func @transform_1(%arg0: i32, %arg1: i32) -> (i32, i32, i32) {
    %c0_i32 = arith.constant 0 : i32
    %c0_i32_0 = arith.constant 0 : i32
    %c0_i32_1 = arith.constant 0 : i32
    return %arg0, %c0_i32, %c0_i32_0 : i32, i32, i32
  }
  func.func @transform_2(%arg0: i32, %arg1: i32) -> (i32, i32, i32) {
    %c0_i32 = arith.constant 0 : i32
    %c0_i32_0 = arith.constant 0 : i32
    return %arg0, %arg1, %c0_i32 : i32, i32, i32
  }
}

module attributes {stable_mosaic.version = 11 : i64} {
  func.func @_conv_ps_in_lrelu_kernel(%arg0: i32, %arg1: i32, %arg2: memref<8x8x32xbf16, #tpu.memory_space<vmem>>, %arg3: memref<1x768xf32, #tpu.memory_space<vmem>>, %arg4: memref<1x32x896xbf16, #tpu.memory_space<vmem>>, %arg5: memref<1x8x768xbf16, #tpu.memory_space<vmem>>, %arg6: memref<8x768xf32, #tpu.memory_space<vmem>>) attributes {dimension_semantics = [#tpu.dimension_semantics<parallel>, #tpu.dimension_semantics<parallel>], iteration_bounds = array<i64: 2, 1>, scalar_prefetch = 0 : i64, scratch_operands = 1 : i64, tpu.core_type = #tpu.core_type<tc>, window_params = [{transform_indices = @transform_0, window_bounds = array<i64: 8, 8, 32>}, {pipeline_mode = #tpu.pipeline_mode<synchronous>, transform_indices = @transform_1, window_bounds = array<i64: 1, 768>}, {transform_indices = @transform_2, window_bounds = array<i64: 1, 32, 896>}, {transform_indices = @transform_3, window_bounds = array<i64: 1, 8, 768>}]} {
    %c0 = arith.constant 0 : index
    %c0_0 = arith.constant 0 : index
    %c0_1 = arith.constant 0 : index
    %0 = vector.load %arg2[%c0, %c0_0, %c0_1] : memref<8x8x32xbf16, #tpu.memory_space<vmem>>, vector<1x8x32xbf16>
    %1 = vector.shape_cast %0 : vector<1x8x32xbf16> to vector<8x32xbf16>
    %c0_2 = arith.constant 0 : index
    %c0_3 = arith.constant 0 : index
    %c0_4 = arith.constant 0 : index
    %2 = vector.load %arg4[%c0_2, %c0_3, %c0_4] : memref<1x32x896xbf16, #tpu.memory_space<vmem>>, vector<1x32x768xbf16>
    %3 = vector.shape_cast %2 : vector<1x32x768xbf16> to vector<32x768xbf16>
    %cst = arith.constant dense<0.000000e+00> : vector<8x768xf32>
    %4 = tpu.matmul %1, %3, %cst {dimension_numbers = #tpu.dot_dimension_numbers<[1], [0], [0], [1], [0, 0, 1, 1], [], []>} : vector<8x32xbf16>, vector<32x768xbf16>, vector<8x768xf32> -> vector<8x768xf32>
    %c0_5 = arith.constant 0 : index
    %c0_6 = arith.constant 0 : index
    %5 = vector.load %arg6[%c0_5, %c0_6] : memref<8x768xf32, #tpu.memory_space<vmem>>, vector<8x768xf32>
    tpu.vector_store %arg6[%c0_5, %c0_6], %4 {strides = array<i32>} : memref<8x768xf32, #tpu.memory_space<vmem>>, vector<8x768xf32>,
    %c0_7 = arith.constant 0 : index
    %c0_8 = arith.constant 0 : index
    %6 = vector.load %arg6[%c0_7, %c0_8] : memref<8x768xf32, #tpu.memory_space<vmem>>, vector<8x768xf32>
    %c1 = arith.constant 1 : index
    %c0_9 = arith.constant 0 : index
    %c0_10 = arith.constant 0 : index
    %7 = vector.load %arg2[%c1, %c0_9, %c0_10] : memref<8x8x32xbf16, #tpu.memory_space<vmem>>, vector<1x8x32xbf16>
    %8 = vector.shape_cast %7 : vector<1x8x32xbf16> to vector<8x32xbf16>
    %c0_11 = arith.constant 0 : index
    %c0_12 = arith.constant 0 : index
    %c1_13 = arith.constant 1 : index
    %9 = vector.load %arg4[%c0_11, %c0_12, %c1_13] : memref<1x32x896xbf16, #tpu.memory_space<vmem>>, vector<1x32x768xbf16>
    %10 = vector.shape_cast %9 : vector<1x32x768xbf16> to vector<32x768xbf16>
    %cst_14 = arith.constant dense<0.000000e+00> : vector<8x768xf32>
    %11 = tpu.matmul %8, %10, %cst_14 {dimension_numbers = #tpu.dot_dimension_numbers<[1], [0], [0], [1], [0, 0, 1, 1], [], []>} : vector<8x32xbf16>, vector<32x768xbf16>, vector<8x768xf32> -> vector<8x768xf32>
    %12 = arith.addf %6, %11 : vector<8x768xf32>
    %c0_15 = arith.constant 0 : index
    %c0_16 = arith.constant 0 : index
    %13 = vector.load %arg6[%c0_15, %c0_16] : memref<8x768xf32, #tpu.memory_space<vmem>>, vector<8x768xf32>
    tpu.vector_store %arg6[%c0_15, %c0_16], %12 {strides = array<i32>} : memref<8x768xf32, #tpu.memory_space<vmem>>, vector<8x768xf32>,
    %c0_17 = arith.constant 0 : index
    %c0_18 = arith.constant 0 : index
    %14 = vector.load %arg6[%c0_17, %c0_18] : memref<8x768xf32, #tpu.memory_space<vmem>>, vector<8x768xf32>
    %c2 = arith.constant 2 : index
    %c0_19 = arith.constant 0 : index
    %c0_20 = arith.constant 0 : index
    %15 = vector.load %arg2[%c2, %c0_19, %c0_20] : memref<8x8x32xbf16, #tpu.memory_space<vmem>>, vector<1x8x32xbf16>
    %16 = vector.shape_cast %15 : vector<1x8x32xbf16> to vector<8x32xbf16>
    %c0_21 = arith.constant 0 : index
    %c0_22 = arith.constant 0 : index
    %c9 = arith.constant 9 : index
    %17 = vector.load %arg4[%c0_21, %c0_22, %c9] : memref<1x32x896xbf16, #tpu.memory_space<vmem>>, vector<1x32x768xbf16>
    %18 = vector.shape_cast %17 : vector<1x32x768xbf16> to vector<32x768xbf16>
    %cst_23 = arith.constant dense<0.000000e+00> : vector<8x768xf32>
    %19 = tpu.matmul %16, %18, %cst_23 {dimension_numbers = #tpu.dot_dimension_numbers<[1], [0], [0], [1], [0, 0, 1, 1], [], []>} : vector<8x32xbf16>, vector<32x768xbf16>, vector<8x768xf32> -> vector<8x768xf32>
    %20 = arith.addf %14, %19 : vector<8x768xf32>
    %c0_24 = arith.constant 0 : index
    %c0_25 = arith.constant 0 : index
    %21 = vector.load %arg6[%c0_24, %c0_25] : memref<8x768xf32, #tpu.memory_space<vmem>>, vector<8x768xf32>
    tpu.vector_store %arg6[%c0_24, %c0_25], %20 {strides = array<i32>} : memref<8x768xf32, #tpu.memory_space<vmem>>, vector<8x768xf32>,
    %c0_26 = arith.constant 0 : index
    %c0_27 = arith.constant 0 : index
    %22 = vector.load %arg6[%c0_26, %c0_27] : memref<8x768xf32, #tpu.memory_space<vmem>>, vector<8x768xf32>
    %c3 = arith.constant 3 : index
    %c0_28 = arith.constant 0 : index
    %c0_29 = arith.constant 0 : index
    %23 = vector.load %arg2[%c3, %c0_28, %c0_29] : memref<8x8x32xbf16, #tpu.memory_space<vmem>>, vector<1x8x32xbf16>
    %24 = vector.shape_cast %23 : vector<1x8x32xbf16> to vector<8x32xbf16>
    %c0_30 = arith.constant 0 : index
    %c0_31 = arith.constant 0 : index
    %c10 = arith.constant 10 : index
    %25 = vector.load %arg4[%c0_30, %c0_31, %c10] : memref<1x32x896xbf16, #tpu.memory_space<vmem>>, vector<1x32x768xbf16>
    %26 = vector.shape_cast %25 : vector<1x32x768xbf16> to vector<32x768xbf16>
    %cst_32 = arith.constant dense<0.000000e+00> : vector<8x768xf32>
    %27 = tpu.matmul %24, %26, %cst_32 {dimension_numbers = #tpu.dot_dimension_numbers<[1], [0], [0], [1], [0, 0, 1, 1], [], []>} : vector<8x32xbf16>, vector<32x768xbf16>, vector<8x768xf32> -> vector<8x768xf32>
    %28 = arith.addf %22, %27 : vector<8x768xf32>
    %c0_33 = arith.constant 0 : index
    %c0_34 = arith.constant 0 : index
    %29 = vector.load %arg6[%c0_33, %c0_34] : memref<8x768xf32, #tpu.memory_space<vmem>>, vector<8x768xf32>
    tpu.vector_store %arg6[%c0_33, %c0_34], %28 {strides = array<i32>} : memref<8x768xf32, #tpu.memory_space<vmem>>, vector<8x768xf32>,
    %c0_35 = arith.constant 0 : index
    %c0_36 = arith.constant 0 : index
    %30 = vector.load %arg6[%c0_35, %c0_36] : memref<8x768xf32, #tpu.memory_space<vmem>>, vector<8x768xf32>
    %c4 = arith.constant 4 : index
    %c0_37 = arith.constant 0 : index
    %c0_38 = arith.constant 0 : index
    %31 = vector.load %arg2[%c4, %c0_37, %c0_38] : memref<8x8x32xbf16, #tpu.memory_space<vmem>>, vector<1x8x32xbf16>
    %32 = vector.shape_cast %31 : vector<1x8x32xbf16> to vector<8x32xbf16>
    %c0_39 = arith.constant 0 : index
    %c0_40 = arith.constant 0 : index
    %c81 = arith.constant 81 : index
    %33 = vector.load %arg4[%c0_39, %c0_40, %c81] : memref<1x32x896xbf16, #tpu.memory_space<vmem>>, vector<1x32x768xbf16>
    %34 = vector.shape_cast %33 : vector<1x32x768xbf16> to vector<32x768xbf16>
    %cst_41 = arith.constant dense<0.000000e+00> : vector<8x768xf32>
    %35 = tpu.matmul %32, %34, %cst_41 {dimension_numbers = #tpu.dot_dimension_numbers<[1], [0], [0], [1], [0, 0, 1, 1], [], []>} : vector<8x32xbf16>, vector<32x768xbf16>, vector<8x768xf32> -> vector<8x768xf32>
    %36 = arith.addf %30, %35 : vector<8x768xf32>
    %c0_42 = arith.constant 0 : index
    %c0_43 = arith.constant 0 : index
    %37 = vector.load %arg6[%c0_42, %c0_43] : memref<8x768xf32, #tpu.memory_space<vmem>>, vector<8x768xf32>
    tpu.vector_store %arg6[%c0_42, %c0_43], %36 {strides = array<i32>} : memref<8x768xf32, #tpu.memory_space<vmem>>, vector<8x768xf32>,
    %c0_44 = arith.constant 0 : index
    %c0_45 = arith.constant 0 : index
    %38 = vector.load %arg6[%c0_44, %c0_45] : memref<8x768xf32, #tpu.memory_space<vmem>>, vector<8x768xf32>
    %c5 = arith.constant 5 : index
    %c0_46 = arith.constant 0 : index
    %c0_47 = arith.constant 0 : index
    %39 = vector.load %arg2[%c5, %c0_46, %c0_47] : memref<8x8x32xbf16, #tpu.memory_space<vmem>>, vector<1x8x32xbf16>
    %40 = vector.shape_cast %39 : vector<1x8x32xbf16> to vector<8x32xbf16>
    %c0_48 = arith.constant 0 : index
    %c0_49 = arith.constant 0 : index
    %c82 = arith.constant 82 : index
    %41 = vector.load %arg4[%c0_48, %c0_49, %c82] : memref<1x32x896xbf16, #tpu.memory_space<vmem>>, vector<1x32x768xbf16>
    %42 = vector.shape_cast %41 : vector<1x32x768xbf16> to vector<32x768xbf16>
    %cst_50 = arith.constant dense<0.000000e+00> : vector<8x768xf32>
    %43 = tpu.matmul %40, %42, %cst_50 {dimension_numbers = #tpu.dot_dimension_numbers<[1], [0], [0], [1], [0, 0, 1, 1], [], []>} : vector<8x32xbf16>, vector<32x768xbf16>, vector<8x768xf32> -> vector<8x768xf32>
    %44 = arith.addf %38, %43 : vector<8x768xf32>
    %c0_51 = arith.constant 0 : index
    %c0_52 = arith.constant 0 : index
    %45 = vector.load %arg6[%c0_51, %c0_52] : memref<8x768xf32, #tpu.memory_space<vmem>>, vector<8x768xf32>
    tpu.vector_store %arg6[%c0_51, %c0_52], %44 {strides = array<i32>} : memref<8x768xf32, #tpu.memory_space<vmem>>, vector<8x768xf32>,
    %c0_53 = arith.constant 0 : index
    %c0_54 = arith.constant 0 : index
    %46 = vector.load %arg6[%c0_53, %c0_54] : memref<8x768xf32, #tpu.memory_space<vmem>>, vector<8x768xf32>
    %c6 = arith.constant 6 : index
    %c0_55 = arith.constant 0 : index
    %c0_56 = arith.constant 0 : index
    %47 = vector.load %arg2[%c6, %c0_55, %c0_56] : memref<8x8x32xbf16, #tpu.memory_space<vmem>>, vector<1x8x32xbf16>
    %48 = vector.shape_cast %47 : vector<1x8x32xbf16> to vector<8x32xbf16>
    %c0_57 = arith.constant 0 : index
    %c0_58 = arith.constant 0 : index
    %c90 = arith.constant 90 : index
    %49 = vector.load %arg4[%c0_57, %c0_58, %c90] : memref<1x32x896xbf16, #tpu.memory_space<vmem>>, vector<1x32x768xbf16>
    %50 = vector.shape_cast %49 : vector<1x32x768xbf16> to vector<32x768xbf16>
    %cst_59 = arith.constant dense<0.000000e+00> : vector<8x768xf32>
    %51 = tpu.matmul %48, %50, %cst_59 {dimension_numbers = #tpu.dot_dimension_numbers<[1], [0], [0], [1], [0, 0, 1, 1], [], []>} : vector<8x32xbf16>, vector<32x768xbf16>, vector<8x768xf32> -> vector<8x768xf32>
    %52 = arith.addf %46, %51 : vector<8x768xf32>
    %c0_60 = arith.constant 0 : index
    %c0_61 = arith.constant 0 : index
    %53 = vector.load %arg6[%c0_60, %c0_61] : memref<8x768xf32, #tpu.memory_space<vmem>>, vector<8x768xf32>
    tpu.vector_store %arg6[%c0_60, %c0_61], %52 {strides = array<i32>} : memref<8x768xf32, #tpu.memory_space<vmem>>, vector<8x768xf32>,
    %c0_62 = arith.constant 0 : index
    %c0_63 = arith.constant 0 : index
    %54 = vector.load %arg6[%c0_62, %c0_63] : memref<8x768xf32, #tpu.memory_space<vmem>>, vector<8x768xf32>
    %c7 = arith.constant 7 : index
    %c0_64 = arith.constant 0 : index
    %c0_65 = arith.constant 0 : index
    %55 = vector.load %arg2[%c7, %c0_64, %c0_65] : memref<8x8x32xbf16, #tpu.memory_space<vmem>>, vector<1x8x32xbf16>
    %56 = vector.shape_cast %55 : vector<1x8x32xbf16> to vector<8x32xbf16>
    %c0_66 = arith.constant 0 : index
    %c0_67 = arith.constant 0 : index
    %c91 = arith.constant 91 : index
    %57 = vector.load %arg4[%c0_66, %c0_67, %c91] : memref<1x32x896xbf16, #tpu.memory_space<vmem>>, vector<1x32x768xbf16>
    %58 = vector.shape_cast %57 : vector<1x32x768xbf16> to vector<32x768xbf16>
    %cst_68 = arith.constant dense<0.000000e+00> : vector<8x768xf32>
    %59 = tpu.matmul %56, %58, %cst_68 {dimension_numbers = #tpu.dot_dimension_numbers<[1], [0], [0], [1], [0, 0, 1, 1], [], []>} : vector<8x32xbf16>, vector<32x768xbf16>, vector<8x768xf32> -> vector<8x768xf32>
    %60 = arith.addf %54, %59 : vector<8x768xf32>
    %c0_69 = arith.constant 0 : index
    %c0_70 = arith.constant 0 : index
    %61 = vector.load %arg6[%c0_69, %c0_70] : memref<8x768xf32, #tpu.memory_space<vmem>>, vector<8x768xf32>
    tpu.vector_store %arg6[%c0_69, %c0_70], %60 {strides = array<i32>} : memref<8x768xf32, #tpu.memory_space<vmem>>, vector<8x768xf32>,
    %c0_71 = arith.constant 0 : index
    %c0_72 = arith.constant 0 : index
    %62 = vector.load %arg6[%c0_71, %c0_72] : memref<8x768xf32, #tpu.memory_space<vmem>>, vector<8x768xf32>
    %c0_73 = arith.constant 0 : index
    %c0_74 = arith.constant 0 : index
    %63 = vector.load %arg3[%c0_73, %c0_74] : memref<1x768xf32, #tpu.memory_space<vmem>>, vector<1x768xf32>
    %64 = vector.broadcast %63 : vector<1x768xf32> to vector<8x768xf32>
    %65 = arith.mulf %62, %64 : vector<8x768xf32>
    %cst_75 = arith.constant dense<0.000000e+00> : vector<8xf32>
    %66 = vector.multi_reduction <add>, %65, %cst_75 [1] : vector<8x768xf32> to vector<8xf32>
    %67 = vector.shape_cast %66 : vector<8xf32> to vector<8x1xf32>
    %cst_76 = arith.constant 0.001953125 : f32
    %68 = vector.broadcast %cst_76 : f32 to vector<8x1xf32>
    %69 = arith.mulf %67, %68 : vector<8x1xf32>
    %70 = arith.mulf %65, %62 : vector<8x768xf32>
    %cst_77 = arith.constant dense<0.000000e+00> : vector<8xf32>
    %71 = vector.multi_reduction <add>, %70, %cst_77 [1] : vector<8x768xf32> to vector<8xf32>
    %72 = vector.shape_cast %71 : vector<8xf32> to vector<8x1xf32>
    %cst_78 = arith.constant 0.001953125 : f32
    %73 = vector.broadcast %cst_78 : f32 to vector<8x1xf32>
    %74 = arith.mulf %72, %73 : vector<8x1xf32>
    %75 = arith.mulf %69, %69 : vector<8x1xf32>
    %76 = arith.subf %74, %75 : vector<8x1xf32>
    %77 = vector.broadcast %69 : vector<8x1xf32> to vector<8x768xf32>
    %78 = arith.subf %62, %77 : vector<8x768xf32>
    %cst_79 = arith.constant 9.99999974E-6 : f32
    %79 = vector.broadcast %cst_79 : f32 to vector<8x1xf32>
    %80 = arith.addf %76, %79 : vector<8x1xf32>
    %81 = math.rsqrt %80 : vector<8x1xf32>
    %82 = vector.broadcast %81 : vector<8x1xf32> to vector<8x768xf32>
    %83 = arith.mulf %78, %82 : vector<8x768xf32>
    %cst_80 = arith.constant 0.000000e+00 : f32
    %84 = vector.broadcast %cst_80 : f32 to vector<8x768xf32>
    %85 = arith.cmpf oge, %83, %84 : vector<8x768xf32>
    %cst_81 = arith.constant 2.000000e-02 : f32
    %86 = vector.broadcast %cst_81 : f32 to vector<8x768xf32>
    %87 = arith.mulf %86, %83 : vector<8x768xf32>
    %88 = arith.select %85, %83, %87 : vector<8x768xi1>, vector<8x768xf32>
    %89 = arith.truncf %88 : vector<8x768xf32> to vector<8x768xbf16>
    %c0_82 = arith.constant 0 : index
    %c0_83 = arith.constant 0 : index
    %c0_84 = arith.constant 0 : index
    %90 = vector.load %arg5[%c0_82, %c0_83, %c0_84] : memref<1x8x768xbf16, #tpu.memory_space<vmem>>, vector<1x8x768xbf16>
    %91 = vector.shape_cast %90 : vector<1x8x768xbf16> to vector<8x768xbf16>
    %92 = vector.shape_cast %89 : vector<8x768xbf16> to vector<1x8x768xbf16>
    tpu.vector_store %arg5[%c0_82, %c0_83, %c0_84], %92 {strides = array<i32>} : memref<1x8x768xbf16, #tpu.memory_space<vmem>>, vector<1x8x768xbf16>,
    return
  }
  func.func @transform_0(%arg0: i32, %arg1: i32) -> (i32, i32, i32) {
    %c0_i32 = arith.constant 0 : i32
    %c0_i32_0 = arith.constant 0 : i32
    %c0_i32_1 = arith.constant 0 : i32
    return %c0_i32, %arg1, %c0_i32_0 : i32, i32, i32
  }
  func.func @transform_1(%arg0: i32, %arg1: i32) -> (i32, i32) {
    %c0_i32 = arith.constant 0 : i32
    %c0_i32_0 = arith.constant 0 : i32
    %c0_i32_1 = arith.constant 0 : i32
    return %c0_i32, %c0_i32_0 : i32, i32
  }
  func.func @transform_2(%arg0: i32, %arg1: i32) -> (i32, i32, i32) {
    %c0_i32 = arith.constant 0 : i32
    %c0_i32_0 = arith.constant 0 : i32
    %c0_i32_1 = arith.constant 0 : i32
    return %arg0, %c0_i32, %c0_i32_0 : i32, i32, i32
  }
  func.func @transform_3(%arg0: i32, %arg1: i32) -> (i32, i32, i32) {
    %c0_i32 = arith.constant 0 : i32
    %c0_i32_0 = arith.constant 0 : i32
    return %arg0, %arg1, %c0_i32 : i32, i32, i32
  }
}

module attributes {stable_mosaic.version = 11 : i64} {
  func.func @_conv_ps_in_lrelu_kernel(%arg0: i32, %arg1: i32, %arg2: memref<8x8x64xbf16, #tpu.memory_space<vmem>>, %arg3: memref<1x128xf32, #tpu.memory_space<vmem>>, %arg4: memref<1x64x256xbf16, #tpu.memory_space<vmem>>, %arg5: memref<1x8x128xbf16, #tpu.memory_space<vmem>>, %arg6: memref<8x128xf32, #tpu.memory_space<vmem>>) attributes {dimension_semantics = [#tpu.dimension_semantics<parallel>, #tpu.dimension_semantics<parallel>], iteration_bounds = array<i64: 2, 2>, scalar_prefetch = 0 : i64, scratch_operands = 1 : i64, tpu.core_type = #tpu.core_type<tc>, window_params = [{transform_indices = @transform_0, window_bounds = array<i64: 8, 8, 64>}, {pipeline_mode = #tpu.pipeline_mode<synchronous>, transform_indices = @transform_1, window_bounds = array<i64: 1, 128>}, {transform_indices = @transform_2, window_bounds = array<i64: 1, 64, 256>}, {transform_indices = @transform_3, window_bounds = array<i64: 1, 8, 128>}]} {
    %c0 = arith.constant 0 : index
    %c0_0 = arith.constant 0 : index
    %c0_1 = arith.constant 0 : index
    %0 = vector.load %arg2[%c0, %c0_0, %c0_1] : memref<8x8x64xbf16, #tpu.memory_space<vmem>>, vector<1x8x64xbf16>
    %1 = vector.shape_cast %0 : vector<1x8x64xbf16> to vector<8x64xbf16>
    %c0_2 = arith.constant 0 : index
    %c0_3 = arith.constant 0 : index
    %c0_4 = arith.constant 0 : index
    %2 = vector.load %arg4[%c0_2, %c0_3, %c0_4] : memref<1x64x256xbf16, #tpu.memory_space<vmem>>, vector<1x64x128xbf16>
    %3 = vector.shape_cast %2 : vector<1x64x128xbf16> to vector<64x128xbf16>
    %cst = arith.constant dense<0.000000e+00> : vector<8x128xf32>
    %4 = tpu.matmul %1, %3, %cst {dimension_numbers = #tpu.dot_dimension_numbers<[1], [0], [0], [1], [0, 0, 1, 1], [], []>} : vector<8x64xbf16>, vector<64x128xbf16>, vector<8x128xf32> -> vector<8x128xf32>
    %c0_5 = arith.constant 0 : index
    %c0_6 = arith.constant 0 : index
    %5 = vector.load %arg6[%c0_5, %c0_6] : memref<8x128xf32, #tpu.memory_space<vmem>>, vector<8x128xf32>
    tpu.vector_store %arg6[%c0_5, %c0_6], %4 {strides = array<i32>} : memref<8x128xf32, #tpu.memory_space<vmem>>, vector<8x128xf32>,
    %c0_7 = arith.constant 0 : index
    %c0_8 = arith.constant 0 : index
    %6 = vector.load %arg6[%c0_7, %c0_8] : memref<8x128xf32, #tpu.memory_space<vmem>>, vector<8x128xf32>
    %c1 = arith.constant 1 : index
    %c0_9 = arith.constant 0 : index
    %c0_10 = arith.constant 0 : index
    %7 = vector.load %arg2[%c1, %c0_9, %c0_10] : memref<8x8x64xbf16, #tpu.memory_space<vmem>>, vector<1x8x64xbf16>
    %8 = vector.shape_cast %7 : vector<1x8x64xbf16> to vector<8x64xbf16>
    %c0_11 = arith.constant 0 : index
    %c0_12 = arith.constant 0 : index
    %c1_13 = arith.constant 1 : index
    %9 = vector.load %arg4[%c0_11, %c0_12, %c1_13] : memref<1x64x256xbf16, #tpu.memory_space<vmem>>, vector<1x64x128xbf16>
    %10 = vector.shape_cast %9 : vector<1x64x128xbf16> to vector<64x128xbf16>
    %cst_14 = arith.constant dense<0.000000e+00> : vector<8x128xf32>
    %11 = tpu.matmul %8, %10, %cst_14 {dimension_numbers = #tpu.dot_dimension_numbers<[1], [0], [0], [1], [0, 0, 1, 1], [], []>} : vector<8x64xbf16>, vector<64x128xbf16>, vector<8x128xf32> -> vector<8x128xf32>
    %12 = arith.addf %6, %11 : vector<8x128xf32>
    %c0_15 = arith.constant 0 : index
    %c0_16 = arith.constant 0 : index
    %13 = vector.load %arg6[%c0_15, %c0_16] : memref<8x128xf32, #tpu.memory_space<vmem>>, vector<8x128xf32>
    tpu.vector_store %arg6[%c0_15, %c0_16], %12 {strides = array<i32>} : memref<8x128xf32, #tpu.memory_space<vmem>>, vector<8x128xf32>,
    %c0_17 = arith.constant 0 : index
    %c0_18 = arith.constant 0 : index
    %14 = vector.load %arg6[%c0_17, %c0_18] : memref<8x128xf32, #tpu.memory_space<vmem>>, vector<8x128xf32>
    %c2 = arith.constant 2 : index
    %c0_19 = arith.constant 0 : index
    %c0_20 = arith.constant 0 : index
    %15 = vector.load %arg2[%c2, %c0_19, %c0_20] : memref<8x8x64xbf16, #tpu.memory_space<vmem>>, vector<1x8x64xbf16>
    %16 = vector.shape_cast %15 : vector<1x8x64xbf16> to vector<8x64xbf16>
    %c0_21 = arith.constant 0 : index
    %c0_22 = arith.constant 0 : index
    %c5 = arith.constant 5 : index
    %17 = vector.load %arg4[%c0_21, %c0_22, %c5] : memref<1x64x256xbf16, #tpu.memory_space<vmem>>, vector<1x64x128xbf16>
    %18 = vector.shape_cast %17 : vector<1x64x128xbf16> to vector<64x128xbf16>
    %cst_23 = arith.constant dense<0.000000e+00> : vector<8x128xf32>
    %19 = tpu.matmul %16, %18, %cst_23 {dimension_numbers = #tpu.dot_dimension_numbers<[1], [0], [0], [1], [0, 0, 1, 1], [], []>} : vector<8x64xbf16>, vector<64x128xbf16>, vector<8x128xf32> -> vector<8x128xf32>
    %20 = arith.addf %14, %19 : vector<8x128xf32>
    %c0_24 = arith.constant 0 : index
    %c0_25 = arith.constant 0 : index
    %21 = vector.load %arg6[%c0_24, %c0_25] : memref<8x128xf32, #tpu.memory_space<vmem>>, vector<8x128xf32>
    tpu.vector_store %arg6[%c0_24, %c0_25], %20 {strides = array<i32>} : memref<8x128xf32, #tpu.memory_space<vmem>>, vector<8x128xf32>,
    %c0_26 = arith.constant 0 : index
    %c0_27 = arith.constant 0 : index
    %22 = vector.load %arg6[%c0_26, %c0_27] : memref<8x128xf32, #tpu.memory_space<vmem>>, vector<8x128xf32>
    %c3 = arith.constant 3 : index
    %c0_28 = arith.constant 0 : index
    %c0_29 = arith.constant 0 : index
    %23 = vector.load %arg2[%c3, %c0_28, %c0_29] : memref<8x8x64xbf16, #tpu.memory_space<vmem>>, vector<1x8x64xbf16>
    %24 = vector.shape_cast %23 : vector<1x8x64xbf16> to vector<8x64xbf16>
    %c0_30 = arith.constant 0 : index
    %c0_31 = arith.constant 0 : index
    %c6 = arith.constant 6 : index
    %25 = vector.load %arg4[%c0_30, %c0_31, %c6] : memref<1x64x256xbf16, #tpu.memory_space<vmem>>, vector<1x64x128xbf16>
    %26 = vector.shape_cast %25 : vector<1x64x128xbf16> to vector<64x128xbf16>
    %cst_32 = arith.constant dense<0.000000e+00> : vector<8x128xf32>
    %27 = tpu.matmul %24, %26, %cst_32 {dimension_numbers = #tpu.dot_dimension_numbers<[1], [0], [0], [1], [0, 0, 1, 1], [], []>} : vector<8x64xbf16>, vector<64x128xbf16>, vector<8x128xf32> -> vector<8x128xf32>
    %28 = arith.addf %22, %27 : vector<8x128xf32>
    %c0_33 = arith.constant 0 : index
    %c0_34 = arith.constant 0 : index
    %29 = vector.load %arg6[%c0_33, %c0_34] : memref<8x128xf32, #tpu.memory_space<vmem>>, vector<8x128xf32>
    tpu.vector_store %arg6[%c0_33, %c0_34], %28 {strides = array<i32>} : memref<8x128xf32, #tpu.memory_space<vmem>>, vector<8x128xf32>,
    %c0_35 = arith.constant 0 : index
    %c0_36 = arith.constant 0 : index
    %30 = vector.load %arg6[%c0_35, %c0_36] : memref<8x128xf32, #tpu.memory_space<vmem>>, vector<8x128xf32>
    %c4 = arith.constant 4 : index
    %c0_37 = arith.constant 0 : index
    %c0_38 = arith.constant 0 : index
    %31 = vector.load %arg2[%c4, %c0_37, %c0_38] : memref<8x8x64xbf16, #tpu.memory_space<vmem>>, vector<1x8x64xbf16>
    %32 = vector.shape_cast %31 : vector<1x8x64xbf16> to vector<8x64xbf16>
    %c0_39 = arith.constant 0 : index
    %c0_40 = arith.constant 0 : index
    %c25 = arith.constant 25 : index
    %33 = vector.load %arg4[%c0_39, %c0_40, %c25] : memref<1x64x256xbf16, #tpu.memory_space<vmem>>, vector<1x64x128xbf16>
    %34 = vector.shape_cast %33 : vector<1x64x128xbf16> to vector<64x128xbf16>
    %cst_41 = arith.constant dense<0.000000e+00> : vector<8x128xf32>
    %35 = tpu.matmul %32, %34, %cst_41 {dimension_numbers = #tpu.dot_dimension_numbers<[1], [0], [0], [1], [0, 0, 1, 1], [], []>} : vector<8x64xbf16>, vector<64x128xbf16>, vector<8x128xf32> -> vector<8x128xf32>
    %36 = arith.addf %30, %35 : vector<8x128xf32>
    %c0_42 = arith.constant 0 : index
    %c0_43 = arith.constant 0 : index
    %37 = vector.load %arg6[%c0_42, %c0_43] : memref<8x128xf32, #tpu.memory_space<vmem>>, vector<8x128xf32>
    tpu.vector_store %arg6[%c0_42, %c0_43], %36 {strides = array<i32>} : memref<8x128xf32, #tpu.memory_space<vmem>>, vector<8x128xf32>,
    %c0_44 = arith.constant 0 : index
    %c0_45 = arith.constant 0 : index
    %38 = vector.load %arg6[%c0_44, %c0_45] : memref<8x128xf32, #tpu.memory_space<vmem>>, vector<8x128xf32>
    %c5_46 = arith.constant 5 : index
    %c0_47 = arith.constant 0 : index
    %c0_48 = arith.constant 0 : index
    %39 = vector.load %arg2[%c5_46, %c0_47, %c0_48] : memref<8x8x64xbf16, #tpu.memory_space<vmem>>, vector<1x8x64xbf16>
    %40 = vector.shape_cast %39 : vector<1x8x64xbf16> to vector<8x64xbf16>
    %c0_49 = arith.constant 0 : index
    %c0_50 = arith.constant 0 : index
    %c26 = arith.constant 26 : index
    %41 = vector.load %arg4[%c0_49, %c0_50, %c26] : memref<1x64x256xbf16, #tpu.memory_space<vmem>>, vector<1x64x128xbf16>
    %42 = vector.shape_cast %41 : vector<1x64x128xbf16> to vector<64x128xbf16>
    %cst_51 = arith.constant dense<0.000000e+00> : vector<8x128xf32>
    %43 = tpu.matmul %40, %42, %cst_51 {dimension_numbers = #tpu.dot_dimension_numbers<[1], [0], [0], [1], [0, 0, 1, 1], [], []>} : vector<8x64xbf16>, vector<64x128xbf16>, vector<8x128xf32> -> vector<8x128xf32>
    %44 = arith.addf %38, %43 : vector<8x128xf32>
    %c0_52 = arith.constant 0 : index
    %c0_53 = arith.constant 0 : index
    %45 = vector.load %arg6[%c0_52, %c0_53] : memref<8x128xf32, #tpu.memory_space<vmem>>, vector<8x128xf32>
    tpu.vector_store %arg6[%c0_52, %c0_53], %44 {strides = array<i32>} : memref<8x128xf32, #tpu.memory_space<vmem>>, vector<8x128xf32>,
    %c0_54 = arith.constant 0 : index
    %c0_55 = arith.constant 0 : index
    %46 = vector.load %arg6[%c0_54, %c0_55] : memref<8x128xf32, #tpu.memory_space<vmem>>, vector<8x128xf32>
    %c6_56 = arith.constant 6 : index
    %c0_57 = arith.constant 0 : index
    %c0_58 = arith.constant 0 : index
    %47 = vector.load %arg2[%c6_56, %c0_57, %c0_58] : memref<8x8x64xbf16, #tpu.memory_space<vmem>>, vector<1x8x64xbf16>
    %48 = vector.shape_cast %47 : vector<1x8x64xbf16> to vector<8x64xbf16>
    %c0_59 = arith.constant 0 : index
    %c0_60 = arith.constant 0 : index
    %c30 = arith.constant 30 : index
    %49 = vector.load %arg4[%c0_59, %c0_60, %c30] : memref<1x64x256xbf16, #tpu.memory_space<vmem>>, vector<1x64x128xbf16>
    %50 = vector.shape_cast %49 : vector<1x64x128xbf16> to vector<64x128xbf16>
    %cst_61 = arith.constant dense<0.000000e+00> : vector<8x128xf32>
    %51 = tpu.matmul %48, %50, %cst_61 {dimension_numbers = #tpu.dot_dimension_numbers<[1], [0], [0], [1], [0, 0, 1, 1], [], []>} : vector<8x64xbf16>, vector<64x128xbf16>, vector<8x128xf32> -> vector<8x128xf32>
    %52 = arith.addf %46, %51 : vector<8x128xf32>
    %c0_62 = arith.constant 0 : index
    %c0_63 = arith.constant 0 : index
    %53 = vector.load %arg6[%c0_62, %c0_63] : memref<8x128xf32, #tpu.memory_space<vmem>>, vector<8x128xf32>
    tpu.vector_store %arg6[%c0_62, %c0_63], %52 {strides = array<i32>} : memref<8x128xf32, #tpu.memory_space<vmem>>, vector<8x128xf32>,
    %c0_64 = arith.constant 0 : index
    %c0_65 = arith.constant 0 : index
    %54 = vector.load %arg6[%c0_64, %c0_65] : memref<8x128xf32, #tpu.memory_space<vmem>>, vector<8x128xf32>
    %c7 = arith.constant 7 : index
    %c0_66 = arith.constant 0 : index
    %c0_67 = arith.constant 0 : index
    %55 = vector.load %arg2[%c7, %c0_66, %c0_67] : memref<8x8x64xbf16, #tpu.memory_space<vmem>>, vector<1x8x64xbf16>
    %56 = vector.shape_cast %55 : vector<1x8x64xbf16> to vector<8x64xbf16>
    %c0_68 = arith.constant 0 : index
    %c0_69 = arith.constant 0 : index
    %c31 = arith.constant 31 : index
    %57 = vector.load %arg4[%c0_68, %c0_69, %c31] : memref<1x64x256xbf16, #tpu.memory_space<vmem>>, vector<1x64x128xbf16>
    %58 = vector.shape_cast %57 : vector<1x64x128xbf16> to vector<64x128xbf16>
    %cst_70 = arith.constant dense<0.000000e+00> : vector<8x128xf32>
    %59 = tpu.matmul %56, %58, %cst_70 {dimension_numbers = #tpu.dot_dimension_numbers<[1], [0], [0], [1], [0, 0, 1, 1], [], []>} : vector<8x64xbf16>, vector<64x128xbf16>, vector<8x128xf32> -> vector<8x128xf32>
    %60 = arith.addf %54, %59 : vector<8x128xf32>
    %c0_71 = arith.constant 0 : index
    %c0_72 = arith.constant 0 : index
    %61 = vector.load %arg6[%c0_71, %c0_72] : memref<8x128xf32, #tpu.memory_space<vmem>>, vector<8x128xf32>
    tpu.vector_store %arg6[%c0_71, %c0_72], %60 {strides = array<i32>} : memref<8x128xf32, #tpu.memory_space<vmem>>, vector<8x128xf32>,
    %c0_73 = arith.constant 0 : index
    %c0_74 = arith.constant 0 : index
    %62 = vector.load %arg6[%c0_73, %c0_74] : memref<8x128xf32, #tpu.memory_space<vmem>>, vector<8x128xf32>
    %c0_75 = arith.constant 0 : index
    %c0_76 = arith.constant 0 : index
    %63 = vector.load %arg3[%c0_75, %c0_76] : memref<1x128xf32, #tpu.memory_space<vmem>>, vector<1x128xf32>
    %64 = vector.broadcast %63 : vector<1x128xf32> to vector<8x128xf32>
    %65 = arith.mulf %62, %64 : vector<8x128xf32>
    %cst_77 = arith.constant dense<0.000000e+00> : vector<8xf32>
    %66 = vector.multi_reduction <add>, %65, %cst_77 [1] : vector<8x128xf32> to vector<8xf32>
    %67 = vector.shape_cast %66 : vector<8xf32> to vector<8x1xf32>
    %cst_78 = arith.constant 1.562500e-02 : f32
    %68 = vector.broadcast %cst_78 : f32 to vector<8x1xf32>
    %69 = arith.mulf %67, %68 : vector<8x1xf32>
    %70 = arith.mulf %65, %62 : vector<8x128xf32>
    %cst_79 = arith.constant dense<0.000000e+00> : vector<8xf32>
    %71 = vector.multi_reduction <add>, %70, %cst_79 [1] : vector<8x128xf32> to vector<8xf32>
    %72 = vector.shape_cast %71 : vector<8xf32> to vector<8x1xf32>
    %cst_80 = arith.constant 1.562500e-02 : f32
    %73 = vector.broadcast %cst_80 : f32 to vector<8x1xf32>
    %74 = arith.mulf %72, %73 : vector<8x1xf32>
    %75 = arith.mulf %69, %69 : vector<8x1xf32>
    %76 = arith.subf %74, %75 : vector<8x1xf32>
    %77 = vector.broadcast %69 : vector<8x1xf32> to vector<8x128xf32>
    %78 = arith.subf %62, %77 : vector<8x128xf32>
    %cst_81 = arith.constant 9.99999974E-6 : f32
    %79 = vector.broadcast %cst_81 : f32 to vector<8x1xf32>
    %80 = arith.addf %76, %79 : vector<8x1xf32>
    %81 = math.rsqrt %80 : vector<8x1xf32>
    %82 = vector.broadcast %81 : vector<8x1xf32> to vector<8x128xf32>
    %83 = arith.mulf %78, %82 : vector<8x128xf32>
    %cst_82 = arith.constant 0.000000e+00 : f32
    %84 = vector.broadcast %cst_82 : f32 to vector<8x128xf32>
    %85 = arith.cmpf oge, %83, %84 : vector<8x128xf32>
    %cst_83 = arith.constant 2.000000e-02 : f32
    %86 = vector.broadcast %cst_83 : f32 to vector<8x128xf32>
    %87 = arith.mulf %86, %83 : vector<8x128xf32>
    %88 = arith.select %85, %83, %87 : vector<8x128xi1>, vector<8x128xf32>
    %89 = arith.truncf %88 : vector<8x128xf32> to vector<8x128xbf16>
    %c0_84 = arith.constant 0 : index
    %c0_85 = arith.constant 0 : index
    %c0_86 = arith.constant 0 : index
    %90 = vector.load %arg5[%c0_84, %c0_85, %c0_86] : memref<1x8x128xbf16, #tpu.memory_space<vmem>>, vector<1x8x128xbf16>
    %91 = vector.shape_cast %90 : vector<1x8x128xbf16> to vector<8x128xbf16>
    %92 = vector.shape_cast %89 : vector<8x128xbf16> to vector<1x8x128xbf16>
    tpu.vector_store %arg5[%c0_84, %c0_85, %c0_86], %92 {strides = array<i32>} : memref<1x8x128xbf16, #tpu.memory_space<vmem>>, vector<1x8x128xbf16>,
    return
  }
  func.func @transform_0(%arg0: i32, %arg1: i32) -> (i32, i32, i32) {
    %c0_i32 = arith.constant 0 : i32
    %c0_i32_0 = arith.constant 0 : i32
    %c0_i32_1 = arith.constant 0 : i32
    return %c0_i32, %arg1, %c0_i32_0 : i32, i32, i32
  }
  func.func @transform_1(%arg0: i32, %arg1: i32) -> (i32, i32) {
    %c0_i32 = arith.constant 0 : i32
    %c0_i32_0 = arith.constant 0 : i32
    %c0_i32_1 = arith.constant 0 : i32
    return %c0_i32, %c0_i32_0 : i32, i32
  }
  func.func @transform_2(%arg0: i32, %arg1: i32) -> (i32, i32, i32) {
    %c0_i32 = arith.constant 0 : i32
    %c0_i32_0 = arith.constant 0 : i32
    %c0_i32_1 = arith.constant 0 : i32
    return %arg0, %c0_i32, %c0_i32_0 : i32, i32, i32
  }
  func.func @transform_3(%arg0: i32, %arg1: i32) -> (i32, i32, i32) {
    %c0_i32 = arith.constant 0 : i32
    %c0_i32_0 = arith.constant 0 : i32
    return %arg0, %arg1, %c0_i32 : i32, i32, i32
  }
}

module attributes {stable_mosaic.version = 11 : i64} {
  func.func @_matmul_bias_sigmoid_kernel(%arg0: i32, %arg1: memref<2x1024xbf16, #tpu.memory_space<vmem>>, %arg2: memref<1024x8xbf16, #tpu.memory_space<vmem>>, %arg3: memref<1x8xf32, #tpu.memory_space<vmem>>, %arg4: memref<2x8xf32, #tpu.memory_space<vmem>>) attributes {dimension_semantics = [#tpu.dimension_semantics<arbitrary>], iteration_bounds = array<i64: 1>, scalar_prefetch = 0 : i64, scratch_operands = 0 : i64, tpu.core_type = #tpu.core_type<tc>, window_params = [{pipeline_mode = #tpu.pipeline_mode<synchronous>, transform_indices = @transform_0, window_bounds = array<i64: 2, 1024>}, {pipeline_mode = #tpu.pipeline_mode<synchronous>, transform_indices = @transform_1, window_bounds = array<i64: 1024, 8>}, {pipeline_mode = #tpu.pipeline_mode<synchronous>, transform_indices = @transform_2, window_bounds = array<i64: 1, 8>}, {pipeline_mode = #tpu.pipeline_mode<synchronous>, transform_indices = @transform_3, window_bounds = array<i64: 2, 8>}]} {
    %c0 = arith.constant 0 : index
    %c0_0 = arith.constant 0 : index
    %0 = vector.load %arg1[%c0, %c0_0] : memref<2x1024xbf16, #tpu.memory_space<vmem>>, vector<2x1024xbf16>
    %c0_1 = arith.constant 0 : index
    %c0_2 = arith.constant 0 : index
    %1 = vector.load %arg2[%c0_1, %c0_2] : memref<1024x8xbf16, #tpu.memory_space<vmem>>, vector<1024x8xbf16>
    %cst = arith.constant dense<0.000000e+00> : vector<2x8xf32>
    %2 = tpu.matmul %0, %1, %cst {dimension_numbers = #tpu.dot_dimension_numbers<[1], [0], [0], [1], [0, 0, 1, 1], [], []>} : vector<2x1024xbf16>, vector<1024x8xbf16>, vector<2x8xf32> -> vector<2x8xf32>
    %c0_3 = arith.constant 0 : index
    %c0_4 = arith.constant 0 : index
    %3 = vector.load %arg3[%c0_3, %c0_4] : memref<1x8xf32, #tpu.memory_space<vmem>>, vector<1x8xf32>
    %4 = vector.broadcast %3 : vector<1x8xf32> to vector<2x8xf32>
    %5 = arith.addf %2, %4 : vector<2x8xf32>
    %6 = arith.negf %5 : vector<2x8xf32>
    %7 = math.exp %6 : vector<2x8xf32>
    %cst_5 = arith.constant 1.000000e+00 : f32
    %8 = vector.broadcast %cst_5 : f32 to vector<2x8xf32>
    %9 = arith.addf %8, %7 : vector<2x8xf32>
    %10 = arith.divf %8, %9 : vector<2x8xf32>
    %c0_6 = arith.constant 0 : index
    %c0_7 = arith.constant 0 : index
    %11 = vector.load %arg4[%c0_6, %c0_7] : memref<2x8xf32, #tpu.memory_space<vmem>>, vector<2x8xf32>
    tpu.vector_store %arg4[%c0_6, %c0_7], %10 {strides = array<i32>} : memref<2x8xf32, #tpu.memory_space<vmem>>, vector<2x8xf32>,
    return
  }
  func.func @transform_0(%arg0: i32) -> (i32, i32) {
    %c0_i32 = arith.constant 0 : i32
    %c0_i32_0 = arith.constant 0 : i32
    %c0_i32_1 = arith.constant 0 : i32
    return %c0_i32, %c0_i32_0 : i32, i32
  }
  func.func @transform_1(%arg0: i32) -> (i32, i32) {
    %c0_i32 = arith.constant 0 : i32
    %c0_i32_0 = arith.constant 0 : i32
    %c0_i32_1 = arith.constant 0 : i32
    return %c0_i32, %c0_i32_0 : i32, i32
  }
  func.func @transform_2(%arg0: i32) -> (i32, i32) {
    %c0_i32 = arith.constant 0 : i32
    %c0_i32_0 = arith.constant 0 : i32
    %c0_i32_1 = arith.constant 0 : i32
    return %c0_i32, %c0_i32_0 : i32, i32
  }
  func.func @transform_3(%arg0: i32) -> (i32, i32) {
    %c0_i32 = arith.constant 0 : i32
    %c0_i32_0 = arith.constant 0 : i32
    %c0_i32_1 = arith.constant 0 : i32
    return %c0_i32, %c0_i32_0 : i32, i32
  }
}

</mosaic_0001>

<bundles_post_ra>
// kernel: encoder_forward.4
= control target key start
LH: loop header
LB: loop body
LE: loop exit
PB: predicated region body
PF: predicated region fallthrough
CT: control target
= control target key end

     0   :  { %7 = vsyncpa [#allocation3], 0  ;;  %s3649_s0 = inlined_call_operand.hbm [shape: bf16[4,64], index: 0, kind: input, shape index: {}]   ;;  %s3650_s1 = inlined_call_operand.hbm [shape: bf16[2,64,4096], index: 1, kind: input, shape index: {}]   ;;  %s3651_s2 = inlined_call_operand.hbm [shape: bf16[2,4,4096], index: 2, kind: output, shape index: {}]  }
   0x1   :  { %8 = vsyncpa [#allocation6], 0 }
   0x2   :  { %10 = vsyncpa [#allocation6 + $0x1], 0 }
   0x3   :  { %11 = vsyncpa [#allocation4], 0 }
   0x4   :  { %13 = vsyncpa [#allocation4 + $0x1], 0  ;;  %s2709_s9 = smov 0   ;;  %s2711_s10 = smov 0  }
   0x5   :  { %s2713_s11 = smov 0   ;;  %s2715_s12 = smov 0  }
   0x6   :  { %s2717_s13 = smov 0   ;;  %s2719_s14 = smov 0  }
   0x7 LB: > { %s2283_s15 = sadd.s32 4294967295, %s2685_s14   ;;  %s2284_s16 = sadd.s32 4294967294, %s2685_s14   ;;  %s2685_s14 = sphi %s2719_s14, %s19_s14   ;;  %s2681_s13 = sphi %s2717_s13, %s3693_s13   ;;  %s2677_s12 = sphi %s2715_s12, %s3692_s12   ;;  %s2673_s11 = sphi %s2713_s11, %s3691_s11   ;;  %s2669_s10 = sphi %s2711_s10, %s3690_s10   ;;  %s2665_s9 = sphi %s2709_s9, %s3689_s9  }
   0x8   : > { %s64_s17 = sadd.s32 1, %s2673_s11  ;;  %p71_p0 = scmp.ne.s32.totalorder %s2673_s11, %s2669_s10 }
   0x9   : > { %p72_p1 = scmp.eq.s32.totalorder %s2685_s14, 0  ;;  %p77_p2 = scmp.ne.s32.totalorder %s2669_s10, %s2665_s9 }
   0xa   : > { %p2747_p3 = scmp.eq.s32.totalorder %s2283_s15, 0  ;;  %p103_p4 = scmp.eq.s32.totalorder %s2283_s15, 1 }
   0xb   : > { %p2751_p5 = por %p72_p1, %p71_p0  ;;  %p109_p6 = scmp.eq.s32.totalorder %s2284_s16, 1 }
   0xc   : > { %s3658_s18 = scalar_select %p2747_p3, 1, 0 }
   0xd   : > { %p2757_p7 = por %p2747_p3, %p77_p2  ;;  %p2761_p8 = por %p103_p4, %p71_p0 }
   0xe   : > { %p2765_p9 = por %p109_p6, %p77_p2  ;;  %p2285_p10 = scmp.ge.s32.totalorder %s2685_s14, 1 }
   0xf   : > { %s3660_s20 = scalar_select %p2757_p7, 1, 0 }
  0x10   : > { %s3661_s21 = scalar_select %p2761_p8, 1, 0 }
  0x11   : > { %s3662_s22 = scalar_select %p2765_p9, 1, 0 }
  0x12   : > { %p116_p11 = scmp.lt.s32.totalorder %s2685_s14, 3  ;;  %s2687_s24 = smov [#allocation2]  }
  0x13   : > { %s131_s25 = sshll.u32 %s2687_s24, 4  ;;  %p2483_p1 = scmp.lt.s32.totalorder %s2685_s14, 2  ;;  %s132_s25 = int_to_ptr.vmem [resolvable:$true] %s131_s25 }
  0x14   : > { %p2772_p13 = pnand %p2285_p10, %p116_p11  ;;  %s31_s28 = sadd.s32 1, %s2681_s13 }
  0x15   : > { %p2781_p4 = pnand %p2483_p1, %p2751_p5  ;;  %p2792_p6 = scmp.ge.s32.totalorder %s31_s28, 2 }
  0x16   : > { %s3663_s23 = scalar_select %p2772_p13, 1, 0 }
  0x17   : > { %p2470_p0 = pneg %p2772_p13  ;;  %s142_s30 = sand.u32 1, %s2673_s11  }
  0x18   : > { %s3664_s26 = scalar_select %p2781_p4, 1, 0 }
  0x19   : > { %p2787_p2 = pnand %p2470_p0, %p2747_p3  ;;  %s2541_s5 = scalar_lea.hbm %s3649_s0, 32 }
  0x1a   : > { %s3666_s29 = scalar_select %p2792_p6, 1, 0 }
  0x1b   : > { %p2542_p5 = scmp.ne.s32.totalorder %s3649_s0, %s2541_s5  ;;  %p2543_p10 = pneg %p2787_p2 }
  0x1c   : > { %p2548_p0 = scmp.lt.u32.totalorder %s2541_s5, %s3649_s0 }
  0x1d   : > { %p2544_p11 = pnand %p2543_p10, %p2542_p5 }
  0x1f   : > { %p2545_p1 = pneg %p2544_p11 }
  0x21   : > { %p2550_p12 = pnand %p2548_p0, %p2545_p1 }
  0x23   : > { %2553 = shalt.err (!%p2550_p12)
}
  0x24   : > { %s2554_s16 = scalar_lea.vmem %s132_s25, 32  ;;  %p2562_p3 = scmp.lt.s32.totalorder %s132_s25, %s132_s25 }
  0x25   : > { %p2555_p9 = scmp.ne.s32.totalorder %s132_s25, %s2554_s16  ;;  %p2563_p13 = scmp.lt.s32.totalorder %s2554_s16, %s2554_s16 }
  0x27   : > { %p2557_p8 = pnand %p2555_p9, %p2543_p10  ;;  %p2564_p4 = por %p2563_p13, %p2562_p3 }
  0x29   : > { %p2558_p7 = pneg %p2557_p8 }
  0x2b   : > { %p2565_p6 = pnand %p2564_p4, %p2558_p7 }
  0x2d   : > { %2568 = shalt.err (!%p2565_p6)
}
  0x2e   : > { %2473 = dma.hbm_to_vmem [thread:$0]  (!%p2787_p2), %s3649_s0, 32, %s132_s25, [#allocation3]  }
  0x2f   : > { %p3667_p9 = scmp.ne.s32.totalorder %s3666_s29, 0  ;;  %s2288_s3 = sshll.u32 %s142_s30, 10 }
  0x30   : > { %s2460_s5 = sshll.u32 %s2681_s13, 14  ;;  %s146_s8 = scalar_lea.vmem [#allocation5], %s2288_s3 }
  0x31   : > { %s3695_s28 = smov (%p3667_p9, %s31_s28), 0  ;;  %s2823_s7 = scalar_lea.hbm %s3650_s1, %s2460_s5 }
  0x32   : > { %s61_s4 = ssub.s32 %s2681_s13, %s3695_s28  ;;  %s153_s15 = sshll.u32 %s146_s8, 4  ;;  %s2830_s15 = int_to_ptr.vmem [resolvable:$true] %s153_s15 }
  0x33   : > { %p62_p3 = scmp.eq.s32.totalorder %s61_s4, 0  ;;  %s2832_s29 = scalar_lea.sflag [#allocation6], %s142_s30 }
  0x34   : > { %s2569_s16 = scalar_lea.hbm %s2823_s7, 16384  ;;  %p3668_p8 = scmp.ne.s32.totalorder %s3664_s26, 0 }
  0x35   : > { %s2828_s25 = scalar_select %p62_p3, %s2673_s11, %s64_s17  }
  0x36   : > { %p2570_p7 = scmp.ne.s32.totalorder %s2823_s7, %s2569_s16  ;;  %p2571_p12 = pneg %p3668_p8 }
  0x37   : > { %s2574_s3 = scalar_lea.hbm %s3650_s1, 32768  ;;  %p2575_p2 = scmp.lt.u32.totalorder %s2823_s7, %s3650_s1 }
  0x38   : > { %p2572_p13 = pnand %p2571_p12, %p2570_p7  ;;  %p2576_p6 = scmp.lt.u32.totalorder %s2574_s3, %s2569_s16 }
  0x39   : > { %p2578_p10 = scmp.lt.u32.totalorder %s2569_s16, %s2823_s7 }
  0x3a   : > { %p2573_p4 = pneg %p2572_p13  ;;  %p2577_p5 = por %p2576_p6, %p2575_p2 }
  0x3c   : > { %p2579_p11 = por %p2578_p10, %p2577_p5 }
  0x3e   : > { %p2580_p1 = pnand %p2579_p11, %p2573_p4 }
  0x40   : > { %2583 = shalt.err (!%p2580_p1)
}
  0x41   : > { %s2584_s17 = scalar_lea.vmem %s2830_s15, 16384  ;;  %s2688_s30 = smov [#allocation5]  }
  0x42   : > { %p2585_p0 = scmp.ne.s32.totalorder %s2830_s15, %s2584_s17  ;;  %s2589_s27 = sshll.u32 %s2688_s30, 4  ;;  %s2590_s27 = int_to_ptr.vmem [resolvable:$false] %s2589_s27 }
  0x43   : > { %s2591_s6 = scalar_lea.vmem %s2590_s27, 32768  ;;  %p2592_p7 = scmp.lt.s32.totalorder %s2830_s15, %s2590_s27 }
  0x44   : > { %p2587_p9 = pnand %p2585_p0, %p2571_p12  ;;  %p2593_p13 = scmp.lt.s32.totalorder %s2591_s6, %s2584_s17 }
  0x46   : > { %p2588_p3 = pneg %p2587_p9  ;;  %p2594_p2 = por %p2593_p13, %p2592_p7 }
  0x48   : > { %p2595_p6 = pnand %p2594_p2, %p2588_p3 }
  0x4a   : > { %2598 = shalt.err (!%p2595_p6)
}
  0x4b   : > { %s2689_s8 = smov 2048   ;;  %s2690_s16 = smov 128  }
  0x4c   : > { %2477 = dma.hbm_to_vmem [thread:$0]  (!%p3668_p8), %s2823_s7, 16384, %s2830_s15, %s2832_s29, %s2689_s8, %s2689_s8, %s2690_s16  }
  0x4d   : > { %p3669_p12 = scmp.ne.s32.totalorder %s3663_s23, 0 }
  0x4e   : > { %p3670_p4 = scmp.ne.s32.totalorder (!%p3669_p12), %s3658_s18, 0 }
  0x4f   : > { %165 = sbr.rel (%p3669_p12) target bundleno = 667 (0x29b), region = 28 }
  0x56   : > { %2652 = dma.done.wait (%p3670_p4), [#allocation3], 32  }
  0x57   : > { %2654 = vsyncadd (%p3670_p4), [#allocation3], 4294967264  ;;  %s2867_s19 = sand.u32 1, %s2669_s10   ;;  %p3671_p8 = scmp.ne.s32.totalorder %s3660_s20, 0 }
  0x58   : > { %s2293_s24 = sshll.u32 %s2867_s19, 10  ;;  %s172_s3 = scalar_lea.sflag [#allocation6], %s2867_s19 }
  0x59   : > { %s2871_s4 = scalar_lea.vmem [#allocation5], %s2293_s24 }
  0x5a   : > { %2656 = dma.done.wait (%p3671_p8), %s172_s3, 16384  }
  0x5b   : > { %2658 = vsyncadd (%p3671_p8), %s172_s3, 4294950912  ;;  %v2691_v0 = vmov 0   ;;  %v198_v1 = vld [vmem:[%s2871_s4] sm:$0xff]  ;;  %v199_v3 = vld [vmem:[%s2871_s4 + $0x8] sm:$0xff]  ;;  %vm966_vm0 = vcmask 523264   ;;  %vm1626_vm1 = vcmask 1043456  }
  0x5c   : > { %1002 = vmatprep.mubr.bf16.mxu0 %v2691_v0  ;;  %1043 = vmatprep.mubr.bf16.mxu1 %v2691_v0  ;;  %v214_v2 = vld [vmem:[%s2871_s4 + $0x80] sm:$0xff]  ;;  %v215_v6 = vld [vmem:[%s2871_s4 + $0x88] sm:$0xff]  ;;  %v200_v31 = vld [vmem:[%s2871_s4 + $0x10] sm:$0xff]  ;;  %s2294_s18 = sshll.u32 %s2867_s19, 6  ;;  %s2461_s23 = sshll.u32 %s2677_s12, 10 }
  0x5d   : > { %v2296_v4 = vcombine.high %v198_v1, %v214_v2  ;;  %v2295_v5 = vcombine.low %v198_v1, %v214_v2  ;;  %v230_v7 = vld [vmem:[%s2871_s4 + $0x100] sm:$0xff]  ;;  %v2298_v9 = vcombine.high %v199_v3, %v215_v6  ;;  %v2297_v10 = vcombine.low %v199_v3, %v215_v6  ;;  %v231_v12 = vld [vmem:[%s2871_s4 + $0x108] sm:$0xff]  ;;  %v216_v32 = vld [vmem:[%s2871_s4 + $0x90] sm:$0xff]  ;;  %s195_s20 = scalar_lea.vmem [#allocation7], %s2294_s18  ;;  %s3600_s29 = scalar_lea.hbm %s3651_s2, %s2461_s23 }
  0x5e   : > { %v246_v8 = vld [vmem:[%s2871_s4 + $0x180] sm:$0xff]  ;;  %v247_v13 = vld [vmem:[%s2871_s4 + $0x188] sm:$0xff]  ;;  %v201_v33 = vld [vmem:[%s2871_s4 + $0x18] sm:$0xff]  ;;  %v2300_v37 = vcombine.high %v200_v31, %v216_v32  ;;  %v2299_v44 = vcombine.low %v200_v31, %v216_v32  ;;  %s2188_s26 = sshll.u32 %s195_s20, 4  ;;  %s2172_s12 = scalar_lea.sflag [#allocation4], %s2867_s19  ;;  %s3602_s26 = int_to_ptr.vmem [resolvable:$true] %s2188_s26 }
  0x5f   : > { %v2328_v11 = vcombine.high %v230_v7, %v246_v8  ;;  %v262_v14 = vld [vmem:[%s2871_s4 + $0x200] sm:$0xff]  ;;  %970 = vmatprep.subr.bf16.mxu0 %v2296_v4  ;;  %v2330_v15 = vcombine.high %v231_v12, %v247_v13  ;;  %v263_v17 = vld [vmem:[%s2871_s4 + $0x208] sm:$0xff]  ;;  %1011 = vmatprep.subr.bf16.mxu1 %v2298_v9  ;;  %v2327_v19 = vcombine.low %v230_v7, %v246_v8  ;;  %v217_v34 = vld [vmem:[%s2871_s4 + $0x98] sm:$0xff]  ;;  %s2599_s5 = scalar_lea.vmem %s3602_s26, 1024  ;;  %p3686_p10 = scmp.ne.s32.totalorder %s3661_s21, 0 }
  0x60   : > { %v278_v16 = vld [vmem:[%s2871_s4 + $0x280] sm:$0xff]  ;;  %v279_v18 = vld [vmem:[%s2871_s4 + $0x288] sm:$0xff]  ;;  %971 = vmatpush1.bf16.msra.mxu0 %v2295_v5  ;;  %1012 = vmatpush1.bf16.msra.mxu1 %v2297_v10  ;;  %v2329_v20 = vcombine.low %v231_v12, %v247_v13  ;;  %v2302_v38 = vcombine.high %v201_v33, %v217_v34  ;;  %v232_v39 = vld [vmem:[%s2871_s4 + $0x110] sm:$0xff]  ;;  %v2301_v45 = vcombine.low %v201_v33, %v217_v34  ;;  %p2600_p5 = scmp.ne.s32.totalorder %s3602_s26, %s2599_s5  ;;  %s2693_s17 = smov [#allocation7]  }
  0x61   : > { %972 = vmatprep.subr.bf16.mxu0 %v2328_v11  ;;  %v2360_v21 = vcombine.high %v262_v14, %v278_v16  ;;  %1013 = vmatprep.subr.bf16.mxu1 %v2330_v15  ;;  %v2362_v22 = vcombine.high %v263_v17, %v279_v18  ;;  %v294_v23 = vld [vmem:[%s2871_s4 + $0x300] sm:$0xff]  ;;  %v295_v25 = vld [vmem:[%s2871_s4 + $0x308] sm:$0xff]  ;;  %v2359_v27 = vcombine.low %v262_v14, %v278_v16  ;;  %v248_v40 = vld [vmem:[%s2871_s4 + $0x190] sm:$0xff]  ;;  %s2603_s30 = sshll.u32 %s2693_s17, 4  ;;  %s2604_s30 = int_to_ptr.vmem [resolvable:$false] %s2603_s30 }
  0x62   : > { %v310_v24 = vld [vmem:[%s2871_s4 + $0x380] sm:$0xff]  ;;  %v311_v26 = vld [vmem:[%s2871_s4 + $0x388] sm:$0xff]  ;;  %v2361_v28 = vcombine.low %v263_v17, %v279_v18  ;;  %v233_v41 = vld [vmem:[%s2871_s4 + $0x118] sm:$0xff]  ;;  %v2332_v46 = vcombine.high %v232_v39, %v248_v40  ;;  %v2331_v52 = vcombine.low %v232_v39, %v248_v40  ;;  %p2601_p11 = pnand %p2600_p5, %p3686_p10  ;;  %s2605_s27 = scalar_lea.vmem %s2604_s30, 2048 }
  0x63   : > { %v2392_v29 = vcombine.high %v294_v23, %v310_v24  ;;  %v2394_v30 = vcombine.high %v295_v25, %v311_v26  ;;  %v2391_v35 = vcombine.low %v294_v23, %v310_v24  ;;  %v2393_v36 = vcombine.low %v295_v25, %v311_v26  ;;  %v249_v42 = vld [vmem:[%s2871_s4 + $0x198] sm:$0xff]  ;;  %v264_v48 = vld [vmem:[%s2871_s4 + $0x210] sm:$0xff]  ;;  %v202_v1 = vld [vmem:[%s2871_s4 + $0x20] sm:$0xff]  ;;  %p2606_p0 = scmp.lt.s32.totalorder %s3602_s26, %s2604_s30  ;;  %p2607_p9 = scmp.lt.s32.totalorder %s2605_s27, %s2599_s5 }
  0x64   : > { %973 = vmatpush1.bf16.msra.mxu0 %v2327_v19  ;;  %1014 = vmatpush1.bf16.msra.mxu1 %v2329_v20  ;;  %v2903_v43 = vld [vmem:[#allocation2] sm:$0x3]  ;;  %v2334_v47 = vcombine.high %v233_v41, %v249_v42  ;;  %v280_v49 = vld [vmem:[%s2871_s4 + $0x290] sm:$0xff]  ;;  %v2333_v53 = vcombine.low %v233_v41, %v249_v42  ;;  %v218_v2 = vld [vmem:[%s2871_s4 + $0xa0] sm:$0xff]  ;;  %p2602_p1 = pneg %p2601_p11 }
  0x65   : > { %974 = vmatprep.subr.bf16.mxu0 %v2360_v21  ;;  %1015 = vmatprep.subr.bf16.mxu1 %v2362_v22  ;;  %v265_v50 = vld [vmem:[%s2871_s4 + $0x218] sm:$0xff]  ;;  %v2364_v54 = vcombine.high %v264_v48, %v280_v49  ;;  %v296_v56 = vld [vmem:[%s2871_s4 + $0x310] sm:$0xff]  ;;  %v2363_v60 = vcombine.low %v264_v48, %v280_v49  ;;  %v203_v3 = vld [vmem:[%s2871_s4 + $0x28] sm:$0xff]  ;;  %v2304_v7 = vcombine.high %v202_v1, %v218_v2  ;;  %p2608_p3 = por %p2607_p9, %p2606_p0 }
  0x66   : > { %v281_v51 = vld [vmem:[%s2871_s4 + $0x298] sm:$0xff]  ;;  %v312_v57 = vld [vmem:[%s2871_s4 + $0x390] sm:$0xff]  ;;  %v219_v4 = vld [vmem:[%s2871_s4 + $0xa8] sm:$0xff]  ;;  %v2303_v13 = vcombine.low %v202_v1, %v218_v2 }
  0x67   : > { %v2366_v55 = vcombine.high %v265_v50, %v281_v51  ;;  %v297_v58 = vld [vmem:[%s2871_s4 + $0x318] sm:$0xff]  ;;  %v2365_v61 = vcombine.low %v265_v50, %v281_v51  ;;  %v2396_v62 = vcombine.high %v296_v56, %v312_v57  ;;  %v2395_v5 = vcombine.low %v296_v56, %v312_v57  ;;  %v234_v9 = vld [vmem:[%s2871_s4 + $0x120] sm:$0xff]  ;;  %v235_v11 = vld [vmem:[%s2871_s4 + $0x128] sm:$0xff]  ;;  %p2609_p7 = pnand %p2608_p3, %p2602_p1 }
  0x68   : > { %975 = vmatpush1.bf16.msra.mxu0 %v2359_v27  ;;  %1016 = vmatpush1.bf16.msra.mxu1 %v2361_v28  ;;  %v313_v59 = vld [vmem:[%s2871_s4 + $0x398] sm:$0xff]  ;;  %v2306_v8 = vcombine.high %v203_v3, %v219_v4  ;;  %v250_v10 = vld [vmem:[%s2871_s4 + $0x1a0] sm:$0xff]  ;;  %v251_v12 = vld [vmem:[%s2871_s4 + $0x1a8] sm:$0xff]  ;;  %v2305_v14 = vcombine.low %v203_v3, %v219_v4 }
  0x69   : > { %976 = vmatprep.subr.bf16.mxu0 %v2392_v29  ;;  %1017 = vmatprep.subr.bf16.mxu1 %v2394_v30  ;;  %v2398_v63 = vcombine.high %v297_v58, %v313_v59  ;;  %v2397_v6 = vcombine.low %v297_v58, %v313_v59  ;;  %v2336_v15 = vcombine.high %v234_v9, %v250_v10  ;;  %v266_v17 = vld [vmem:[%s2871_s4 + $0x220] sm:$0xff]  ;;  %v267_v19 = vld [vmem:[%s2871_s4 + $0x228] sm:$0xff]  ;;  %v204_v33 = vld [vmem:[%s2871_s4 + $0x30] sm:$0xff] }
  0x6a   : > { %v2338_v16 = vcombine.high %v235_v11, %v251_v12  ;;  %v282_v18 = vld [vmem:[%s2871_s4 + $0x2a0] sm:$0xff]  ;;  %v283_v20 = vld [vmem:[%s2871_s4 + $0x2a8] sm:$0xff]  ;;  %v2335_v21 = vcombine.low %v234_v9, %v250_v10  ;;  %v2337_v22 = vcombine.low %v235_v11, %v251_v12  ;;  %v220_v34 = vld [vmem:[%s2871_s4 + $0xb0] sm:$0xff] }
  0x6b   : > { %v2368_v23 = vcombine.high %v266_v17, %v282_v18  ;;  %v2370_v24 = vcombine.high %v267_v19, %v283_v20  ;;  %v298_v25 = vld [vmem:[%s2871_s4 + $0x320] sm:$0xff]  ;;  %v299_v27 = vld [vmem:[%s2871_s4 + $0x328] sm:$0xff]  ;;  %v2367_v29 = vcombine.low %v266_v17, %v282_v18  ;;  %v2369_v30 = vcombine.low %v267_v19, %v283_v20  ;;  %v236_v41 = vld [vmem:[%s2871_s4 + $0x130] sm:$0xff] }
  0x6c   : > { %977 = vmatpush1.bf16.msra.mxu0 %v2391_v35  ;;  %1018 = vmatpush1.bf16.msra.mxu1 %v2393_v36  ;;  %v314_v26 = vld [vmem:[%s2871_s4 + $0x3a0] sm:$0xff]  ;;  %v315_v28 = vld [vmem:[%s2871_s4 + $0x3a8] sm:$0xff]  ;;  %v205_v35 = vld [vmem:[%s2871_s4 + $0x38] sm:$0xff]  ;;  %v2308_v39 = vcombine.high %v204_v33, %v220_v34 }
  0x6d   : > { %1052 = vmatprep.subr.bf16.mxu0 %v2300_v37  ;;  %1093 = vmatprep.subr.bf16.mxu1 %v2302_v38  ;;  %v2400_v31 = vcombine.high %v298_v25, %v314_v26  ;;  %v2402_v32 = vcombine.high %v299_v27, %v315_v28  ;;  %v221_v36 = vld [vmem:[%s2871_s4 + $0xb8] sm:$0xff]  ;;  %v2399_v37 = vcombine.low %v298_v25, %v314_v26  ;;  %v252_v42 = vld [vmem:[%s2871_s4 + $0x1b0] sm:$0xff]  ;;  %v206_v3 = vld [vmem:[%s2871_s4 + $0x40] sm:$0xff] }
  0x6e   : > { %v2401_v38 = vcombine.low %v299_v27, %v315_v28  ;;  %v2310_v40 = vcombine.high %v205_v35, %v221_v36  ;;  %v2340_v48 = vcombine.high %v236_v41, %v252_v42  ;;  %v268_v50 = vld [vmem:[%s2871_s4 + $0x230] sm:$0xff]  ;;  %v222_v4 = vld [vmem:[%s2871_s4 + $0xc0] sm:$0xff] }
  0x6f   : > { %2423 = vmatmul.mubr.msk.bf16.vlgmr.msra.gmra.mrb[0].mxu0 %vm966_vm0, %v2903_v43  ;;  %2424 = vmatmul.mubr.msk.bf16.vlgmr.msra.gmra.mrb[0].mxu1 %vm966_vm0, %v2903_v43  ;;  %v284_v51 = vld [vmem:[%s2871_s4 + $0x2b0] sm:$0xff]  ;;  %v2312_v9 = vcombine.high %v206_v3, %v222_v4  ;;  %v238_v11 = vld [vmem:[%s2871_s4 + $0x140] sm:$0xff] }
  0x70   : > { %1053 = vmatpush1.bf16.msra.mxu0 %v2299_v44  ;;  %1094 = vmatpush1.bf16.msra.mxu1 %v2301_v45  ;;  %v237_v44 = vld [vmem:[%s2871_s4 + $0x138] sm:$0xff]  ;;  %v2372_v56 = vcombine.high %v268_v50, %v284_v51  ;;  %v300_v58 = vld [vmem:[%s2871_s4 + $0x330] sm:$0xff]  ;;  %v254_v12 = vld [vmem:[%s2871_s4 + $0x1c0] sm:$0xff] }
  0x71   : > { %1054 = vmatprep.subr.bf16.mxu0 %v2332_v46  ;;  %1095 = vmatprep.subr.bf16.mxu1 %v2334_v47  ;;  %v253_v45 = vld [vmem:[%s2871_s4 + $0x1b8] sm:$0xff]  ;;  %v2307_v46 = vcombine.low %v204_v33, %v220_v34  ;;  %v2309_v47 = vcombine.low %v205_v35, %v221_v36  ;;  %v316_v59 = vld [vmem:[%s2871_s4 + $0x3b0] sm:$0xff]  ;;  %v2344_v17 = vcombine.high %v238_v11, %v254_v12  ;;  %v270_v19 = vld [vmem:[%s2871_s4 + $0x240] sm:$0xff] }
  0x72   : > { %1084 = vmatprep.mubr.bf16.mxu0 %v2691_v0  ;;  %1125 = vmatprep.mubr.bf16.mxu1 %v2691_v0  ;;  %v2342_v49 = vcombine.high %v237_v44, %v253_v45  ;;  %v2404_v1 = vcombine.high %v300_v58, %v316_v59  ;;  %v286_v20 = vld [vmem:[%s2871_s4 + $0x2c0] sm:$0xff]  ;;  %v208_v35 = vld [vmem:[%s2871_s4 + $0x50] sm:$0xff] }
  0x73   : > { %v2376_v25 = vcombine.high %v270_v19, %v286_v20  ;;  %v302_v27 = vld [vmem:[%s2871_s4 + $0x340] sm:$0xff]  ;;  %v224_v36 = vld [vmem:[%s2871_s4 + $0xd0] sm:$0xff] }
  0x74   : > { %1055 = vmatpush1.bf16.msra.mxu0 %v2331_v52  ;;  %1096 = vmatpush1.bf16.msra.mxu1 %v2333_v53  ;;  %v269_v52 = vld [vmem:[%s2871_s4 + $0x238] sm:$0xff]  ;;  %v318_v28 = vld [vmem:[%s2871_s4 + $0x3c0] sm:$0xff] }
  0x75   : > { %1056 = vmatprep.subr.bf16.mxu0 %v2364_v54  ;;  %1097 = vmatprep.subr.bf16.mxu1 %v2366_v55  ;;  %v285_v53 = vld [vmem:[%s2871_s4 + $0x2b8] sm:$0xff]  ;;  %v2339_v54 = vcombine.low %v236_v41, %v252_v42  ;;  %v2341_v55 = vcombine.low %v237_v44, %v253_v45  ;;  %v2408_v33 = vcombine.high %v302_v27, %v318_v28  ;;  %v240_v44 = vld [vmem:[%s2871_s4 + $0x150] sm:$0xff] }
  0x76   : > { %v2374_v57 = vcombine.high %v269_v52, %v285_v53  ;;  %v2316_v41 = vcombine.high %v208_v35, %v224_v36  ;;  %v256_v45 = vld [vmem:[%s2871_s4 + $0x1d0] sm:$0xff] }
  0x78   : > { %1057 = vmatpush1.bf16.msra.mxu0 %v2363_v60  ;;  %1098 = vmatpush1.bf16.msra.mxu1 %v2365_v61  ;;  %v301_v60 = vld [vmem:[%s2871_s4 + $0x338] sm:$0xff] }
  0x79   : > { %1058 = vmatprep.subr.bf16.mxu0 %v2396_v62  ;;  %1099 = vmatprep.subr.bf16.mxu1 %v2398_v63  ;;  %v317_v61 = vld [vmem:[%s2871_s4 + $0x3b8] sm:$0xff]  ;;  %v2371_v62 = vcombine.low %v268_v50, %v284_v51  ;;  %v2373_v63 = vcombine.low %v269_v52, %v285_v53  ;;  %v2348_v50 = vcombine.high %v240_v44, %v256_v45  ;;  %v272_v52 = vld [vmem:[%s2871_s4 + $0x250] sm:$0xff] }
  0x7a   : > { %v2406_v2 = vcombine.high %v301_v60, %v317_v61  ;;  %v288_v53 = vld [vmem:[%s2871_s4 + $0x2d0] sm:$0xff] }
  0x7c   : > { %1059 = vmatpush1.bf16.msra.mxu0 %v2395_v5  ;;  %1100 = vmatpush1.bf16.msra.mxu1 %v2397_v6  ;;  %v207_v5 = vld [vmem:[%s2871_s4 + $0x48] sm:$0xff] }
  0x7d   : > { %1134 = vmatprep.subr.bf16.mxu0 %v2304_v7  ;;  %1175 = vmatprep.subr.bf16.mxu1 %v2306_v8  ;;  %v223_v6 = vld [vmem:[%s2871_s4 + $0xc8] sm:$0xff]  ;;  %v2403_v7 = vcombine.low %v300_v58, %v316_v59  ;;  %v2405_v8 = vcombine.low %v301_v60, %v317_v61  ;;  %v2380_v58 = vcombine.high %v272_v52, %v288_v53  ;;  %v304_v60 = vld [vmem:[%s2871_s4 + $0x350] sm:$0xff] }
  0x7e   : > { %v2314_v10 = vcombine.high %v207_v5, %v223_v6  ;;  %v320_v61 = vld [vmem:[%s2871_s4 + $0x3d0] sm:$0xff] }
  0x7f   : > { %2425 = vmatmul.mubr.msk.bf16.vlgmr.msra.gmra.mrb[4].mxu0 %vm966_vm0, %v2903_v43  ;;  %2426 = vmatmul.mubr.msk.bf16.vlgmr.msra.gmra.mrb[4].mxu1 %vm966_vm0, %v2903_v43 }
  0x80   : > { %1135 = vmatpush1.bf16.msra.mxu0 %v2303_v13  ;;  %1176 = vmatpush1.bf16.msra.mxu1 %v2305_v14  ;;  %v239_v13 = vld [vmem:[%s2871_s4 + $0x148] sm:$0xff] }
  0x81   : > { %1136 = vmatprep.subr.bf16.mxu0 %v2336_v15  ;;  %1177 = vmatprep.subr.bf16.mxu1 %v2338_v16  ;;  %v255_v14 = vld [vmem:[%s2871_s4 + $0x1c8] sm:$0xff]  ;;  %v2311_v15 = vcombine.low %v206_v3, %v222_v4  ;;  %v2313_v16 = vcombine.low %v207_v5, %v223_v6  ;;  %v2412_v3 = vcombine.high %v304_v60, %v320_v61  ;;  %v210_v5 = vld [vmem:[%s2871_s4 + $0x60] sm:$0xff] }
  0x82   : > { %1166 = vmatprep.mubr.bf16.mxu0 %v2691_v0  ;;  %1207 = vmatprep.mubr.bf16.mxu1 %v2691_v0  ;;  %v2346_v18 = vcombine.high %v239_v13, %v255_v14  ;;  %v226_v6 = vld [vmem:[%s2871_s4 + $0xe0] sm:$0xff] }
  0x84   : > { %1137 = vmatpush1.bf16.msra.mxu0 %v2335_v21  ;;  %1178 = vmatpush1.bf16.msra.mxu1 %v2337_v22  ;;  %v271_v21 = vld [vmem:[%s2871_s4 + $0x248] sm:$0xff] }
  0x85   : > { %1138 = vmatprep.subr.bf16.mxu0 %v2368_v23  ;;  %1179 = vmatprep.subr.bf16.mxu1 %v2370_v24  ;;  %v287_v22 = vld [vmem:[%s2871_s4 + $0x2c8] sm:$0xff]  ;;  %v2343_v23 = vcombine.low %v238_v11, %v254_v12  ;;  %v2345_v24 = vcombine.low %v239_v13, %v255_v14  ;;  %v2320_v11 = vcombine.high %v210_v5, %v226_v6  ;;  %v242_v13 = vld [vmem:[%s2871_s4 + $0x160] sm:$0xff] }
  0x86   : > { %v2378_v26 = vcombine.high %v271_v21, %v287_v22  ;;  %v258_v14 = vld [vmem:[%s2871_s4 + $0x1e0] sm:$0xff] }
  0x88   : > { %1139 = vmatpush1.bf16.msra.mxu0 %v2367_v29  ;;  %1180 = vmatpush1.bf16.msra.mxu1 %v2369_v30  ;;  %v303_v29 = vld [vmem:[%s2871_s4 + $0x348] sm:$0xff] }
  0x89   : > { %1140 = vmatprep.subr.bf16.mxu0 %v2400_v31  ;;  %1181 = vmatprep.subr.bf16.mxu1 %v2402_v32  ;;  %v319_v30 = vld [vmem:[%s2871_s4 + $0x3c8] sm:$0xff]  ;;  %v2375_v31 = vcombine.low %v270_v19, %v286_v20  ;;  %v2377_v32 = vcombine.low %v271_v21, %v287_v22  ;;  %v2352_v19 = vcombine.high %v242_v13, %v258_v14  ;;  %v274_v21 = vld [vmem:[%s2871_s4 + $0x260] sm:$0xff] }
  0x8a   : > { %v2410_v34 = vcombine.high %v303_v29, %v319_v30  ;;  %v290_v22 = vld [vmem:[%s2871_s4 + $0x2e0] sm:$0xff] }
  0x8c   : > { %1141 = vmatpush1.bf16.msra.mxu0 %v2399_v37  ;;  %1182 = vmatpush1.bf16.msra.mxu1 %v2401_v38  ;;  %v209_v37 = vld [vmem:[%s2871_s4 + $0x58] sm:$0xff] }
  0x8d   : > { %1216 = vmatprep.subr.bf16.mxu0 %v2308_v39  ;;  %1257 = vmatprep.subr.bf16.mxu1 %v2310_v40  ;;  %v225_v38 = vld [vmem:[%s2871_s4 + $0xd8] sm:$0xff]  ;;  %v2407_v39 = vcombine.low %v302_v27, %v318_v28  ;;  %v2409_v40 = vcombine.low %v303_v29, %v319_v30  ;;  %v2384_v27 = vcombine.high %v274_v21, %v290_v22  ;;  %v306_v29 = vld [vmem:[%s2871_s4 + $0x360] sm:$0xff] }
  0x8e   : > { %v2318_v42 = vcombine.high %v209_v37, %v225_v38  ;;  %v322_v30 = vld [vmem:[%s2871_s4 + $0x3e0] sm:$0xff] }
  0x8f   : > { %2427 = vmatmul.mubr.msk.bf16.vlgmr.msra.gmra.mrb[8].mxu0 %vm966_vm0, %v2903_v43  ;;  %2428 = vmatmul.mubr.msk.bf16.vlgmr.msra.gmra.mrb[8].mxu1 %vm966_vm0, %v2903_v43 }
  0x90   : > { %1217 = vmatpush1.bf16.msra.mxu0 %v2307_v46  ;;  %1258 = vmatpush1.bf16.msra.mxu1 %v2309_v47  ;;  %v241_v46 = vld [vmem:[%s2871_s4 + $0x158] sm:$0xff] }
  0x91   : > { %1218 = vmatprep.subr.bf16.mxu0 %v2340_v48  ;;  %1259 = vmatprep.subr.bf16.mxu1 %v2342_v49  ;;  %v257_v47 = vld [vmem:[%s2871_s4 + $0x1d8] sm:$0xff]  ;;  %v2315_v48 = vcombine.low %v208_v35, %v224_v36  ;;  %v2317_v49 = vcombine.low %v209_v37, %v225_v38  ;;  %v2416_v35 = vcombine.high %v306_v29, %v322_v30  ;;  %v212_v37 = vld [vmem:[%s2871_s4 + $0x70] sm:$0xff] }
  0x92   : > { %1248 = vmatprep.mubr.bf16.mxu0 %v2691_v0  ;;  %1289 = vmatprep.mubr.bf16.mxu1 %v2691_v0  ;;  %v2350_v51 = vcombine.high %v241_v46, %v257_v47  ;;  %v228_v38 = vld [vmem:[%s2871_s4 + $0xf0] sm:$0xff] }
  0x94   : > { %1219 = vmatpush1.bf16.msra.mxu0 %v2339_v54  ;;  %1260 = vmatpush1.bf16.msra.mxu1 %v2341_v55  ;;  %v273_v54 = vld [vmem:[%s2871_s4 + $0x258] sm:$0xff] }
  0x95   : > { %1220 = vmatprep.subr.bf16.mxu0 %v2372_v56  ;;  %1261 = vmatprep.subr.bf16.mxu1 %v2374_v57  ;;  %v289_v55 = vld [vmem:[%s2871_s4 + $0x2d8] sm:$0xff]  ;;  %v2347_v56 = vcombine.low %v240_v44, %v256_v45  ;;  %v2349_v57 = vcombine.low %v241_v46, %v257_v47  ;;  %v2324_v44 = vcombine.high %v212_v37, %v228_v38  ;;  %v244_v46 = vld [vmem:[%s2871_s4 + $0x170] sm:$0xff] }
  0x96   : > { %v2382_v59 = vcombine.high %v273_v54, %v289_v55  ;;  %v260_v47 = vld [vmem:[%s2871_s4 + $0x1f0] sm:$0xff] }
  0x98   : > { %1221 = vmatpush1.bf16.msra.mxu0 %v2371_v62  ;;  %1262 = vmatpush1.bf16.msra.mxu1 %v2373_v63  ;;  %v305_v62 = vld [vmem:[%s2871_s4 + $0x358] sm:$0xff] }
  0x99   : > { %1222 = vmatprep.subr.bf16.mxu0 %v2404_v1  ;;  %1263 = vmatprep.subr.bf16.mxu1 %v2406_v2  ;;  %v321_v63 = vld [vmem:[%s2871_s4 + $0x3d8] sm:$0xff]  ;;  %v2379_v1 = vcombine.low %v272_v52, %v288_v53  ;;  %v2381_v2 = vcombine.low %v273_v54, %v289_v55  ;;  %v2356_v52 = vcombine.high %v244_v46, %v260_v47  ;;  %v276_v54 = vld [vmem:[%s2871_s4 + $0x270] sm:$0xff] }
  0x9a   : > { %v2414_v4 = vcombine.high %v305_v62, %v321_v63  ;;  %v292_v55 = vld [vmem:[%s2871_s4 + $0x2f0] sm:$0xff] }
  0x9c   : > { %1223 = vmatpush1.bf16.msra.mxu0 %v2403_v7  ;;  %1264 = vmatpush1.bf16.msra.mxu1 %v2405_v8  ;;  %v211_v7 = vld [vmem:[%s2871_s4 + $0x68] sm:$0xff] }
  0x9d   : > { %1298 = vmatprep.subr.bf16.mxu0 %v2312_v9  ;;  %1339 = vmatprep.subr.bf16.mxu1 %v2314_v10  ;;  %v227_v8 = vld [vmem:[%s2871_s4 + $0xe8] sm:$0xff]  ;;  %v2411_v9 = vcombine.low %v304_v60, %v320_v61  ;;  %v2413_v10 = vcombine.low %v305_v62, %v321_v63  ;;  %v2388_v60 = vcombine.high %v276_v54, %v292_v55  ;;  %v308_v62 = vld [vmem:[%s2871_s4 + $0x370] sm:$0xff] }
  0x9e   : > { %v2322_v12 = vcombine.high %v211_v7, %v227_v8  ;;  %v324_v63 = vld [vmem:[%s2871_s4 + $0x3f0] sm:$0xff] }
  0x9f   : > { %2429 = vmatmul.mubr.msk.bf16.vlgmr.msra.gmra.mrb[12].mxu0 %vm966_vm0, %v2903_v43  ;;  %2430 = vmatmul.mubr.msk.bf16.vlgmr.msra.gmra.mrb[12].mxu1 %vm966_vm0, %v2903_v43 }
  0xa0   : > { %1299 = vmatpush1.bf16.msra.mxu0 %v2311_v15  ;;  %1340 = vmatpush1.bf16.msra.mxu1 %v2313_v16  ;;  %v243_v15 = vld [vmem:[%s2871_s4 + $0x168] sm:$0xff] }
  0xa1   : > { %1300 = vmatprep.subr.bf16.mxu0 %v2344_v17  ;;  %1341 = vmatprep.subr.bf16.mxu1 %v2346_v18  ;;  %v259_v16 = vld [vmem:[%s2871_s4 + $0x1e8] sm:$0xff]  ;;  %v2319_v17 = vcombine.low %v210_v5, %v226_v6  ;;  %v2321_v18 = vcombine.low %v211_v7, %v227_v8  ;;  %v2420_v5 = vcombine.high %v308_v62, %v324_v63 }
  0xa2   : > { %1330 = vmatprep.mubr.bf16.mxu0 %v2691_v0  ;;  %1371 = vmatprep.mubr.bf16.mxu1 %v2691_v0  ;;  %v2354_v20 = vcombine.high %v243_v15, %v259_v16  ;;  %v2419_v7 = vcombine.low %v308_v62, %v324_v63 }
  0xa4   : > { %1301 = vmatpush1.bf16.msra.mxu0 %v2343_v23  ;;  %1342 = vmatpush1.bf16.msra.mxu1 %v2345_v24  ;;  %v275_v23 = vld [vmem:[%s2871_s4 + $0x268] sm:$0xff] }
  0xa5   : > { %1302 = vmatprep.subr.bf16.mxu0 %v2376_v25  ;;  %1343 = vmatprep.subr.bf16.mxu1 %v2378_v26  ;;  %v291_v24 = vld [vmem:[%s2871_s4 + $0x2e8] sm:$0xff]  ;;  %v2351_v25 = vcombine.low %v242_v13, %v258_v14  ;;  %v2353_v26 = vcombine.low %v243_v15, %v259_v16 }
  0xa6   : > { %v2386_v28 = vcombine.high %v275_v23, %v291_v24 }
  0xa8   : > { %1303 = vmatpush1.bf16.msra.mxu0 %v2375_v31  ;;  %1344 = vmatpush1.bf16.msra.mxu1 %v2377_v32  ;;  %v307_v31 = vld [vmem:[%s2871_s4 + $0x368] sm:$0xff] }
  0xa9   : > { %1304 = vmatprep.subr.bf16.mxu0 %v2408_v33  ;;  %1345 = vmatprep.subr.bf16.mxu1 %v2410_v34  ;;  %v323_v32 = vld [vmem:[%s2871_s4 + $0x3e8] sm:$0xff]  ;;  %v2383_v33 = vcombine.low %v274_v21, %v290_v22  ;;  %v2385_v34 = vcombine.low %v275_v23, %v291_v24 }
  0xaa   : > { %v2418_v36 = vcombine.high %v307_v31, %v323_v32 }
  0xac   : > { %1305 = vmatpush1.bf16.msra.mxu0 %v2407_v39  ;;  %1346 = vmatpush1.bf16.msra.mxu1 %v2409_v40  ;;  %v213_v39 = vld [vmem:[%s2871_s4 + $0x78] sm:$0xff] }
  0xad   : > { %1380 = vmatprep.subr.bf16.mxu0 %v2316_v41  ;;  %1421 = vmatprep.subr.bf16.mxu1 %v2318_v42  ;;  %v229_v40 = vld [vmem:[%s2871_s4 + $0xf8] sm:$0xff]  ;;  %v2415_v41 = vcombine.low %v306_v29, %v322_v30  ;;  %v2417_v42 = vcombine.low %v307_v31, %v323_v32 }
  0xae   : > { %v2326_v45 = vcombine.high %v213_v39, %v229_v40 }
  0xaf   : > { %2431 = vmatmul.mubr.msk.bf16.vlgmr.msra.gmra.mrb[16].mxu0 %vm966_vm0, %v2903_v43  ;;  %2432 = vmatmul.mubr.msk.bf16.vlgmr.msra.gmra.mrb[16].mxu1 %vm966_vm0, %v2903_v43 }
  0xb0   : > { %1381 = vmatpush1.bf16.msra.mxu0 %v2315_v48  ;;  %1422 = vmatpush1.bf16.msra.mxu1 %v2317_v49  ;;  %v245_v48 = vld [vmem:[%s2871_s4 + $0x178] sm:$0xff] }
  0xb1   : > { %1382 = vmatprep.subr.bf16.mxu0 %v2348_v50  ;;  %1423 = vmatprep.subr.bf16.mxu1 %v2350_v51  ;;  %v261_v49 = vld [vmem:[%s2871_s4 + $0x1f8] sm:$0xff]  ;;  %v2323_v50 = vcombine.low %v212_v37, %v228_v38  ;;  %v2325_v51 = vcombine.low %v213_v39, %v229_v40 }
  0xb2   : > { %1412 = vmatprep.mubr.bf16.mxu0 %v2691_v0  ;;  %1453 = vmatprep.mubr.bf16.mxu1 %v2691_v0  ;;  %v2358_v53 = vcombine.high %v245_v48, %v261_v49 }
  0xb4   : > { %1383 = vmatpush1.bf16.msra.mxu0 %v2347_v56  ;;  %1424 = vmatpush1.bf16.msra.mxu1 %v2349_v57  ;;  %v277_v56 = vld [vmem:[%s2871_s4 + $0x278] sm:$0xff] }
  0xb5   : > { %1384 = vmatprep.subr.bf16.mxu0 %v2380_v58  ;;  %1425 = vmatprep.subr.bf16.mxu1 %v2382_v59  ;;  %v293_v57 = vld [vmem:[%s2871_s4 + $0x2f8] sm:$0xff]  ;;  %v2355_v58 = vcombine.low %v244_v46, %v260_v47  ;;  %v2357_v59 = vcombine.low %v245_v48, %v261_v49 }
  0xb6   : > { %v2390_v61 = vcombine.high %v277_v56, %v293_v57 }
  0xb8   : > { %1385 = vmatpush1.bf16.msra.mxu0 %v2379_v1  ;;  %1426 = vmatpush1.bf16.msra.mxu1 %v2381_v2  ;;  %v309_v1 = vld [vmem:[%s2871_s4 + $0x378] sm:$0xff] }
  0xb9   : > { %1386 = vmatprep.subr.bf16.mxu0 %v2412_v3  ;;  %1427 = vmatprep.subr.bf16.mxu1 %v2414_v4  ;;  %v325_v2 = vld [vmem:[%s2871_s4 + $0x3f8] sm:$0xff]  ;;  %v2387_v3 = vcombine.low %v276_v54, %v292_v55  ;;  %v2389_v4 = vcombine.low %v277_v56, %v293_v57 }
  0xba   : > { %v2422_v6 = vcombine.high %v309_v1, %v325_v2  ;;  %v2421_v8 = vcombine.low %v309_v1, %v325_v2 }
  0xbc   : > { %1387 = vmatpush1.bf16.msra.mxu0 %v2411_v9  ;;  %1428 = vmatpush1.bf16.msra.mxu1 %v2413_v10 }
  0xbd   : > { %1462 = vmatprep.subr.bf16.mxu0 %v2320_v11  ;;  %1503 = vmatprep.subr.bf16.mxu1 %v2322_v12 }
  0xbf   : > { %2433 = vmatmul.mubr.msk.bf16.vlgmr.msra.gmra.mrb[20].mxu0 %vm966_vm0, %v2903_v43  ;;  %2434 = vmatmul.mubr.msk.bf16.vlgmr.msra.gmra.mrb[20].mxu1 %vm966_vm0, %v2903_v43 }
  0xc0   : > { %1463 = vmatpush1.bf16.msra.mxu0 %v2319_v17  ;;  %1504 = vmatpush1.bf16.msra.mxu1 %v2321_v18 }
  0xc1   : > { %1464 = vmatprep.subr.bf16.mxu0 %v2352_v19  ;;  %1505 = vmatprep.subr.bf16.mxu1 %v2354_v20 }
  0xc2   : > { %1494 = vmatprep.mubr.bf16.mxu0 %v2691_v0  ;;  %1535 = vmatprep.mubr.bf16.mxu1 %v2691_v0 }
  0xc4   : > { %1465 = vmatpush1.bf16.msra.mxu0 %v2351_v25  ;;  %1506 = vmatpush1.bf16.msra.mxu1 %v2353_v26 }
  0xc5   : > { %1466 = vmatprep.subr.bf16.mxu0 %v2384_v27  ;;  %1507 = vmatprep.subr.bf16.mxu1 %v2386_v28 }
  0xc8   : > { %1467 = vmatpush1.bf16.msra.mxu0 %v2383_v33  ;;  %1508 = vmatpush1.bf16.msra.mxu1 %v2385_v34 }
  0xc9   : > { %1468 = vmatprep.subr.bf16.mxu0 %v2416_v35  ;;  %1509 = vmatprep.subr.bf16.mxu1 %v2418_v36 }
  0xcc   : > { %1469 = vmatpush1.bf16.msra.mxu0 %v2415_v41  ;;  %1510 = vmatpush1.bf16.msra.mxu1 %v2417_v42 }
  0xcd   : > { %1544 = vmatprep.subr.bf16.mxu0 %v2324_v44  ;;  %1585 = vmatprep.subr.bf16.mxu1 %v2326_v45 }
  0xcf   : > { %2435 = vmatmul.mubr.msk.bf16.vlgmr.msra.gmra.mrb[24].mxu0 %vm966_vm0, %v2903_v43  ;;  %2436 = vmatmul.mubr.msk.bf16.vlgmr.msra.gmra.mrb[24].mxu1 %vm966_vm0, %v2903_v43 }
  0xd0   : > { %1545 = vmatpush1.bf16.msra.mxu0 %v2323_v50  ;;  %1586 = vmatpush1.bf16.msra.mxu1 %v2325_v51 }
  0xd1   : > { %1546 = vmatprep.subr.bf16.mxu0 %v2356_v52  ;;  %1587 = vmatprep.subr.bf16.mxu1 %v2358_v53 }
  0xd2   : > { %1576 = vmatprep.mubr.bf16.mxu0 %v2691_v0  ;;  %1617 = vmatprep.mubr.bf16.mxu1 %v2691_v0 }
  0xd4   : > { %1547 = vmatpush1.bf16.msra.mxu0 %v2355_v58  ;;  %1588 = vmatpush1.bf16.msra.mxu1 %v2357_v59 }
  0xd5   : > { %1548 = vmatprep.subr.bf16.mxu0 %v2388_v60  ;;  %1589 = vmatprep.subr.bf16.mxu1 %v2390_v61 }
  0xd8   : > { %1549 = vmatpush1.bf16.msra.mxu0 %v2387_v3  ;;  %1590 = vmatpush1.bf16.msra.mxu1 %v2389_v4 }
  0xd9   : > { %1550 = vmatprep.subr.bf16.mxu0 %v2420_v5  ;;  %1591 = vmatprep.subr.bf16.mxu1 %v2422_v6 }
  0xdc   : > { %1551 = vmatpush1.bf16.msra.mxu0 %v2419_v7  ;;  %1592 = vmatpush1.bf16.msra.mxu1 %v2421_v8 }
  0xdf   : > { %2437 = vmatmul.mubr.msk.bf16.vlgmr.msra.gmra.mrb[28].mxu0 %vm966_vm0, %v2903_v43  ;;  %2438 = vmatmul.mubr.msk.bf16.vlgmr.msra.gmra.mrb[28].mxu1 %vm966_vm0, %v2903_v43 }
 0x142   : > { %v3055_v0 = vpop.f32.mrb[0].mxu0  ;;  %v3063_v12 = vpop.f32.mrb[0].mxu1 }
 0x143   : > { %v1627_v9 = vsel %vm1626_vm1, %v3055_v0, 0.0  ;;  %v1693_v10 = vmul.f32 %v3055_v0, %v3055_v0  ;;  %v3061_v11 = vpop.f32.mrb[1].mxu0  ;;  %v1630_v15 = vsel %vm1626_vm1, %v3063_v12, 0.0  ;;  %v1695_v16 = vmul.f32 %v3063_v12, %v3063_v12  ;;  %v3073_v17 = vpop.f32.mrb[1].mxu1 }
 0x144   : > { %v1628_v13 = vsel %vm1626_vm1, %v3061_v11, 0.0  ;;  %v1694_v14 = vmul.f32 %v3061_v11, %v3061_v11  ;;  %v1008_v43 = vpop.f32.mrb[2].mxu0  ;;  %v1696_v21 = vmul.f32 %v3073_v17, %v3073_v17  ;;  %v1049_v22 = vpop.f32.mrb[2].mxu1  ;;  %v1632_v25 = vsel %vm1626_vm1, %v3073_v17, 0.0 }
 0x145   : > { %v1725_v18 = vsel %vm1626_vm1, %v1693_v10, 0.0  ;;  %v1629_v19 = vadd.f32 %v1628_v13, %v1627_v9  ;;  %v1009_v20 = vpop.f32.mrb[3].mxu0  ;;  %v1728_v24 = vsel %vm1626_vm1, %v1695_v16, 0.0  ;;  %v1050_v26 = vpop.f32.mrb[3].mxu1 }
 0x146   : > { %v1726_v23 = vsel %vm1626_vm1, %v1694_v14, 0.0  ;;  %v1730_v29 = vsel %vm1626_vm1, %v1696_v21, 0.0 }
 0x147   : > { %v1727_v27 = vadd.f32 %v1726_v23, %v1725_v18  ;;  %v1631_v28 = vadd.f32 %v1630_v15, %v1629_v19 }
 0x149   : > { %v1729_v30 = vadd.f32 %v1728_v24, %v1727_v27  ;;  %v1633_v31 = vadd.f32 %v1632_v25, %v1631_v28 }
 0x14b   : > { %v1731_v32 = vadd.f32 %v1730_v29, %v1729_v30 }
 0x152   : > { %v3083_v33 = vpop.f32.mrb[4].mxu0  ;;  %v3091_v37 = vpop.f32.mrb[4].mxu1 }
 0x153   : > { %v1634_v34 = vsel %vm1626_vm1, %v3083_v33, 0.0  ;;  %v1697_v35 = vmul.f32 %v3083_v33, %v3083_v33  ;;  %v3089_v36 = vpop.f32.mrb[5].mxu0  ;;  %v3097_v42 = vpop.f32.mrb[5].mxu1  ;;  %v1638_v45 = vsel %vm1626_vm1, %v3091_v37, 0.0  ;;  %v1699_v46 = vmul.f32 %v3091_v37, %v3091_v37 }
 0x154   : > { %v1635_v38 = vadd.f32 %v1634_v34, %v1633_v31  ;;  %v1636_v39 = vsel %vm1626_vm1, %v3089_v36, 0.0  ;;  %v1698_v40 = vmul.f32 %v3089_v36, %v3089_v36  ;;  %v1090_v41 = vpop.f32.mrb[6].mxu0  ;;  %v1700_v48 = vmul.f32 %v3097_v42, %v3097_v42  ;;  %v1131_v49 = vpop.f32.mrb[6].mxu1 }
 0x155   : > { %v1732_v44 = vsel %vm1626_vm1, %v1697_v35, 0.0  ;;  %v1091_v47 = vpop.f32.mrb[7].mxu0  ;;  %v1132_v53 = vpop.f32.mrb[7].mxu1  ;;  %v1736_v54 = vsel %vm1626_vm1, %v1699_v46, 0.0  ;;  %v1640_v55 = vsel %vm1626_vm1, %v3097_v42, 0.0 }
 0x156   : > { %v1733_v50 = vadd.f32 %v1732_v44, %v1731_v32  ;;  %v1637_v51 = vadd.f32 %v1636_v39, %v1635_v38  ;;  %v1734_v52 = vsel %vm1626_vm1, %v1698_v40, 0.0  ;;  %v1738_v58 = vsel %vm1626_vm1, %v1700_v48, 0.0 }
 0x158   : > { %v1735_v56 = vadd.f32 %v1734_v52, %v1733_v50  ;;  %v1639_v57 = vadd.f32 %v1638_v45, %v1637_v51 }
 0x15a   : > { %v1737_v59 = vadd.f32 %v1736_v54, %v1735_v56  ;;  %v1641_v60 = vadd.f32 %v1640_v55, %v1639_v57 }
 0x15c   : > { %v1739_v61 = vadd.f32 %v1738_v58, %v1737_v59 }
 0x162   : > { %v3111_v62 = vpop.f32.mrb[8].mxu0  ;;  %v3119_v3 = vpop.f32.mrb[8].mxu1 }
 0x163   : > { %v1642_v63 = vsel %vm1626_vm1, %v3111_v62, 0.0  ;;  %v1701_v1 = vmul.f32 %v3111_v62, %v3111_v62  ;;  %v3117_v2 = vpop.f32.mrb[9].mxu0  ;;  %v3125_v8 = vpop.f32.mrb[9].mxu1  ;;  %v1646_v10 = vsel %vm1626_vm1, %v3119_v3, 0.0  ;;  %v1703_v13 = vmul.f32 %v3119_v3, %v3119_v3 }
 0x164   : > { %v1643_v4 = vadd.f32 %v1642_v63, %v1641_v60  ;;  %v1644_v5 = vsel %vm1626_vm1, %v3117_v2, 0.0  ;;  %v1702_v6 = vmul.f32 %v3117_v2, %v3117_v2  ;;  %v1172_v7 = vpop.f32.mrb[10].mxu0  ;;  %v1704_v43 = vmul.f32 %v3125_v8, %v3125_v8  ;;  %v1213_v15 = vpop.f32.mrb[10].mxu1 }
 0x165   : > { %v1740_v9 = vsel %vm1626_vm1, %v1701_v1, 0.0  ;;  %v1173_v14 = vpop.f32.mrb[11].mxu0  ;;  %v1214_v20 = vpop.f32.mrb[11].mxu1  ;;  %v1744_v21 = vsel %vm1626_vm1, %v1703_v13, 0.0  ;;  %v1648_v22 = vsel %vm1626_vm1, %v3125_v8, 0.0 }
 0x166   : > { %v1741_v16 = vadd.f32 %v1740_v9, %v1739_v61  ;;  %v1645_v18 = vadd.f32 %v1644_v5, %v1643_v4  ;;  %v1742_v19 = vsel %vm1626_vm1, %v1702_v6, 0.0  ;;  %v1746_v25 = vsel %vm1626_vm1, %v1704_v43, 0.0 }
 0x168   : > { %v1743_v23 = vadd.f32 %v1742_v19, %v1741_v16  ;;  %v1647_v24 = vadd.f32 %v1646_v10, %v1645_v18 }
 0x16a   : > { %v1745_v26 = vadd.f32 %v1744_v21, %v1743_v23  ;;  %v1649_v27 = vadd.f32 %v1648_v22, %v1647_v24 }
 0x16c   : > { %v1747_v28 = vadd.f32 %v1746_v25, %v1745_v26 }
 0x172   : > { %v3139_v29 = vpop.f32.mrb[12].mxu0  ;;  %v3147_v34 = vpop.f32.mrb[12].mxu1 }
 0x173   : > { %v1650_v30 = vsel %vm1626_vm1, %v3139_v29, 0.0  ;;  %v1705_v31 = vmul.f32 %v3139_v29, %v3139_v29  ;;  %v3145_v32 = vpop.f32.mrb[13].mxu0  ;;  %v3153_v41 = vpop.f32.mrb[13].mxu1  ;;  %v1654_v45 = vsel %vm1626_vm1, %v3147_v34, 0.0  ;;  %v1707_v46 = vmul.f32 %v3147_v34, %v3147_v34 }
 0x174   : > { %v1651_v35 = vadd.f32 %v1650_v30, %v1649_v27  ;;  %v1652_v38 = vsel %vm1626_vm1, %v3145_v32, 0.0  ;;  %v1706_v39 = vmul.f32 %v3145_v32, %v3145_v32  ;;  %v1254_v40 = vpop.f32.mrb[14].mxu0  ;;  %v1708_v48 = vmul.f32 %v3153_v41, %v3153_v41  ;;  %v1295_v49 = vpop.f32.mrb[14].mxu1 }
 0x175   : > { %v1748_v44 = vsel %vm1626_vm1, %v1705_v31, 0.0  ;;  %v1255_v47 = vpop.f32.mrb[15].mxu0  ;;  %v1296_v53 = vpop.f32.mrb[15].mxu1  ;;  %v1752_v54 = vsel %vm1626_vm1, %v1707_v46, 0.0  ;;  %v1656_v55 = vsel %vm1626_vm1, %v3153_v41, 0.0 }
 0x176   : > { %v1749_v50 = vadd.f32 %v1748_v44, %v1747_v28  ;;  %v1653_v51 = vadd.f32 %v1652_v38, %v1651_v35  ;;  %v1750_v52 = vsel %vm1626_vm1, %v1706_v39, 0.0  ;;  %v1754_v58 = vsel %vm1626_vm1, %v1708_v48, 0.0 }
 0x178   : > { %v1751_v56 = vadd.f32 %v1750_v52, %v1749_v50  ;;  %v1655_v57 = vadd.f32 %v1654_v45, %v1653_v51 }
 0x17a   : > { %v1753_v59 = vadd.f32 %v1752_v54, %v1751_v56  ;;  %v1657_v60 = vadd.f32 %v1656_v55, %v1655_v57 }
 0x17c   : > { %v1755_v61 = vadd.f32 %v1754_v58, %v1753_v59 }
 0x182   : > { %v3167_v63 = vpop.f32.mrb[16].mxu0  ;;  %v3175_v6 = vpop.f32.mrb[16].mxu1 }
 0x183   : > { %v1658_v1 = vsel %vm1626_vm1, %v3167_v63, 0.0  ;;  %v1709_v4 = vmul.f32 %v3167_v63, %v3167_v63  ;;  %v3173_v5 = vpop.f32.mrb[17].mxu0  ;;  %v3181_v14 = vpop.f32.mrb[17].mxu1  ;;  %v1662_v15 = vsel %vm1626_vm1, %v3175_v6, 0.0  ;;  %v1711_v16 = vmul.f32 %v3175_v6, %v3175_v6 }
 0x184   : > { %v1659_v7 = vadd.f32 %v1658_v1, %v1657_v60  ;;  %v1660_v9 = vsel %vm1626_vm1, %v3173_v5, 0.0  ;;  %v1710_v10 = vmul.f32 %v3173_v5, %v3173_v5  ;;  %v1336_v13 = vpop.f32.mrb[18].mxu0  ;;  %v1712_v19 = vmul.f32 %v3181_v14, %v3181_v14  ;;  %v1377_v20 = vpop.f32.mrb[18].mxu1 }
 0x185   : > { %v1756_v43 = vsel %vm1626_vm1, %v1709_v4, 0.0  ;;  %v1337_v18 = vpop.f32.mrb[19].mxu0  ;;  %v1378_v24 = vpop.f32.mrb[19].mxu1  ;;  %v1760_v25 = vsel %vm1626_vm1, %v1711_v16, 0.0  ;;  %v1664_v26 = vsel %vm1626_vm1, %v3181_v14, 0.0 }
 0x186   : > { %v1757_v21 = vadd.f32 %v1756_v43, %v1755_v61  ;;  %v1661_v22 = vadd.f32 %v1660_v9, %v1659_v7  ;;  %v1758_v23 = vsel %vm1626_vm1, %v1710_v10, 0.0  ;;  %v1762_v30 = vsel %vm1626_vm1, %v1712_v19, 0.0 }
 0x188   : > { %v1759_v27 = vadd.f32 %v1758_v23, %v1757_v21  ;;  %v1663_v28 = vadd.f32 %v1662_v15, %v1661_v22 }
 0x18a   : > { %v1761_v31 = vadd.f32 %v1760_v25, %v1759_v27  ;;  %v1665_v35 = vadd.f32 %v1664_v26, %v1663_v28 }
 0x18c   : > { %v1763_v38 = vadd.f32 %v1762_v30, %v1761_v31 }
 0x192   : > { %v3195_v39 = vpop.f32.mrb[20].mxu0  ;;  %v3203_v46 = vpop.f32.mrb[20].mxu1 }
 0x193   : > { %v1666_v40 = vsel %vm1626_vm1, %v3195_v39, 0.0  ;;  %v1713_v44 = vmul.f32 %v3195_v39, %v3195_v39  ;;  %v3201_v45 = vpop.f32.mrb[21].mxu0  ;;  %v3209_v51 = vpop.f32.mrb[21].mxu1  ;;  %v1670_v53 = vsel %vm1626_vm1, %v3203_v46, 0.0  ;;  %v1715_v54 = vmul.f32 %v3203_v46, %v3203_v46 }
 0x194   : > { %v1667_v47 = vadd.f32 %v1666_v40, %v1665_v35  ;;  %v1668_v48 = vsel %vm1626_vm1, %v3201_v45, 0.0  ;;  %v1714_v49 = vmul.f32 %v3201_v45, %v3201_v45  ;;  %v1418_v50 = vpop.f32.mrb[22].mxu0  ;;  %v1716_v56 = vmul.f32 %v3209_v51, %v3209_v51  ;;  %v1459_v57 = vpop.f32.mrb[22].mxu1 }
 0x195   : > { %v1764_v52 = vsel %vm1626_vm1, %v1713_v44, 0.0  ;;  %v1419_v55 = vpop.f32.mrb[23].mxu0  ;;  %v1460_v61 = vpop.f32.mrb[23].mxu1  ;;  %v1768_v1 = vsel %vm1626_vm1, %v1715_v54, 0.0  ;;  %v1672_v4 = vsel %vm1626_vm1, %v3209_v51, 0.0 }
 0x196   : > { %v1765_v58 = vadd.f32 %v1764_v52, %v1763_v38  ;;  %v1669_v59 = vadd.f32 %v1668_v48, %v1667_v47  ;;  %v1766_v60 = vsel %vm1626_vm1, %v1714_v49, 0.0  ;;  %v1770_v10 = vsel %vm1626_vm1, %v1716_v56, 0.0 }
 0x198   : > { %v1767_v7 = vadd.f32 %v1766_v60, %v1765_v58  ;;  %v1671_v9 = vadd.f32 %v1670_v53, %v1669_v59 }
 0x19a   : > { %v1769_v13 = vadd.f32 %v1768_v1, %v1767_v7  ;;  %v1673_v43 = vadd.f32 %v1672_v4, %v1671_v9 }
 0x19c   : > { %v1771_v15 = vadd.f32 %v1770_v10, %v1769_v13 }
 0x1a2   : > { %v3223_v16 = vpop.f32.mrb[24].mxu0  ;;  %v3231_v21 = vpop.f32.mrb[24].mxu1 }
 0x1a3   : > { %v1674_v18 = vsel %vm1626_vm1, %v3223_v16, 0.0  ;;  %v1717_v19 = vmul.f32 %v3223_v16, %v3223_v16  ;;  %v3229_v20 = vpop.f32.mrb[25].mxu0  ;;  %v3237_v26 = vpop.f32.mrb[25].mxu1  ;;  %v1678_v28 = vsel %vm1626_vm1, %v3231_v21, 0.0  ;;  %v1719_v30 = vmul.f32 %v3231_v21, %v3231_v21 }
 0x1a4   : > { %v1675_v22 = vadd.f32 %v1674_v18, %v1673_v43  ;;  %v1676_v23 = vsel %vm1626_vm1, %v3229_v20, 0.0  ;;  %v1718_v24 = vmul.f32 %v3229_v20, %v3229_v20  ;;  %v1500_v25 = vpop.f32.mrb[26].mxu0  ;;  %v1720_v35 = vmul.f32 %v3237_v26, %v3237_v26  ;;  %v1541_v38 = vpop.f32.mrb[26].mxu1 }
 0x1a5   : > { %v1772_v27 = vsel %vm1626_vm1, %v1717_v19, 0.0  ;;  %v1501_v31 = vpop.f32.mrb[27].mxu0  ;;  %v1542_v48 = vpop.f32.mrb[27].mxu1  ;;  %v1776_v49 = vsel %vm1626_vm1, %v1719_v30, 0.0  ;;  %v1680_v50 = vsel %vm1626_vm1, %v3237_v26, 0.0 }
 0x1a6   : > { %v1773_v40 = vadd.f32 %v1772_v27, %v1771_v15  ;;  %v1677_v44 = vadd.f32 %v1676_v23, %v1675_v22  ;;  %v1774_v47 = vsel %vm1626_vm1, %v1718_v24, 0.0  ;;  %v1778_v54 = vsel %vm1626_vm1, %v1720_v35, 0.0 }
 0x1a8   : > { %v1775_v52 = vadd.f32 %v1774_v47, %v1773_v40  ;;  %v1679_v53 = vadd.f32 %v1678_v28, %v1677_v44 }
 0x1aa   : > { %v1777_v55 = vadd.f32 %v1776_v49, %v1775_v52  ;;  %v1681_v56 = vadd.f32 %v1680_v50, %v1679_v53 }
 0x1ac   : > { %v1779_v57 = vadd.f32 %v1778_v54, %v1777_v55 }
 0x1b2   : > { %v3251_v58 = vpop.f32.mrb[28].mxu0  ;;  %v3259_v1 = vpop.f32.mrb[28].mxu1 }
 0x1b3   : > { %v1682_v59 = vsel %vm1626_vm1, %v3251_v58, 0.0  ;;  %v1721_v60 = vmul.f32 %v3251_v58, %v3251_v58  ;;  %v3257_v61 = vpop.f32.mrb[29].mxu0  ;;  %v1723_v10 = vmul.f32 %v3259_v1, %v3259_v1  ;;  %v3267_v43 = vpop.f32.mrb[29].mxu1  ;;  %v1686_v23 = vsel %vm1626_vm1, %v3259_v1, 0.0 }
 0x1b4   : > { %v1683_v4 = vadd.f32 %v1682_v59, %v1681_v56  ;;  %v1684_v7 = vsel %vm1626_vm1, %v3257_v61, 0.0  ;;  %v1722_v9 = vmul.f32 %v3257_v61, %v3257_v61  ;;  %v1582_v13 = vpop.f32.mrb[30].mxu0  ;;  %v1724_v18 = vmul.f32 %v3267_v43, %v3267_v43  ;;  %v1623_v22 = vpop.f32.mrb[30].mxu1 }
 0x1b5   : > { %v1780_v15 = vsel %vm1626_vm1, %v1721_v60, 0.0  ;;  %v1583_v19 = vpop.f32.mrb[31].mxu0  ;;  %v1624_v27 = vpop.f32.mrb[31].mxu1  ;;  %v1784_v30 = vsel %vm1626_vm1, %v1723_v10, 0.0  ;;  %v1688_v40 = vsel %vm1626_vm1, %v3267_v43, 0.0  ;;  %v2024_v59 = vlaneseq }
 0x1b6   : > { %v1781_v24 = vadd.f32 %v1780_v15, %v1779_v57  ;;  %v1782_v25 = vsel %vm1626_vm1, %v1722_v9, 0.0  ;;  %v1685_v28 = vadd.f32 %v1684_v7, %v1683_v4  ;;  %v1786_v31 = vsel %vm1626_vm1, %v1724_v18, 0.0 }
 0x1b7   : > { %v2692_v56 = vmov 1983009808   ;;  %v2025_v7 = vshrl.u32 %v2024_v59, 7 }
 0x1b8   : > { %v1687_v35 = vadd.f32 %v1686_v23, %v1685_v28  ;;  %v1783_v38 = vadd.f32 %v1782_v25, %v1781_v24  ;;  %v2022_v57 = vunpack.c.l.s4 %v2692_v56 }
 0x1ba   : > { %v1689_v44 = vadd.f32 %v1688_v40, %v1687_v35  ;;  %v1785_v47 = vadd.f32 %v1784_v30, %v1783_v38  ;;  %v2023_v4 = vunpack.c.0.s8 %v2022_v57 }
 0x1bc   : > { %1690 = vadd.xlane.f32.xlu0 %v1689_v44  ;;  %v1787_v48 = vadd.f32 %v1786_v31, %v1785_v47  ;;  %v3283_v9 = vsub.s32 %v2023_v4, %v2025_v7 }
 0x1c0   : > { %1788 = vadd.xlane.f32.xlu0 %v1787_v48 }
 0x249   : > { %v1691_v49 = vpop.xlane.xlu0 %1690 }
 0x24a   : > { %v3279_v50 = vmul.f32 0.00024414063, %v1691_v49 }
 0x24c   : > { %v1791_v53 = vmul.f32 %v3279_v50, %v3279_v50  ;;  %v1793_v10 = vsub.f32 %v3055_v0, %v3279_v50  ;;  %v1794_v13 = vsub.f32 %v3061_v11, %v3279_v50  ;;  %v1795_v15 = vsub.f32 %v3063_v12, %v3279_v50 }
 0x24d   : > { %v1789_v52 = vpop.xlane.xlu0 %1788  ;;  %v1796_v18 = vsub.f32 %v3073_v17, %v3279_v50  ;;  %v1797_v19 = vsub.f32 %v3083_v33, %v3279_v50  ;;  %v1798_v22 = vsub.f32 %v3089_v36, %v3279_v50  ;;  %v1799_v23 = vsub.f32 %v3091_v37, %v3279_v50 }
 0x24e   : > { %v1790_v54 = vmul.f32 0.00024414063, %v1789_v52  ;;  %v1800_v0 = vsub.f32 %v3097_v42, %v3279_v50  ;;  %v1801_v11 = vsub.f32 %v3111_v62, %v3279_v50  ;;  %v1802_v12 = vsub.f32 %v3117_v2, %v3279_v50 }
 0x24f   : > { %v1803_v17 = vsub.f32 %v3119_v3, %v3279_v50  ;;  %v1804_v33 = vsub.f32 %v3125_v8, %v3279_v50  ;;  %v1805_v36 = vsub.f32 %v3139_v29, %v3279_v50  ;;  %v1806_v37 = vsub.f32 %v3145_v32, %v3279_v50 }
 0x250   : > { %v1792_v55 = vsub.f32 %v1790_v54, %v1791_v53  ;;  %v1807_v42 = vsub.f32 %v3147_v34, %v3279_v50  ;;  %v1808_v62 = vsub.f32 %v3153_v41, %v3279_v50  ;;  %v1809_v2 = vsub.f32 %v3167_v63, %v3279_v50 }
 0x251   : > { %v1810_v3 = vsub.f32 %v3173_v5, %v3279_v50  ;;  %v1811_v8 = vsub.f32 %v3175_v6, %v3279_v50  ;;  %v1812_v29 = vsub.f32 %v3181_v14, %v3279_v50  ;;  %v1813_v32 = vsub.f32 %v3195_v39, %v3279_v50 }
 0x252   : > { %v1825_v60 = vadd.f32 1e-05, %v1792_v55  ;;  %v1814_v34 = vsub.f32 %v3201_v45, %v3279_v50  ;;  %v1815_v41 = vsub.f32 %v3203_v46, %v3279_v50  ;;  %v1816_v63 = vsub.f32 %v3209_v51, %v3279_v50 }
 0x253   : > { %v1817_v5 = vsub.f32 %v3223_v16, %v3279_v50  ;;  %v1818_v6 = vsub.f32 %v3229_v20, %v3279_v50  ;;  %v1819_v14 = vsub.f32 %v3231_v21, %v3279_v50  ;;  %v1820_v39 = vsub.f32 %v3237_v26, %v3279_v50 }
 0x254   : > { %2539 = vrsqrt.f32 %v1825_v60  ;;  %v1821_v45 = vsub.f32 %v3251_v58, %v3279_v50  ;;  %v1822_v46 = vsub.f32 %v3257_v61, %v3279_v50  ;;  %v1823_v51 = vsub.f32 %v3259_v1, %v3279_v50 }
 0x255   : > { %v1824_v16 = vsub.f32 %v3267_v43, %v3279_v50 }
 0x25e   : > { %v2540_v24 = vpop.eup %2539 }
 0x25f   : > { %v3349_v25 = vmul.f32 %v2540_v24, %v1793_v10  ;;  %v3351_v20 = vmul.f32 %v2540_v24, %v1794_v13  ;;  %v3353_v21 = vmul.f32 %v2540_v24, %v1795_v15  ;;  %v3355_v27 = vmul.f32 %v2540_v24, %v1796_v18 }
 0x260   : > { %v3357_v26 = vmul.f32 %v2540_v24, %v1797_v19  ;;  %v3359_v58 = vmul.f32 %v2540_v24, %v1798_v22  ;;  %v3361_v28 = vmul.f32 %v2540_v24, %v1799_v23  ;;  %v3363_v61 = vmul.f32 %v2540_v24, %v1800_v0 }
 0x261   : > { %v3365_v1 = vmul.f32 %v2540_v24, %v1801_v11  ;;  %v3367_v30 = vmul.f32 %v2540_v24, %v1802_v12  ;;  %v3369_v43 = vmul.f32 %v2540_v24, %v1803_v17  ;;  %v3371_v31 = vmul.f32 %v2540_v24, %v1804_v33 }
 0x262   : > { %v3373_v35 = vmul.f32 %v2540_v24, %v1805_v36  ;;  %v3375_v38 = vmul.f32 %v2540_v24, %v1806_v37  ;;  %v3377_v40 = vmul.f32 %v2540_v24, %v1807_v42  ;;  %v3379_v44 = vmul.f32 %v2540_v24, %v1808_v62 }
 0x263   : > { %v3381_v47 = vmul.f32 %v2540_v24, %v1809_v2  ;;  %v3383_v48 = vmul.f32 %v2540_v24, %v1810_v3  ;;  %v3385_v49 = vmul.f32 %v2540_v24, %v1811_v8  ;;  %v3387_v50 = vmul.f32 %v2540_v24, %v1812_v29 }
 0x264   : > { %v3389_v52 = vmul.f32 %v2540_v24, %v1813_v32  ;;  %v3391_v53 = vmul.f32 %v2540_v24, %v1814_v34  ;;  %v3393_v54 = vmul.f32 %v2540_v24, %v1815_v41  ;;  %v3395_v55 = vmul.f32 %v2540_v24, %v1816_v63 }
 0x265   : > { %v3397_v56 = vmul.f32 %v2540_v24, %v1817_v5  ;;  %v3399_v57 = vmul.f32 %v2540_v24, %v1818_v6  ;;  %v3401_v59 = vmul.f32 %v2540_v24, %v1819_v14  ;;  %v3403_v60 = vmul.f32 %v2540_v24, %v1820_v39 }
 0x266   : > { %v3405_v4 = vmul.f32 %v2540_v24, %v1821_v45  ;;  %v3407_v7 = vmul.f32 %v2540_v24, %v1822_v46  ;;  %vm1859_vm2 = vcmp.ge.f32.partialorder %v3349_v25, 0.0  ;;  %vm1860_vm3 = vcmp.ge.f32.partialorder %v3351_v20, 0.0 }
 0x267   : > { %vm1861_vm4 = vcmp.ge.f32.partialorder %v3353_v21, 0.0  ;;  %vm1862_vm5 = vcmp.ge.f32.partialorder %v3355_v27, 0.0  ;;  %vm1863_vm6 = vcmp.ge.f32.partialorder %v3357_v26, 0.0  ;;  %vm1864_vm7 = vcmp.ge.f32.partialorder %v3359_v58, 0.0 }
 0x268   : > { %vm1865_vm8 = vcmp.ge.f32.partialorder %v3361_v28, 0.0  ;;  %vm1866_vm9 = vcmp.ge.f32.partialorder %v3363_v61, 0.0  ;;  %vm1867_vm10 = vcmp.ge.f32.partialorder %v3365_v1, 0.0  ;;  %v3419_v10 = vmul.f32 %v2540_v24, %v1823_v51 }
 0x269   : > { %v1891_v13 = vmul.f32 0.02, %v3349_v25  ;;  %v1892_v15 = vmul.f32 0.02, %v3351_v20  ;;  %v1893_v18 = vmul.f32 0.02, %v3353_v21  ;;  %v3428_v19 = vmul.f32 %v2540_v24, %v1824_v16 }
 0x26a   : > { %vm1874_vm1 = vcmp.ge.f32.partialorder %v3379_v44, 0.0  ;;  %vm1875_vm12 = vcmp.ge.f32.partialorder %v3381_v47, 0.0  ;;  %v1894_v22 = vmul.f32 0.02, %v3355_v27  ;;  %v1895_v23 = vmul.f32 0.02, %v3357_v26 }
 0x26b   : > { %v1896_v0 = vmul.f32 0.02, %v3359_v58  ;;  %vm1880_vm0 = vcmp.ge.f32.partialorder %v3391_v53, 0.0  ;;  %v1897_v11 = vmul.f32 0.02, %v3361_v28  ;;  %v3447_v33 = vsel %vm1859_vm2, %v3349_v25, %v1891_v13 }
 0x26c   : > { %v1898_v12 = vmul.f32 0.02, %v3363_v61  ;;  %v1899_v17 = vmul.f32 0.02, %v3365_v1  ;;  %vm1884_vm11 = vcmp.ge.f32.partialorder %v3399_v57, 0.0  ;;  %v3459_v62 = vsel %vm1860_vm3, %v3351_v20, %v1892_v15 }
 0x26d   : > { %v1900_v36 = vmul.f32 0.02, %v3367_v30  ;;  %v1901_v37 = vmul.f32 0.02, %v3369_v43  ;;  %v1902_v42 = vmul.f32 0.02, %v3371_v31  ;;  %v1925_v29 = vsel %vm1861_vm4, %v3353_v21, %v1893_v18 }
 0x26e   : > { %vm1886_vm13 = vcmp.ge.f32.partialorder %v3403_v60, 0.0  ;;  %vm1887_vm15 = vcmp.ge.f32.partialorder %v3405_v4, 0.0  ;;  %vm1888_vm14 = vcmp.ge.f32.partialorder %v3407_v7, 0.0  ;;  %v1903_v2 = vmul.f32 0.02, %v3373_v35 }
 0x26f   : > { %v1904_v3 = vmul.f32 0.02, %v3375_v38  ;;  %v1905_v8 = vmul.f32 0.02, %v3377_v40  ;;  %vm1889_vm3 = vcmp.ge.f32.partialorder %v3419_v10, 0.0  ;;  %vm1890_vm2 = vcmp.ge.f32.partialorder %v3428_v19, 0.0 }
 0x270   : > { %v1906_v24 = vmul.f32 0.02, %v3379_v44  ;;  %v1907_v32 = vmul.f32 0.02, %v3381_v47  ;;  %v1908_v34 = vmul.f32 0.02, %v3383_v48  ;;  %v1926_v41 = vsel %vm1862_vm5, %v3355_v27, %v1894_v22 }
 0x271   : > { %v1909_v63 = vmul.f32 0.02, %v3385_v49  ;;  %v1910_v5 = vmul.f32 0.02, %v3387_v50  ;;  %v1911_v6 = vmul.f32 0.02, %v3389_v52  ;;  %v1927_v14 = vsel %vm1863_vm6, %v3357_v26, %v1895_v23 }
 0x272   : > { %v1912_v39 = vmul.f32 0.02, %v3391_v53  ;;  %v1913_v45 = vmul.f32 0.02, %v3393_v54  ;;  %v1914_v46 = vmul.f32 0.02, %v3395_v55  ;;  %v1928_v51 = vsel %vm1864_vm7, %v3359_v58, %v1896_v0 }
 0x273   : > { %v1915_v16 = vmul.f32 0.02, %v3397_v56  ;;  %v1916_v25 = vmul.f32 0.02, %v3399_v57  ;;  %v1917_v20 = vmul.f32 0.02, %v3401_v59  ;;  %v1929_v21 = vsel %vm1865_vm8, %v3361_v28, %v1897_v11 }
 0x274   : > { %v1918_v27 = vmul.f32 0.02, %v3403_v60  ;;  %v1919_v26 = vmul.f32 0.02, %v3405_v4  ;;  %v1920_v13 = vmul.f32 0.02, %v3407_v7  ;;  %v1930_v58 = vsel %vm1866_vm9, %v3363_v61, %v1898_v12 }
 0x275   : > { %v1921_v15 = vmul.f32 0.02, %v3419_v10  ;;  %v1922_v18 = vmul.f32 0.02, %v3428_v19  ;;  %v1931_v22 = vsel %vm1867_vm10, %v3365_v1, %v1899_v17  ;;  %vm3672_vm4 = vcmp.ge.f32.partialorder %v3367_v30, 0.0 }
 0x276   : > { %v1932_v28 = vsel %vm3672_vm4, %v3367_v30, %v1900_v36  ;;  %vm3673_vm5 = vcmp.ge.f32.partialorder %v3369_v43, 0.0  ;;  %vm3674_vm6 = vcmp.ge.f32.partialorder %v3371_v31, 0.0  ;;  %vm3675_vm7 = vcmp.ge.f32.partialorder %v3373_v35, 0.0 }
 0x277   : > { %v1933_v23 = vsel %vm3673_vm5, %v3369_v43, %v1901_v37  ;;  %v1934_v61 = vsel %vm3674_vm6, %v3371_v31, %v1902_v42  ;;  %v1935_v0 = vsel %vm3675_vm7, %v3373_v35, %v1903_v2  ;;  %vm3676_vm8 = vcmp.ge.f32.partialorder %v3375_v38, 0.0 }
 0x278   : > { %v1936_v1 = vsel %vm3676_vm8, %v3375_v38, %v1904_v3  ;;  %vm3677_vm9 = vcmp.ge.f32.partialorder %v3377_v40, 0.0  ;;  %v1938_v43 = vsel %vm1874_vm1, %v3379_v44, %v1906_v24  ;;  %v1939_v31 = vsel %vm1875_vm12, %v3381_v47, %v1907_v32 }
 0x279   : > { %v1937_v30 = vsel %vm3677_vm9, %v3377_v40, %v1905_v8  ;;  %vm3678_vm10 = vcmp.ge.f32.partialorder %v3383_v48, 0.0  ;;  %vm3679_vm4 = vcmp.ge.f32.partialorder %v3385_v49, 0.0  ;;  %vm3680_vm5 = vcmp.ge.f32.partialorder %v3387_v50, 0.0 }
 0x27a   : > { %v1940_v35 = vsel %vm3678_vm10, %v3383_v48, %v1908_v34  ;;  %v1941_v38 = vsel %vm3679_vm4, %v3385_v49, %v1909_v63  ;;  %v1942_v40 = vsel %vm3680_vm5, %v3387_v50, %v1910_v5  ;;  %vm3681_vm6 = vcmp.ge.f32.partialorder %v3389_v52, 0.0 }
 0x27b   : > { %v1943_v44 = vsel %vm3681_vm6, %v3389_v52, %v1911_v6  ;;  %v1944_v47 = vsel %vm1880_vm0, %v3391_v53, %v1912_v39  ;;  %vm3682_vm12 = vcmp.ge.f32.partialorder %v3393_v54, 0.0  ;;  %vm3683_vm1 = vcmp.ge.f32.partialorder %v3395_v55, 0.0 }
 0x27c   : > { %v1945_v48 = vsel %vm3682_vm12, %v3393_v54, %v1913_v45  ;;  %v1946_v49 = vsel %vm3683_vm1, %v3395_v55, %v1914_v46  ;;  %vm3684_vm7 = vcmp.ge.f32.partialorder %v3397_v56, 0.0  ;;  %v1948_v52 = vsel %vm1884_vm11, %v3399_v57, %v1916_v25 }
 0x27d   : > { %v1947_v50 = vsel %vm3684_vm7, %v3397_v56, %v1915_v16  ;;  %vm3685_vm8 = vcmp.ge.f32.partialorder %v3401_v59, 0.0  ;;  %v1950_v54 = vsel %vm1886_vm13, %v3403_v60, %v1918_v27  ;;  %v1951_v55 = vsel %vm1887_vm15, %v3405_v4, %v1919_v26 }
 0x27e   : > { %v1949_v53 = vsel %vm3685_vm8, %v3401_v59, %v1917_v20  ;;  %v1952_v56 = vsel %vm1888_vm14, %v3407_v7, %v1920_v13  ;;  %v1953_v57 = vsel %vm1889_vm3, %v3419_v10, %v1921_v15  ;;  %v1954_v59 = vsel %vm1890_vm2, %v3428_v19, %v1922_v18 }
 0x27f   : > { %v2439_v60 = vpack.c.bf16 %v3459_v62, %v3447_v33  ;;  %v2440_v11 = vpack.c.bf16 %v1926_v41, %v1925_v29  ;;  %v2441_v12 = vpack.c.bf16 %v1928_v51, %v1927_v14  ;;  %v2442_v17 = vpack.c.bf16 %v1930_v58, %v1929_v21 }
 0x280   : > { %v2443_v4 = vpack.c.bf16 %v1932_v28, %v1931_v22  ;;  %v2444_v36 = vpack.c.bf16 %v1934_v61, %v1933_v23  ;;  %v2445_v42 = vpack.c.bf16 %v1936_v1, %v1935_v0  ;;  %v2446_v2 = vpack.c.bf16 %v1938_v43, %v1937_v30 }
 0x281   : > { %v2027_v37 = vrot.slane %v2439_v60, %v3283_v9  ;;  %v2034_v7 = vrot.slane %v2440_v11, %v3283_v9  ;;  %v2044_v10 = vrot.slane %v2441_v12, %v3283_v9  ;;  %v2051_v3 = vrot.slane %v2442_v17, %v3283_v9 }
 0x282   : > { %v2061_v19 = vrot.slane %v2443_v4, %v3283_v9  ;;  %v2068_v8 = vrot.slane %v2444_v36, %v3283_v9  ;;  %v2078_v62 = vrot.slane %v2445_v42, %v3283_v9  ;;  %v2085_v29 = vrot.slane %v2446_v2, %v3283_v9 }
 0x283   : > { %v2035_v33 = vcombine.low %v2027_v37, %v2034_v7  ;;  %v2447_v24 = vpack.c.bf16 %v1940_v35, %v1939_v31  ;;  %v2052_v32 = vcombine.low %v2044_v10, %v2051_v3  ;;  %v2448_v41 = vpack.c.bf16 %v1942_v40, %v1941_v38 }
 0x284   : > { %v2069_v34 = vcombine.low %v2061_v19, %v2068_v8  ;;  %v2449_v63 = vpack.c.bf16 %v1944_v47, %v1943_v44  ;;  %v2086_v5 = vcombine.low %v2078_v62, %v2085_v29  ;;  %v2450_v14 = vpack.c.bf16 %v1946_v49, %v1945_v48 }
 0x285   : > { %v2095_v6 = vrot.slane %v2447_v24, %v3283_v9  ;;  %v2451_v39 = vpack.c.bf16 %v1948_v52, %v1947_v50  ;;  %2163 = vst [vmem:[%s195_s20] sm:$0xff] %v2035_v33  ;;  %v2102_v45 = vrot.slane %v2448_v41, %v3283_v9  ;;  %v2452_v51 = vpack.c.bf16 %v1950_v54, %v1949_v53 }
 0x286   : > { %v2112_v46 = vrot.slane %v2449_v63, %v3283_v9  ;;  %v2453_v16 = vpack.c.bf16 %v1952_v56, %v1951_v55  ;;  %2164 = vst [vmem:[%s195_s20 + $0x8] sm:$0xff] %v2052_v32  ;;  %2165 = vst [vmem:[%s195_s20 + $0x10] sm:$0xff] %v2069_v34  ;;  %v2119_v25 = vrot.slane %v2450_v14, %v3283_v9 }
 0x287   : > { %v2129_v20 = vrot.slane %v2451_v39, %v3283_v9  ;;  %v2454_v21 = vpack.c.bf16 %v1954_v59, %v1953_v57  ;;  %2166 = vst [vmem:[%s195_s20 + $0x18] sm:$0xff] %v2086_v5  ;;  %v2103_v27 = vcombine.low %v2095_v6, %v2102_v45  ;;  %v2136_v26 = vrot.slane %v2452_v51, %v3283_v9 }
 0x288   : > { %v2146_v13 = vrot.slane %v2453_v16, %v3283_v9  ;;  %v2120_v58 = vcombine.low %v2112_v46, %v2119_v25 }
 0x289   : > { %v2153_v15 = vrot.slane %v2454_v21, %v3283_v9  ;;  %v2137_v18 = vcombine.low %v2129_v20, %v2136_v26  ;;  %2167 = vst [vmem:[%s195_s20 + $0x20] sm:$0xff] %v2103_v27 }
 0x28a   : > { %2168 = vst [vmem:[%s195_s20 + $0x28] sm:$0xff] %v2120_v58 }
 0x28b   : > { %v2154_v22 = vcombine.low %v2146_v13, %v2153_v15  ;;  %2169 = vst [vmem:[%s195_s20 + $0x30] sm:$0xff] %v2137_v18 }
 0x28d   : > { %2170 = vst [vmem:[%s195_s20 + $0x38] sm:$0xff] %v2154_v22 }
 0x28e   : > { %2612 = shalt.err (!%p2609_p7)
}
 0x28f   : > { %s2613_s6 = scalar_lea.hbm %s3600_s29, 1024  ;;  %s2617_s19 = scalar_lea.hbm %s3651_s2, 2048 }
 0x290   : > { %p2614_p13 = scmp.ne.s32.totalorder %s3600_s29, %s2613_s6  ;;  %p2618_p12 = scmp.lt.u32.totalorder %s3600_s29, %s3651_s2 }
 0x291   : > { %p2619_p4 = scmp.lt.u32.totalorder %s2617_s19, %s2613_s6  ;;  %p2621_p5 = scmp.lt.u32.totalorder %s2613_s6, %s3600_s29 }
 0x292   : > { %p2615_p2 = pnand %p2614_p13, %p3686_p10 }
 0x293   : > { %p2620_p8 = por %p2619_p4, %p2618_p12 }
 0x294   : > { %p2616_p6 = pneg %p2615_p2 }
 0x295   : > { %p2622_p11 = por %p2621_p5, %p2620_p8 }
 0x297   : > { %p2623_p1 = pnand %p2622_p11, %p2616_p6 }
 0x299   : > { %2626 = shalt.err (!%p2623_p1)
}
 0x29a   : > { %2468 = dma.vmem_to_hbm [thread:$0]  (%p3686_p10), %s3602_s26, 1024, %s3600_s29, %s2172_s12  }
 0x29b PF: > { %s2200_s4 = sand.u32 1, %s2665_s9   ;;  %p3687_p0 = scmp.ne.s32.totalorder %s3662_s22, 0 }
 0x29c   : > { %p3688_p9 = scmp.ge.s32.totalorder %s2685_s14, 2  ;;  %s2201_s18 = scalar_lea.sflag [#allocation4], %s2200_s4 }
 0x29e   : > { %p2479_p3 = pnand %p3688_p9, %p3687_p0 }
 0x2a0   : > { %2660 = dma.done.wait (!%p2479_p3), %s2201_s18, 1024  }
 0x2a1   : > { %2662 = vsyncadd (!%p2479_p3), %s2201_s18, 4294966272  ;;  %s19_s14 = sadd.s32 1, %s2685_s14   ;;  %s3689_s9 = smov %s2669_s10 }
 0x2a2   : > { %p16_p7 = scmp.ge.s32.totalorder %s19_s14, 4   ;;  %s3690_s10 = smov %s2673_s11 }
 0x2a3   : > { %s3691_s11 = smov %s2828_s25  ;;  %s3692_s12 = smov %s2681_s13 }
 0x2a4   : > { %s3693_s13 = smov %s3695_s28  ;;  %18 = sbr.rel (!%p16_p7) target bundleno = 7 (0x7), region = 79 }
 0x2ab   :  { %2206 = vsyncpa [#allocation3], 1 }
 0x2ac   :  { %2208 = vsyncpa [#allocation3 + $0x1], 1 }
 0x2ad   :  { %2209 = vsyncpa [#allocation6], 1 }
 0x2ae   :  { %2211 = vsyncpa [#allocation6 + $0x1], 1 }
 0x2af   :  { %2212 = vsyncpa [#allocation4], 1 }
 0x2b0   :  { %2214 = vsyncpa [#allocation4 + $0x1], 1 }

// kernel: encoder_forward.5
= control target key start
LH: loop header
LB: loop body
LE: loop exit
PB: predicated region body
PF: predicated region fallthrough
CT: control target
= control target key end

     0   :  { %8 = vsyncpa [#allocation4], 0  ;;  %s3871_s0 = inlined_call_operand.hbm [shape: bf16[8,8,32], index: 0, kind: input, shape index: {}]   ;;  %s3872_s1 = inlined_call_operand.hbm [shape: f32[1,768], index: 1, kind: input, shape index: {}]   ;;  %s3873_s2 = inlined_call_operand.hbm [shape: bf16[2,32,896], index: 2, kind: input, shape index: {}]   ;;  %s3874_s3 = inlined_call_operand.hbm [shape: bf16[2,8,768], index: 3, kind: output, shape index: {}]  }
   0x1   :  { %9 = vsyncpa [#allocation7], 0 }
   0x2   :  { %10 = vsyncpa [#allocation5], 0 }
   0x3   :  { %12 = vsyncpa [#allocation5 + $0x1], 0  ;;  %s3180_s12 = smov 0   ;;  %s3182_s13 = smov 0  }
   0x4   :  { %s3184_s14 = smov 0   ;;  %s3186_s15 = smov 0  }
   0x5   :  { %s3188_s16 = smov 0   ;;  %s3190_s17 = smov 0  }
   0x6 LB: > { %s3211_s18 = sadd.s32 4294967295, %s3142_s17   ;;  %s2600_s19 = sadd.s32 4294967294, %s3142_s17   ;;  %s3142_s17 = sphi %s3190_s17, %s18_s17   ;;  %s3138_s16 = sphi %s3188_s16, %s3897_s16   ;;  %s3134_s15 = sphi %s3186_s15, %s3896_s15   ;;  %s3130_s14 = sphi %s3184_s14, %s3895_s14   ;;  %s3126_s13 = sphi %s3182_s13, %s3894_s13   ;;  %s3122_s12 = sphi %s3180_s12, %s3893_s12  }
   0x7   : > { %s84_s20 = sadd.s32 1, %s3130_s14  ;;  %p91_p0 = scmp.ne.s32.totalorder %s3130_s14, %s3126_s13 }
   0x8   : > { %p92_p1 = scmp.eq.s32.totalorder %s3142_s17, 0  ;;  %p97_p2 = scmp.ne.s32.totalorder %s3126_s13, %s3122_s12 }
   0x9   : > { %p3875_p3 = scmp.eq.s32.totalorder %s3211_s18, 0  ;;  %p123_p4 = scmp.eq.s32.totalorder %s3211_s18, 1 }
   0xa   : > { %p3222_p5 = por %p92_p1, %p91_p0  ;;  %p129_p6 = scmp.eq.s32.totalorder %s2600_s19, 1 }
   0xb   : > { %p3228_p7 = por %p3875_p3, %p97_p2  ;;  %p3232_p8 = por %p123_p4, %p91_p0 }
   0xc   : > { %p3236_p9 = por %p129_p6, %p97_p2  ;;  %p2601_p10 = scmp.ge.s32.totalorder %s3142_s17, 1 }
   0xd   : > { %s3879_s22 = scalar_select %p3228_p7, 1, 0 }
   0xe   : > { %s3880_s23 = scalar_select %p3232_p8, 1, 0 }
   0xf   : > { %s3881_s24 = scalar_select %p3236_p9, 1, 0 }
  0x10   : > { %p136_p11 = scmp.lt.s32.totalorder %s3142_s17, 3  ;;  %s3144_s26 = smov [#allocation3]  }
  0x11   : > { %s150_s27 = sshll.u32 %s3144_s26, 4  ;;  %p2866_p1 = scmp.lt.s32.totalorder %s3142_s17, 2  ;;  %s3246_s27 = int_to_ptr.vmem [resolvable:$true] %s150_s27 }
  0x12   : > { %p3242_p12 = pnand %p2601_p10, %p136_p11  ;;  %s3145_s29 = smov [#allocation6]  }
  0x13   : > { %s164_s30 = sshll.u32 %s3145_s29, 4  ;;  %p3260_p4 = pnand %p2866_p1, %p3222_p5  ;;  %s3264_s30 = int_to_ptr.vmem [resolvable:$true] %s164_s30 }
  0x14   : > { %p2849_p13 = pneg %p3242_p12  ;;  %s2966_s7 = scalar_lea.hbm %s3871_s0, 512 }
  0x15   : > { %p2967_p6 = scmp.ne.s32.totalorder %s3871_s0, %s2966_s7  ;;  %p2973_p5 = scmp.lt.u32.totalorder %s2966_s7, %s3871_s0 }
  0x16   : > { %p3254_p2 = pnand %p2849_p13, %p3875_p3 }
  0x18   : > { %p2968_p10 = pneg %p3254_p2 }
  0x1a   : > { %p2969_p11 = pnand %p2968_p10, %p2967_p6 }
  0x1c   : > { %p2970_p13 = pneg %p2969_p11 }
  0x1e   : > { %p2975_p1 = pnand %p2973_p5, %p2970_p13 }
  0x20   : > { %2978 = shalt.err (!%p2975_p1)
}
  0x21   : > { %s2979_s19 = scalar_lea.vmem %s3246_s27, 512  ;;  %p2987_p8 = scmp.lt.s32.totalorder %s3246_s27, %s3246_s27 }
  0x22   : > { %p2980_p0 = scmp.ne.s32.totalorder %s3246_s27, %s2979_s19  ;;  %p2988_p6 = scmp.lt.s32.totalorder %s2979_s19, %s2979_s19 }
  0x24   : > { %p2982_p3 = pnand %p2980_p0, %p2968_p10  ;;  %p2989_p11 = por %p2988_p6, %p2987_p8 }
  0x26   : > { %p2983_p9 = pneg %p2982_p3 }
  0x28   : > { %p2990_p7 = pnand %p2989_p11, %p2983_p9 }
  0x2a   : > { %2993 = shalt.err (!%p2990_p7)
}
  0x2b   : > { %s3146_s21 = smov 64   ;;  %s3147_s26 = smov 4  }
  0x2c   : > { %2852 = dma.hbm_to_vmem [thread:$0]  (!%p3254_p2), %s3871_s0, 512, %s3246_s27, [#allocation4], %s3146_s21, %s3146_s21, %s3147_s26  }
  0x2d   : > { %s2994_s8 = scalar_lea.hbm %s3872_s1, 96 }
  0x2e   : > { %p2995_p3 = scmp.ne.s32.totalorder %s3872_s1, %s2994_s8  ;;  %p3001_p9 = scmp.lt.u32.totalorder %s2994_s8, %s3872_s1 }
  0x30   : > { %p2997_p7 = pnand %p2995_p3, %p2968_p10 }
  0x32   : > { %p2998_p8 = pneg %p2997_p7 }
  0x34   : > { %p3003_p0 = pnand %p3001_p9, %p2998_p8 }
  0x36   : > { %3006 = shalt.err (!%p3003_p0)
}
  0x37   : > { %s3007_s27 = scalar_lea.vmem %s3264_s30, 96  ;;  %p3015_p6 = scmp.lt.s32.totalorder %s3264_s30, %s3264_s30 }
  0x38   : > { %p3008_p13 = scmp.ne.s32.totalorder %s3264_s30, %s3007_s27  ;;  %p3016_p11 = scmp.lt.s32.totalorder %s3007_s27, %s3007_s27 }
  0x3a   : > { %p3010_p5 = pnand %p3008_p13, %p2968_p10  ;;  %p3017_p3 = por %p3016_p11, %p3015_p6 }
  0x3c   : > { %p3011_p1 = pneg %p3010_p5 }
  0x3e   : > { %p3018_p7 = pnand %p3017_p3, %p3011_p1 }
  0x40   : > { %3021 = shalt.err (!%p3018_p7)
}
  0x41   : > { %2855 = dma.hbm_to_vmem [thread:$0]  (!%p3254_p2), %s3872_s1, 96, %s3264_s30, [#allocation7]  }
  0x42   : > { %s30_s29 = sadd.s32 1, %s3138_s16  ;;  %s175_s5 = sand.u32 1, %s3142_s17  }
  0x43   : > { %p32_p10 = scmp.ge.s32.totalorder %s30_s29, 2  ;;  %s177_s6 = sand.u32 1, %s3130_s14  }
  0x44   : > { %s2833_s7 = smul.u32 1792, %s3138_s16  ;;  %s3338_s21 = scalar_lea.sflag [#allocation4], %s175_s5 }
  0x45   : > { %s3899_s29 = smov (%p32_p10, %s30_s29), 0  ;;  %s2832_s28 = smul.u32 112, %s177_s6 }
  0x46   : > { %s3327_s10 = scalar_lea.hbm %s3873_s2, %s2833_s7  ;;  %s81_s30 = ssub.s32 %s3138_s16, %s3899_s29 }
  0x47   : > { %p82_p2 = scmp.eq.s32.totalorder %s81_s30, 0  ;;  %s179_s11 = scalar_lea.vmem [#allocation8], %s2832_s28 }
  0x48   : > { %s186_s19 = sshll.u32 %s179_s11, 4  ;;  %s3022_s26 = scalar_lea.hbm %s3327_s10, 1792  ;;  %s3336_s19 = int_to_ptr.vmem [resolvable:$true] %s186_s19 }
  0x49   : > { %s3334_s27 = scalar_select %p82_p2, %s3130_s14, %s84_s20  }
  0x4a   : > { %p3023_p8 = scmp.ne.s32.totalorder %s3327_s10, %s3022_s26  ;;  %p3024_p9 = pneg %p3260_p4 }
  0x4b   : > { %s3027_s28 = scalar_lea.hbm %s3873_s2, 3584  ;;  %p3028_p5 = scmp.lt.u32.totalorder %s3327_s10, %s3873_s2 }
  0x4c   : > { %p3025_p0 = pnand %p3024_p9, %p3023_p8  ;;  %p3029_p1 = scmp.lt.u32.totalorder %s3027_s28, %s3022_s26 }
  0x4d   : > { %p3031_p11 = scmp.lt.u32.totalorder %s3022_s26, %s3327_s10 }
  0x4e   : > { %p3026_p13 = pneg %p3025_p0  ;;  %p3030_p6 = por %p3029_p1, %p3028_p5 }
  0x50   : > { %p3032_p3 = por %p3031_p11, %p3030_p6 }
  0x52   : > { %p3033_p7 = pnand %p3032_p3, %p3026_p13 }
  0x54   : > { %3036 = shalt.err (!%p3033_p7)
}
  0x55   : > { %s3037_s20 = scalar_lea.vmem %s3336_s19, 1792  ;;  %s3148_s5 = smov [#allocation8]  }
  0x56   : > { %p3038_p10 = scmp.ne.s32.totalorder %s3336_s19, %s3037_s20  ;;  %s3042_s30 = sshll.u32 %s3148_s5, 4  ;;  %s3043_s30 = int_to_ptr.vmem [resolvable:$false] %s3042_s30 }
  0x57   : > { %s3044_s11 = scalar_lea.vmem %s3043_s30, 3584  ;;  %p3045_p0 = scmp.lt.s32.totalorder %s3336_s19, %s3043_s30 }
  0x58   : > { %p3040_p2 = pnand %p3038_p10, %p3024_p9  ;;  %p3046_p5 = scmp.lt.s32.totalorder %s3044_s11, %s3037_s20 }
  0x5a   : > { %p3041_p8 = pneg %p3040_p2  ;;  %p3047_p1 = por %p3046_p5, %p3045_p0 }
  0x5c   : > { %p3048_p6 = pnand %p3047_p1, %p3041_p8 }
  0x5e   : > { %3051 = shalt.err (!%p3048_p6)
}
  0x5f   : > { %s3149_s26 = smov 448   ;;  %s3150_s6 = smov 28  }
  0x60   : > { %2859 = dma.hbm_to_vmem [thread:$0]  (!%p3260_p4), %s3327_s10, 1792, %s3336_s19, %s3338_s21, %s3149_s26, %s3149_s26, %s3150_s6  }
  0x61   : > { %198 = sbr.rel (%p3242_p12) target bundleno = 833 (0x341), region = 32  ;;  %p3885_p9 = scmp.eq.s32.totalorder (!%p3242_p12), %s3211_s18, 0 }
  0x68   : > { %3105 = dma.done.wait (%p3885_p9), [#allocation4], 512   ;;  %p3886_p13 = pmov %p3885_p9 }
  0x69   : > { %p3887_p11 = pmov %p3885_p9 }
  0x6a   : > { %3107 = vsyncadd (%p3886_p13), [#allocation4], 4294966784 }
  0x6b   : > { %3109 = dma.done.wait (%p3887_p11), [#allocation7], 96   ;;  %p3888_p3 = pmov %p3885_p9 }
  0x6c   : > { %s208_s4 = sand.u32 1, %s3211_s18   ;;  %s3378_s10 = sand.u32 1, %s3126_s13  }
  0x6d   : > { %3111 = vsyncadd (%p3888_p3), [#allocation7], 4294967200  ;;  %s2834_s25 = smul.u32 112, %s3378_s10  ;;  %s209_s19 = scalar_lea.sflag [#allocation4], %s208_s4 }
  0x6e   : > { %p3889_p12 = scmp.ne.s32.totalorder %s3879_s22, 0 }
  0x6f   : > { %s3381_s21 = scalar_lea.vmem [#allocation8], %s2834_s25 }
  0x70   : > { %3113 = dma.done.wait (%p3889_p12), %s209_s19, 1792  }
  0x71   : > { %3115 = vsyncadd (%p3889_p12), %s209_s19, 4294965504  ;;  %v3151_v0 = vmov 0   ;;  %v3390_v1 = vld [vmem:[%s3381_s21 + $0x4] ss:$28 sps:$4 sm:$0xff]   ;;  %s3152_s18 = smov 119   ;;  %s3153_s22 = smov 127  }
  0x72   : > { %345 = vmatprep.mubr.bf16.mxu1 %v3151_v0  ;;  %885 = vmatprep.mubr.bf16.mxu0 %v3151_v0  ;;  %v3393_v2 = vld [vmem:[%s3381_s21] ss:$28 sps:$4 sm:$0xff]   ;;  %v3398_v3 = vld [vmem:[%s3381_s21 + $0x8] ss:$28 sps:$4 sm:$0xff]   ;;  %v3408_v5 = vld [vmem:[%s3381_s21 + $0x38] ss:$28 sps:$4 sm:$0xff]  }
  0x73   : > { %799 = vrot.lane.b32.xlu0 %v3390_v1, %s3152_s18  ;;  %313 = vmatprep.subr.bf16.mxu1 %v3390_v1  ;;  %v3404_v4 = vld [vmem:[%s3381_s21 + $0x3c] ss:$28 sps:$4 sm:$0xff]   ;;  %v3416_v6 = vld [vmem:[%s3381_s21 + $0xc] ss:$28 sps:$4 sm:$0xff]   ;;  %vm309_vm0 = vcmask 261120   ;;  %s3154_s7 = smov 118  }
  0x74   : > { %797 = vrot.lane.b32.xlu1 %v3393_v2, %s3152_s18  ;;  %314 = vmatpush1.bf16.msra.mxu1 %v3393_v2  ;;  %v3425_v7 = vld [vmem:[%s3381_s21 + $0x40] ss:$28 sps:$4 sm:$0xff]   ;;  %v3443_v10 = vld [vmem:[%s3381_s21 + $0x14] ss:$28 sps:$4 sm:$0xff]   ;;  %v3456_v13 = vld [vmem:[%s3381_s21 + $0x4c] ss:$28 sps:$4 sm:$0xff]  }
  0x75   : > { %315 = vmatprep.subr.bf16.mxu1 %v3404_v4  ;;  %v236_v8 = vld [vmem:[#allocation3] sm:$0xf]  ;;  %v3432_v9 = vld [vmem:[%s3381_s21 + $0x44] ss:$28 sps:$4 sm:$0xff]   ;;  %s3155_s28 = smov 47   ;;  %s3156_s8 = smov 46  }
  0x76   : > { %v2944_v11 = vld [vmem:[%s3381_s21 + $0x18] ss:$28 sps:$4 sm:$0xff]   ;;  %v3453_v12 = vld [vmem:[%s3381_s21 + $0x10] ss:$28 sps:$4 sm:$0xff]   ;;  %v3465_v14 = vld [vmem:[%s3381_s21 + $0x48] ss:$28 sps:$4 sm:$0xff]  }
  0x77   : > { %801 = vrot.lane.b32.xlu0 %v3398_v3, %s3152_s18  ;;  %v2949_v15 = vld [vmem:[%s3381_s21 + $0x50] ss:$28 sps:$4 sm:$0xff]   ;;  %v2952_v16 = vld [vmem:[%s3381_s21 + $0x18] ss:$28 sps:$4 sm:$0xff]   ;;  %vm825_vm1 = vcmask 973824   ;;  %vm552_vm2 = vcmask 1039360  }
  0x78   : > { %526 = vrot.lane.b32.xlu1 %v3390_v1, %s3153_s22  ;;  %316 = vmatpush1.bf16.msra.mxu1 %v3408_v5  ;;  %v2953_v17 = vld [vmem:[%s3381_s21 + $0x50] ss:$28 sps:$4 sm:$0xff]   ;;  %v2954_v18 = vld [vmem:[%s3381_s21 + $0x18] ss:$28 sps:$4 sm:$0xff]   ;;  %s3157_s9 = smov 38   ;;  %vm1098_vm3 = vcmask 965632  }
  0x79   : > { %354 = vmatprep.subr.bf16.mxu1 %v3416_v6  ;;  %v2955_v19 = vld [vmem:[%s3381_s21 + $0x50] ss:$28 sps:$4 sm:$0xff]   ;;  %v2956_v20 = vld [vmem:[%s3381_s21 + $0x18] ss:$28 sps:$4 sm:$0xff]   ;;  %s3158_s20 = smov 37   ;;  %vm1371_vm4 = vcmask 384000  }
  0x7a   : > { %v2957_v21 = vld [vmem:[%s3381_s21 + $0x50] ss:$28 sps:$4 sm:$0xff]   ;;  %v2958_v28 = vld [vmem:[%s3381_s21 + $0x18] ss:$28 sps:$4 sm:$0xff]   ;;  %vm1644_vm5 = vcmask 375808   ;;  %vm1917_vm6 = vcmask 310272  }
  0x7b   : > { %528 = vrot.lane.b32.xlu0 %v3398_v3, %s3153_s22  ;;  %2621 = vmatmul.mubr.msk.bf16.vlgmr.msra.gmra.mrb[0].mxu1 %vm309_vm0, %v236_v8  ;;  %v2959_v36 = vld [vmem:[%s3381_s21 + $0x50] ss:$28 sps:$4 sm:$0xff]   ;;  %v2960_v56 = vld [vmem:[%s3381_s21 + $0x18] ss:$28 sps:$4 sm:$0xff]   ;;  %vm2190_vm7 = vcmask 302080   ;;  %s2835_s5 = smul.u32 24, %s3378_s10 }
  0x7c   : > { %524 = vrot.lane.b32.xlu1 %v3393_v2, %s3153_s22  ;;  %355 = vmatpush1.bf16.msra.mxu1 %v3398_v3  ;;  %v3589_v40 = vld [vmem:[#allocation3 + $0x8] sm:$0xf]  ;;  %v3601_v45 = vld [vmem:[#allocation3 + $0x4] sm:$0xf]  ;;  %s2836_s30 = smul.u32 384, %s3134_s15  ;;  %s2481_s25 = scalar_lea.sflag [#allocation5], %s3378_s10 }
  0x7d   : > { %356 = vmatprep.subr.bf16.mxu1 %v3432_v9  ;;  %386 = vmatprep.mubr.bf16.mxu1 %v3151_v0  ;;  %s234_s11 = scalar_lea.vmem [#allocation9], %s2835_s5  ;;  %p3890_p7 = scmp.ne.s32.totalorder %s3880_s23, 0 }
  0x7e   : > { %s2497_s26 = sshll.u32 %s234_s11, 4  ;;  %s3822_s4 = scalar_lea.hbm %s3874_s3, %s2836_s30  ;;  %s3824_s26 = int_to_ptr.vmem [resolvable:$true] %s2497_s26 }
  0x7f   : > { %813 = vrot.lane.b32.xlu0 %v3404_v4, %s3152_s18  ;;  %s3052_s19 = scalar_lea.vmem %s3824_s26, 384 }
  0x80   : > { %815 = vrot.lane.b32.xlu1 %v3425_v7, %s3152_s18  ;;  %357 = vmatpush1.bf16.msra.mxu1 %v3425_v7  ;;  %p3053_p4 = scmp.ne.s32.totalorder %s3824_s26, %s3052_s19 }
  0x81   : > { %395 = vmatprep.subr.bf16.mxu1 %v3443_v10 }
  0x82   : > { %p3054_p10 = pnand %p3053_p4, %p3890_p7 }
  0x83   : > { %811 = vrot.lane.b32.xlu0 %v3408_v5, %s3152_s18  ;;  %2622 = vmatmul.mubr.msk.bf16.vlgmr.msra.gmra.mrb[4].mxu1 %vm309_vm0, %v236_v8 }
  0x84   : > { %540 = vrot.lane.b32.xlu1 %v3404_v4, %s3153_s22  ;;  %396 = vmatpush1.bf16.msra.mxu1 %v3453_v12  ;;  %p3055_p2 = pneg %p3054_p10 }
  0x85   : > { %397 = vmatprep.subr.bf16.mxu1 %v3456_v13  ;;  %427 = vmatprep.mubr.bf16.mxu1 %v3151_v0 }
  0x87   : > { %542 = vrot.lane.b32.xlu0 %v3425_v7, %s3153_s22 }
  0x88   : > { %538 = vrot.lane.b32.xlu1 %v3408_v5, %s3153_s22  ;;  %398 = vmatpush1.bf16.msra.mxu1 %v3465_v14 }
  0x8b   : > { %807 = vrot.lane.b32.xlu0 %v3443_v10, %s3152_s18  ;;  %2623 = vmatmul.mubr.msk.bf16.vlgmr.msra.gmra.mrb[8].mxu1 %vm309_vm0, %v236_v8 }
  0x8c   : > { %809 = vrot.lane.b32.xlu1 %v2944_v11, %s3152_s18  ;;  %612 = vmatprep.mubr.bf16.mxu1 %v3151_v0  ;;  %v2961_v11 = vld [vmem:[%s3381_s21 + $0x50] ss:$28 sps:$4 sm:$0xff]  }
  0x8f   : > { %805 = vrot.lane.b32.xlu0 %v3453_v12, %s3152_s18 }
  0x90   : > { %530 = vrot.lane.b32.xlu1 %v3416_v6, %s3153_s22 }
  0x93   : > { %532 = vrot.lane.b32.xlu0 %v3453_v12, %s3153_s22 }
  0x94   : > { %821 = vrot.lane.b32.xlu1 %v3456_v13, %s3152_s18 }
  0x97   : > { %823 = vrot.lane.b32.xlu0 %v2949_v15, %s3152_s18 }
  0x98   : > { %819 = vrot.lane.b32.xlu1 %v3465_v14, %s3152_s18 }
  0x9b   : > { %544 = vrot.lane.b32.xlu0 %v3432_v9, %s3153_s22 }
  0x9c   : > { %546 = vrot.lane.b32.xlu1 %v3465_v14, %s3153_s22 }
  0x9f   : > { %1072 = vrot.lane.b32.xlu0 %v3390_v1, %s3154_s7 }
  0xa0   : > { %1074 = vrot.lane.b32.xlu1 %v3398_v3, %s3154_s7 }
  0xa3   : > { %1070 = vrot.lane.b32.xlu0 %v3393_v2, %s3154_s7 }
  0xa4   : > { %534 = vrot.lane.b32.xlu1 %v3443_v10, %s3153_s22 }
  0xa7   : > { %536 = vrot.lane.b32.xlu0 %v2952_v16, %s3153_s22 }
  0xa8   : > { %1086 = vrot.lane.b32.xlu1 %v3404_v4, %s3154_s7 }
  0xab   : > { %1088 = vrot.lane.b32.xlu0 %v3425_v7, %s3154_s7 }
  0xac   : > { %1084 = vrot.lane.b32.xlu1 %v3408_v5, %s3154_s7 }
  0xaf   : > { %548 = vrot.lane.b32.xlu0 %v3456_v13, %s3153_s22 }
  0xb0   : > { %550 = vrot.lane.b32.xlu1 %v2953_v17, %s3153_s22 }
  0xb3   : > { %1080 = vrot.lane.b32.xlu0 %v3443_v10, %s3154_s7 }
  0xb4   : > { %1082 = vrot.lane.b32.xlu1 %v2954_v18, %s3154_s7 }
  0xb7   : > { %1078 = vrot.lane.b32.xlu0 %v3453_v12, %s3154_s7 }
  0xb8   : > { %803 = vrot.lane.b32.xlu1 %v3416_v6, %s3152_s18 }
  0xbb   : > { %1094 = vrot.lane.b32.xlu0 %v3456_v13, %s3154_s7 }
  0xbc   : > { %1096 = vrot.lane.b32.xlu1 %v2955_v19, %s3154_s7 }
  0xbf   : > { %1092 = vrot.lane.b32.xlu0 %v3465_v14, %s3154_s7 }
  0xc0   : > { %817 = vrot.lane.b32.xlu1 %v3432_v9, %s3152_s18 }
  0xc3   : > { %1345 = vrot.lane.b32.xlu0 %v3390_v1, %s3155_s28 }
  0xc4   : > { %1347 = vrot.lane.b32.xlu1 %v3398_v3, %s3155_s28 }
  0xc7   : > { %1343 = vrot.lane.b32.xlu0 %v3393_v2, %s3155_s28 }
  0xc8   : > { %1359 = vrot.lane.b32.xlu1 %v3404_v4, %s3155_s28 }
  0xcb   : > { %1361 = vrot.lane.b32.xlu0 %v3425_v7, %s3155_s28 }
  0xcc   : > { %1357 = vrot.lane.b32.xlu1 %v3408_v5, %s3155_s28 }
  0xcf   : > { %1076 = vrot.lane.b32.xlu0 %v3416_v6, %s3154_s7 }
  0xd0   : > { %1353 = vrot.lane.b32.xlu1 %v3443_v10, %s3155_s28 }
  0xd3   : > { %1355 = vrot.lane.b32.xlu0 %v2956_v20, %s3155_s28 }
  0xd4   : > { %1351 = vrot.lane.b32.xlu1 %v3453_v12, %s3155_s28 }
  0xd7   : > { %1090 = vrot.lane.b32.xlu0 %v3432_v9, %s3154_s7 }
  0xd8   : > { %1367 = vrot.lane.b32.xlu1 %v3456_v13, %s3155_s28 }
  0xdb   : > { %1369 = vrot.lane.b32.xlu0 %v2957_v21, %s3155_s28 }
  0xdc   : > { %1365 = vrot.lane.b32.xlu1 %v3465_v14, %s3155_s28 }
  0xdf   : > { %1618 = vrot.lane.b32.xlu0 %v3390_v1, %s3156_s8 }
  0xe0   : > { %1620 = vrot.lane.b32.xlu1 %v3398_v3, %s3156_s8 }
  0xe3   : > { %1616 = vrot.lane.b32.xlu0 %v3393_v2, %s3156_s8 }
  0xe4   : > { %1349 = vrot.lane.b32.xlu1 %v3416_v6, %s3155_s28 }
  0xe5   : > { %v800_v22 = vpop.permute.xlu0 %799 }
  0xe6   : > { %v798_v23 = vpop.permute.xlu1 %797 }
  0xe7   : > { %1632 = vrot.lane.b32.xlu0 %v3404_v4, %s3156_s8  ;;  %v826_v27 = vsel %vm825_vm1, %v798_v23, %v800_v22 }
  0xe8   : > { %1634 = vrot.lane.b32.xlu1 %v3425_v7, %s3156_s8 }
  0xe9   : > { %v3563_v24 = vpop.permute.xlu0 %801 }
  0xea   : > { %v527_v25 = vpop.permute.xlu1 %526  ;;  %v827_v26 = vsel %vm825_vm1, %v800_v22, %v3563_v24 }
  0xeb   : > { %853 = vmatprep.subr.bf16.mxu0 %v827_v26  ;;  %1630 = vrot.lane.b32.xlu0 %v3408_v5, %s3156_s8 }
  0xec   : > { %1363 = vrot.lane.b32.xlu1 %v3432_v9, %s3155_s28  ;;  %854 = vmatpush1.bf16.msra.mxu0 %v826_v27 }
  0xed   : > { %v529_v29 = vpop.permute.xlu0 %528 }
  0xee   : > { %v525_v30 = vpop.permute.xlu1 %524  ;;  %v554_v31 = vsel %vm552_vm2, %v527_v25, %v529_v29 }
  0xef   : > { %v553_v32 = vsel %vm552_vm2, %v525_v30, %v527_v25  ;;  %1626 = vrot.lane.b32.xlu0 %v3443_v10, %s3156_s8  ;;  %580 = vmatprep.subr.bf16.mxu1 %v554_v31 }
  0xf0   : > { %1628 = vrot.lane.b32.xlu1 %v2958_v28, %s3156_s8  ;;  %581 = vmatpush1.bf16.msra.mxu1 %v553_v32 }
  0xf1   : > { %v814_v33 = vpop.permute.xlu0 %813 }
  0xf2   : > { %v3578_v34 = vpop.permute.xlu1 %815 }
  0xf3   : > { %1624 = vrot.lane.b32.xlu0 %v3453_v12, %s3156_s8  ;;  %v833_v35 = vsel %vm825_vm1, %v814_v33, %v3578_v34 }
  0xf4   : > { %1640 = vrot.lane.b32.xlu1 %v3456_v13, %s3156_s8  ;;  %855 = vmatprep.subr.bf16.mxu0 %v833_v35 }
  0xf5   : > { %v812_v37 = vpop.permute.xlu0 %811 }
  0xf6   : > { %v541_v38 = vpop.permute.xlu1 %540  ;;  %v832_v39 = vsel %vm825_vm1, %v812_v37, %v814_v33 }
  0xf7   : > { %1642 = vrot.lane.b32.xlu0 %v2959_v36, %s3156_s8  ;;  %856 = vmatpush1.bf16.msra.mxu0 %v832_v39 }
  0xf8   : > { %1638 = vrot.lane.b32.xlu1 %v3465_v14, %s3156_s8 }
  0xf9   : > { %v543_v41 = vpop.permute.xlu0 %542 }
  0xfa   : > { %v539_v42 = vpop.permute.xlu1 %538  ;;  %v560_v43 = vsel %vm552_vm2, %v541_v38, %v543_v41  ;;  %2655 = vmatmul.mubr.msk.bf16.vlgmr.msra.gmra.mrb[0].mxu0 %vm309_vm0, %v3589_v40 }
  0xfb   : > { %v559_v44 = vsel %vm552_vm2, %v539_v42, %v541_v38  ;;  %1622 = vrot.lane.b32.xlu0 %v3416_v6, %s3156_s8  ;;  %582 = vmatprep.subr.bf16.mxu1 %v560_v43 }
  0xfc   : > { %1891 = vrot.lane.b32.xlu1 %v3390_v1, %s3157_s9  ;;  %583 = vmatpush1.bf16.msra.mxu1 %v559_v44 }
  0xfd   : > { %v808_v46 = vpop.permute.xlu0 %807  ;;  %967 = vmatprep.mubr.bf16.mxu0 %v3151_v0 }
  0xfe   : > { %v810_v47 = vpop.permute.xlu1 %809 }
  0xff   : > { %1893 = vrot.lane.b32.xlu0 %v3398_v3, %s3157_s9  ;;  %v831_v48 = vsel %vm825_vm1, %v808_v46, %v810_v47  ;;  %2638 = vmatmul.mubr.msk.bf16.vlgmr.msra.gmra.mrb[0].mxu1 %vm309_vm0, %v3601_v45 }
 0x100   : > { %1889 = vrot.lane.b32.xlu1 %v3393_v2, %s3157_s9  ;;  %935 = vmatprep.subr.bf16.mxu0 %v831_v48 }
 0x101   : > { %v3611_v49 = vpop.permute.xlu0 %805  ;;  %653 = vmatprep.mubr.bf16.mxu1 %v3151_v0 }
 0x102   : > { %v830_v50 = vsel %vm825_vm1, %v3611_v49, %v808_v46  ;;  %v531_v51 = vpop.permute.xlu1 %530 }
 0x103   : > { %1636 = vrot.lane.b32.xlu0 %v3432_v9, %s3156_s8  ;;  %936 = vmatpush1.bf16.msra.mxu0 %v830_v50  ;;  %v555_v55 = vsel %vm552_vm2, %v529_v29, %v531_v51 }
 0x104   : > { %1905 = vrot.lane.b32.xlu1 %v3404_v4, %s3157_s9 }
 0x105   : > { %v533_v52 = vpop.permute.xlu0 %532 }
 0x106   : > { %v822_v53 = vpop.permute.xlu1 %821  ;;  %v556_v54 = vsel %vm552_vm2, %v531_v51, %v533_v52  ;;  %v3727_v51 = vld [vmem:[#allocation3 + $0x10] sm:$0xf] }
 0x107   : > { %1907 = vrot.lane.b32.xlu0 %v3425_v7, %s3157_s9  ;;  %621 = vmatprep.subr.bf16.mxu1 %v556_v54 }
 0x108   : > { %1903 = vrot.lane.b32.xlu1 %v3408_v5, %s3157_s9  ;;  %622 = vmatpush1.bf16.msra.mxu1 %v555_v55 }
 0x109   : > { %v824_v57 = vpop.permute.xlu0 %823 }
 0x10a   : > { %v3627_v58 = vpop.permute.xlu1 %819  ;;  %v837_v59 = vsel %vm825_vm1, %v822_v53, %v824_v57 }
 0x10b   : > { %v836_v60 = vsel %vm825_vm1, %v3627_v58, %v822_v53  ;;  %1899 = vrot.lane.b32.xlu0 %v3443_v10, %s3157_s9  ;;  %937 = vmatprep.subr.bf16.mxu0 %v837_v59 }
 0x10c   : > { %1901 = vrot.lane.b32.xlu1 %v2960_v56, %s3157_s9  ;;  %938 = vmatpush1.bf16.msra.mxu0 %v836_v60 }
 0x10d   : > { %v545_v61 = vpop.permute.xlu0 %544 }
 0x10e   : > { %v561_v62 = vsel %vm552_vm2, %v543_v41, %v545_v61  ;;  %v547_v63 = vpop.permute.xlu1 %546 }
 0x10f   : > { %1897 = vrot.lane.b32.xlu0 %v3453_v12, %s3157_s9  ;;  %v562_v8 = vsel %vm552_vm2, %v545_v61, %v547_v63  ;;  %2657 = vmatmul.mubr.msk.bf16.vlgmr.msra.gmra.mrb[4].mxu0 %vm309_vm0, %v3589_v40 }
 0x110   : > { %1895 = vrot.lane.b32.xlu1 %v3416_v6, %s3157_s9  ;;  %623 = vmatprep.subr.bf16.mxu1 %v562_v8 }
 0x111   : > { %624 = vmatpush1.bf16.msra.mxu1 %v561_v62  ;;  %v1073_v15 = vpop.permute.xlu0 %1072  ;;  %1158 = vmatprep.mubr.bf16.mxu0 %v3151_v0 }
 0x112   : > { %v3645_v16 = vpop.permute.xlu1 %1074 }
 0x113   : > { %1913 = vrot.lane.b32.xlu0 %v3456_v13, %s3157_s9  ;;  %v1100_v17 = vsel %vm1098_vm3, %v1073_v15, %v3645_v16 }
 0x114   : > { %1915 = vrot.lane.b32.xlu1 %v2961_v11, %s3157_s9  ;;  %1126 = vmatprep.subr.bf16.mxu0 %v1100_v17 }
 0x115   : > { %v1071_v18 = vpop.permute.xlu0 %1070  ;;  %2639 = vmatmul.mubr.msk.bf16.vlgmr.msra.gmra.mrb[4].mxu1 %vm309_vm0, %v3601_v45 }
 0x116   : > { %v1099_v19 = vsel %vm1098_vm3, %v1071_v18, %v1073_v15  ;;  %v535_v20 = vpop.permute.xlu1 %534  ;;  %694 = vmatprep.mubr.bf16.mxu1 %v3151_v0 }
 0x117   : > { %1911 = vrot.lane.b32.xlu0 %v3465_v14, %s3157_s9  ;;  %1127 = vmatpush1.bf16.msra.mxu0 %v1099_v19  ;;  %v557_v25 = vsel %vm552_vm2, %v533_v52, %v535_v20 }
 0x118   : > { %1909 = vrot.lane.b32.xlu1 %v3432_v9, %s3157_s9 }
 0x119   : > { %v537_v21 = vpop.permute.xlu0 %536 }
 0x11a   : > { %v1087_v22 = vpop.permute.xlu1 %1086  ;;  %v558_v23 = vsel %vm552_vm2, %v535_v20, %v537_v21 }
 0x11b   : > { %2164 = vrot.lane.b32.xlu0 %v3390_v1, %s3158_s20  ;;  %662 = vmatprep.subr.bf16.mxu1 %v558_v23  ;;  %v3675_v1 = vld [vmem:[#allocation3 + $0xc] sm:$0xf] }
 0x11c   : > { %2166 = vrot.lane.b32.xlu1 %v3398_v3, %s3158_s20  ;;  %663 = vmatpush1.bf16.msra.mxu1 %v557_v25 }
 0x11d   : > { %v3666_v26 = vpop.permute.xlu0 %1088 }
 0x11e   : > { %v1085_v27 = vpop.permute.xlu1 %1084  ;;  %v1106_v28 = vsel %vm1098_vm3, %v1087_v22, %v3666_v26 }
 0x11f   : > { %v1105_v29 = vsel %vm1098_vm3, %v1085_v27, %v1087_v22  ;;  %2162 = vrot.lane.b32.xlu0 %v3393_v2, %s3158_s20  ;;  %1128 = vmatprep.subr.bf16.mxu0 %v1106_v28 }
 0x120   : > { %2178 = vrot.lane.b32.xlu1 %v3404_v4, %s3158_s20  ;;  %1129 = vmatpush1.bf16.msra.mxu0 %v1105_v29 }
 0x121   : > { %v549_v3 = vpop.permute.xlu0 %548 }
 0x122   : > { %v563_v30 = vsel %vm552_vm2, %v547_v63, %v549_v3  ;;  %v551_v31 = vpop.permute.xlu1 %550 }
 0x123   : > { %2180 = vrot.lane.b32.xlu0 %v3425_v7, %s3158_s20  ;;  %v564_v32 = vsel %vm552_vm2, %v549_v3, %v551_v31  ;;  %2672 = vmatmul.mubr.msk.bf16.vlgmr.msra.gmra.mrb[0].mxu0 %vm309_vm0, %v3675_v1  ;;  %v2962_v7 = vld [vmem:[%s3381_s21 + $0x18] ss:$28 sps:$4 sm:$0xff]   ;;  %v1541_v31 = vld [vmem:[#allocation3 + $0x14] sm:$0xf] }
 0x124   : > { %2176 = vrot.lane.b32.xlu1 %v3408_v5, %s3158_s20  ;;  %664 = vmatprep.subr.bf16.mxu1 %v564_v32 }
 0x125   : > { %665 = vmatpush1.bf16.msra.mxu1 %v563_v30  ;;  %v1081_v2 = vpop.permute.xlu0 %1080  ;;  %1240 = vmatprep.mubr.bf16.mxu0 %v3151_v0 }
 0x126   : > { %v1083_v4 = vpop.permute.xlu1 %1082 }
 0x127   : > { %2168 = vrot.lane.b32.xlu0 %v3416_v6, %s3158_s20  ;;  %v1104_v33 = vsel %vm1098_vm3, %v1081_v2, %v1083_v4 }
 0x128   : > { %2170 = vrot.lane.b32.xlu1 %v3453_v12, %s3158_s20  ;;  %1208 = vmatprep.subr.bf16.mxu0 %v1104_v33 }
 0x129   : > { %v1079_v35 = vpop.permute.xlu0 %1078  ;;  %2640 = vmatmul.mubr.msk.bf16.vlgmr.msra.gmra.mrb[8].mxu1 %vm309_vm0, %v3601_v45 }
 0x12a   : > { %v1103_v5 = vsel %vm1098_vm3, %v1079_v35, %v1081_v2  ;;  %v804_v36 = vpop.permute.xlu1 %803  ;;  %926 = vmatprep.mubr.bf16.mxu1 %v3151_v0 }
 0x12b   : > { %v828_v6 = vsel %vm825_vm1, %v3563_v24, %v804_v36  ;;  %2172 = vrot.lane.b32.xlu0 %v3443_v10, %s3158_s20  ;;  %v829_v12 = vsel %vm825_vm1, %v804_v36, %v3611_v49  ;;  %1209 = vmatpush1.bf16.msra.mxu0 %v1103_v5  ;;  %v2963_v10 = vld [vmem:[%s3381_s21 + $0x50] ss:$28 sps:$4 sm:$0xff]   ;;  %s3159_s21 = smov [#allocation9]  }
 0x12c   : > { %2174 = vrot.lane.b32.xlu1 %v2962_v7, %s3158_s20  ;;  %894 = vmatprep.subr.bf16.mxu1 %v829_v12  ;;  %s3056_s18 = sshll.u32 %s3159_s21, 4  ;;  %s3057_s18 = int_to_ptr.vmem [resolvable:$false] %s3056_s18 }
 0x12d   : > { %895 = vmatpush1.bf16.msra.mxu1 %v828_v6  ;;  %v1095_v37 = vpop.permute.xlu0 %1094  ;;  %s3058_s22 = scalar_lea.vmem %s3057_s18, 768  ;;  %p3059_p8 = scmp.lt.s32.totalorder %s3824_s26, %s3057_s18 }
 0x12e   : > { %v1097_v38 = vpop.permute.xlu1 %1096  ;;  %p3060_p0 = scmp.lt.s32.totalorder %s3058_s22, %s3052_s19 }
 0x12f   : > { %2182 = vrot.lane.b32.xlu0 %v3432_v9, %s3158_s20  ;;  %v1110_v39 = vsel %vm1098_vm3, %v1095_v37, %v1097_v38 }
 0x130   : > { %2184 = vrot.lane.b32.xlu1 %v3465_v14, %s3158_s20  ;;  %1210 = vmatprep.subr.bf16.mxu0 %v1110_v39  ;;  %p3061_p5 = por %p3060_p0, %p3059_p8 }
 0x131   : > { %v1093_v24 = vpop.permute.xlu0 %1092 }
 0x132   : > { %v1109_v41 = vsel %vm1098_vm3, %v1093_v24, %v1095_v37  ;;  %v818_v42 = vpop.permute.xlu1 %817  ;;  %p3062_p1 = pnand %p3061_p5, %p3055_p2 }
 0x133   : > { %v834_v43 = vsel %vm825_vm1, %v3578_v34, %v818_v42  ;;  %2186 = vrot.lane.b32.xlu0 %v3456_v13, %s3158_s20  ;;  %v835_v9 = vsel %vm825_vm1, %v818_v42, %v3627_v58  ;;  %1211 = vmatpush1.bf16.msra.mxu0 %v1109_v41 }
 0x134   : > { %2188 = vrot.lane.b32.xlu1 %v2963_v10, %s3158_s20  ;;  %896 = vmatprep.subr.bf16.mxu1 %v835_v9 }
 0x135   : > { %897 = vmatpush1.bf16.msra.mxu1 %v834_v43  ;;  %v1346_v14 = vpop.permute.xlu0 %1345 }
 0x136   : > { %v1348_v44 = vpop.permute.xlu1 %1347  ;;  %2674 = vmatmul.mubr.msk.bf16.vlgmr.msra.gmra.mrb[4].mxu0 %vm309_vm0, %v3675_v1 }
 0x137   : > { %v1373_v45 = vsel %vm1371_vm4, %v1346_v14, %v1348_v44  ;;  %1431 = vmatprep.mubr.bf16.mxu0 %v3151_v0 }
 0x138   : > { %1399 = vmatprep.subr.bf16.mxu0 %v1373_v45  ;;  %2656 = vmatmul.mubr.msk.bf16.vlgmr.msra.gmra.mrb[4].mxu1 %vm309_vm0, %v3589_v40 }
 0x139   : > { %v1344_v13 = vpop.permute.xlu0 %1343  ;;  %1199 = vmatprep.mubr.bf16.mxu1 %v3151_v0 }
 0x13a   : > { %v1372_v34 = vsel %vm1371_vm4, %v1344_v13, %v1346_v14  ;;  %v1360_v46 = vpop.permute.xlu1 %1359 }
 0x13b   : > { %1400 = vmatpush1.bf16.msra.mxu0 %v1372_v34 }
 0x13d   : > { %v1362_v47 = vpop.permute.xlu0 %1361 }
 0x13e   : > { %v1358_v48 = vpop.permute.xlu1 %1357  ;;  %v1379_v49 = vsel %vm1371_vm4, %v1360_v46, %v1362_v47 }
 0x13f   : > { %v1378_v50 = vsel %vm1371_vm4, %v1358_v48, %v1360_v46  ;;  %1401 = vmatprep.subr.bf16.mxu0 %v1379_v49  ;;  %v1814_v48 = vld [vmem:[#allocation3 + $0x18] sm:$0xf] }
 0x140   : > { %1402 = vmatpush1.bf16.msra.mxu0 %v1378_v50 }
 0x141   : > { %v1077_v52 = vpop.permute.xlu0 %1076 }
 0x142   : > { %v1101_v40 = vsel %vm1098_vm3, %v3645_v16, %v1077_v52  ;;  %v1354_v53 = vpop.permute.xlu1 %1353  ;;  %v1102_v54 = vsel %vm1098_vm3, %v1077_v52, %v1079_v35 }
 0x143   : > { %1167 = vmatprep.subr.bf16.mxu1 %v1102_v54  ;;  %2689 = vmatmul.mubr.msk.bf16.vlgmr.msra.gmra.mrb[0].mxu0 %vm309_vm0, %v3727_v51 }
 0x144   : > { %1168 = vmatpush1.bf16.msra.mxu1 %v1101_v40  ;;  %1513 = vmatprep.mubr.bf16.mxu0 %v3151_v0 }
 0x145   : > { %v1356_v55 = vpop.permute.xlu0 %1355 }
 0x146   : > { %v1352_v56 = vpop.permute.xlu1 %1351  ;;  %v1377_v57 = vsel %vm1371_vm4, %v1354_v53, %v1356_v55 }
 0x147   : > { %v1376_v58 = vsel %vm1371_vm4, %v1352_v56, %v1354_v53  ;;  %1481 = vmatprep.subr.bf16.mxu0 %v1377_v57 }
 0x148   : > { %1482 = vmatpush1.bf16.msra.mxu0 %v1376_v58 }
 0x149   : > { %v1091_v59 = vpop.permute.xlu0 %1090 }
 0x14a   : > { %v1107_v60 = vsel %vm1098_vm3, %v3666_v26, %v1091_v59  ;;  %v1368_v61 = vpop.permute.xlu1 %1367  ;;  %v1108_v62 = vsel %vm1098_vm3, %v1091_v59, %v1093_v24 }
 0x14b   : > { %1169 = vmatprep.subr.bf16.mxu1 %v1108_v62 }
 0x14c   : > { %1170 = vmatpush1.bf16.msra.mxu1 %v1107_v60 }
 0x14d   : > { %v1370_v63 = vpop.permute.xlu0 %1369 }
 0x14e   : > { %v1366_v8 = vpop.permute.xlu1 %1365  ;;  %v1383_v11 = vsel %vm1371_vm4, %v1368_v61, %v1370_v63 }
 0x14f   : > { %v1382_v15 = vsel %vm1371_vm4, %v1366_v8, %v1368_v61  ;;  %1483 = vmatprep.subr.bf16.mxu0 %v1383_v11  ;;  %2673 = vmatmul.mubr.msk.bf16.vlgmr.msra.gmra.mrb[4].mxu1 %vm309_vm0, %v3675_v1 }
 0x150   : > { %1484 = vmatpush1.bf16.msra.mxu0 %v1382_v15  ;;  %1472 = vmatprep.mubr.bf16.mxu1 %v3151_v0 }
 0x151   : > { %v1619_v16 = vpop.permute.xlu0 %1618 }
 0x152   : > { %v1621_v17 = vpop.permute.xlu1 %1620 }
 0x153   : > { %v1646_v18 = vsel %vm1644_vm5, %v1619_v16, %v1621_v17  ;;  %2691 = vmatmul.mubr.msk.bf16.vlgmr.msra.gmra.mrb[4].mxu0 %vm309_vm0, %v3727_v51 }
 0x154   : > { %1672 = vmatprep.subr.bf16.mxu0 %v1646_v18  ;;  %1704 = vmatprep.mubr.bf16.mxu0 %v3151_v0 }
 0x155   : > { %v1617_v19 = vpop.permute.xlu0 %1616 }
 0x156   : > { %v1645_v20 = vsel %vm1644_vm5, %v1617_v19, %v1619_v16  ;;  %v1350_v21 = vpop.permute.xlu1 %1349 }
 0x157   : > { %v1374_v22 = vsel %vm1371_vm4, %v1348_v44, %v1350_v21  ;;  %v1375_v23 = vsel %vm1371_vm4, %v1350_v21, %v1352_v56  ;;  %1673 = vmatpush1.bf16.msra.mxu0 %v1645_v20 }
 0x158   : > { %1440 = vmatprep.subr.bf16.mxu1 %v1375_v23  ;;  %v2087_v23 = vld [vmem:[#allocation3 + $0x1c] sm:$0xf] }
 0x159   : > { %1441 = vmatpush1.bf16.msra.mxu1 %v1374_v22  ;;  %v1633_v25 = vpop.permute.xlu0 %1632 }
 0x15a   : > { %v1635_v26 = vpop.permute.xlu1 %1634 }
 0x15b   : > { %v1652_v27 = vsel %vm1644_vm5, %v1633_v25, %v1635_v26 }
 0x15c   : > { %1674 = vmatprep.subr.bf16.mxu0 %v1652_v27 }
 0x15d   : > { %v1631_v28 = vpop.permute.xlu0 %1630 }
 0x15e   : > { %v1651_v29 = vsel %vm1644_vm5, %v1631_v28, %v1633_v25  ;;  %v1364_v1 = vpop.permute.xlu1 %1363 }
 0x15f   : > { %v1380_v3 = vsel %vm1371_vm4, %v1362_v47, %v1364_v1  ;;  %v1381_v30 = vsel %vm1371_vm4, %v1364_v1, %v1366_v8  ;;  %1675 = vmatpush1.bf16.msra.mxu0 %v1651_v29 }
 0x160   : > { %1442 = vmatprep.subr.bf16.mxu1 %v1381_v30 }
 0x161   : > { %1443 = vmatpush1.bf16.msra.mxu1 %v1380_v3  ;;  %v1627_v32 = vpop.permute.xlu0 %1626 }
 0x162   : > { %v1629_v2 = vpop.permute.xlu1 %1628  ;;  %2706 = vmatmul.mubr.msk.bf16.vlgmr.msra.gmra.mrb[0].mxu0 %vm309_vm0, %v1541_v31 }
 0x163   : > { %v1650_v4 = vsel %vm1644_vm5, %v1627_v32, %v1629_v2  ;;  %1786 = vmatprep.mubr.bf16.mxu0 %v3151_v0 }
 0x164   : > { %1754 = vmatprep.subr.bf16.mxu0 %v1650_v4  ;;  %2690 = vmatmul.mubr.msk.bf16.vlgmr.msra.gmra.mrb[4].mxu1 %vm309_vm0, %v3727_v51 }
 0x165   : > { %v1625_v33 = vpop.permute.xlu0 %1624  ;;  %1745 = vmatprep.mubr.bf16.mxu1 %v3151_v0 }
 0x166   : > { %v1649_v7 = vsel %vm1644_vm5, %v1625_v33, %v1627_v32  ;;  %v1641_v35 = vpop.permute.xlu1 %1640 }
 0x167   : > { %1755 = vmatpush1.bf16.msra.mxu0 %v1649_v7 }
 0x169   : > { %v1643_v5 = vpop.permute.xlu0 %1642 }
 0x16a   : > { %v1639_v36 = vpop.permute.xlu1 %1638  ;;  %v1656_v6 = vsel %vm1644_vm5, %v1641_v35, %v1643_v5 }
 0x16b   : > { %v1655_v12 = vsel %vm1644_vm5, %v1639_v36, %v1641_v35  ;;  %1756 = vmatprep.subr.bf16.mxu0 %v1656_v6 }
 0x16c   : > { %1757 = vmatpush1.bf16.msra.mxu0 %v1655_v12 }
 0x16d   : > { %v1623_v37 = vpop.permute.xlu0 %1622 }
 0x16e   : > { %v1647_v38 = vsel %vm1644_vm5, %v1621_v17, %v1623_v37  ;;  %v1892_v39 = vpop.permute.xlu1 %1891  ;;  %v1648_v10 = vsel %vm1644_vm5, %v1623_v37, %v1625_v33 }
 0x16f   : > { %1713 = vmatprep.subr.bf16.mxu1 %v1648_v10  ;;  %2708 = vmatmul.mubr.msk.bf16.vlgmr.msra.gmra.mrb[4].mxu0 %vm309_vm0, %v1541_v31 }
 0x170   : > { %1714 = vmatpush1.bf16.msra.mxu1 %v1647_v38  ;;  %1977 = vmatprep.mubr.bf16.mxu0 %v3151_v0 }
 0x171   : > { %v1894_v24 = vpop.permute.xlu0 %1893 }
 0x172   : > { %v1890_v41 = vpop.permute.xlu1 %1889  ;;  %v1919_v42 = vsel %vm1917_vm6, %v1892_v39, %v1894_v24 }
 0x173   : > { %v1918_v43 = vsel %vm1917_vm6, %v1890_v41, %v1892_v39  ;;  %1945 = vmatprep.subr.bf16.mxu0 %v1919_v42 }
 0x174   : > { %1946 = vmatpush1.bf16.msra.mxu0 %v1918_v43 }
 0x175   : > { %v1637_v9 = vpop.permute.xlu0 %1636 }
 0x176   : > { %v1653_v14 = vsel %vm1644_vm5, %v1635_v26, %v1637_v9  ;;  %v1906_v44 = vpop.permute.xlu1 %1905  ;;  %v1654_v45 = vsel %vm1644_vm5, %v1637_v9, %v1639_v36 }
 0x177   : > { %1715 = vmatprep.subr.bf16.mxu1 %v1654_v45 }
 0x178   : > { %1716 = vmatpush1.bf16.msra.mxu1 %v1653_v14 }
 0x179   : > { %v1908_v13 = vpop.permute.xlu0 %1907 }
 0x17a   : > { %v1904_v34 = vpop.permute.xlu1 %1903  ;;  %v1925_v46 = vsel %vm1917_vm6, %v1906_v44, %v1908_v13 }
 0x17b   : > { %v1924_v47 = vsel %vm1917_vm6, %v1904_v34, %v1906_v44  ;;  %1947 = vmatprep.subr.bf16.mxu0 %v1925_v46  ;;  %2707 = vmatmul.mubr.msk.bf16.vlgmr.msra.gmra.mrb[4].mxu1 %vm309_vm0, %v1541_v31  ;;  %v2359_v44 = vld [vmem:[#allocation6] sm:$0x3f] }
 0x17c   : > { %1948 = vmatpush1.bf16.msra.mxu0 %v1924_v47  ;;  %2018 = vmatprep.mubr.bf16.mxu1 %v3151_v0 }
 0x17d   : > { %v1900_v49 = vpop.permute.xlu0 %1899 }
 0x17e   : > { %v1902_v50 = vpop.permute.xlu1 %1901 }
 0x17f   : > { %v1923_v51 = vsel %vm1917_vm6, %v1900_v49, %v1902_v50  ;;  %2723 = vmatmul.mubr.msk.bf16.vlgmr.msra.gmra.mrb[0].mxu0 %vm309_vm0, %v1814_v48 }
 0x180   : > { %2027 = vmatprep.subr.bf16.mxu0 %v1923_v51  ;;  %2059 = vmatprep.mubr.bf16.mxu0 %v3151_v0 }
 0x181   : > { %v1898_v52 = vpop.permute.xlu0 %1897 }
 0x182   : > { %v1922_v40 = vsel %vm1917_vm6, %v1898_v52, %v1900_v49  ;;  %v1896_v53 = vpop.permute.xlu1 %1895 }
 0x183   : > { %v1920_v54 = vsel %vm1917_vm6, %v1894_v24, %v1896_v53  ;;  %v1921_v55 = vsel %vm1917_vm6, %v1896_v53, %v1898_v52  ;;  %2028 = vmatpush1.bf16.msra.mxu0 %v1922_v40  ;;  %v2361_v24 = vlaneseq }
 0x184   : > { %1986 = vmatprep.subr.bf16.mxu1 %v1921_v55 }
 0x185   : > { %1987 = vmatpush1.bf16.msra.mxu1 %v1920_v54  ;;  %v1914_v56 = vpop.permute.xlu0 %1913  ;;  %v2362_v41 = vshrl.u32 %v2361_v24, 7 }
 0x186   : > { %v1916_v57 = vpop.permute.xlu1 %1915 }
 0x187   : > { %v1929_v58 = vsel %vm1917_vm6, %v1914_v56, %v1916_v57  ;;  %v2363_v43 = vsub.s32 0, %v2362_v41  ;;  %v2367_v9 = vsub.s32 1, %v2362_v41  ;;  %v2371_v49 = vsub.s32 2, %v2362_v41 }
 0x188   : > { %2029 = vmatprep.subr.bf16.mxu0 %v1929_v58  ;;  %v2375_v50 = vsub.s32 3, %v2362_v41  ;;  %v2383_v58 = vsub.s32 5, %v2362_v41 }
 0x189   : > { %v1912_v59 = vpop.permute.xlu0 %1911  ;;  %v2364_v47 = vrot.slane %v2359_v44, %v2363_v43  ;;  %v2372_v40 = vrot.slane %v2359_v44, %v2371_v49 }
 0x18a   : > { %v1928_v60 = vsel %vm1917_vm6, %v1912_v59, %v1914_v56  ;;  %v1910_v61 = vpop.permute.xlu1 %1909  ;;  %v2376_v53 = vrot.slane %v2359_v44, %v2375_v50  ;;  %v2379_v56 = vsub.s32 4, %v2362_v41 }
 0x18b   : > { %v1926_v62 = vsel %vm1917_vm6, %v1908_v13, %v1910_v61  ;;  %v1927_v63 = vsel %vm1917_vm6, %v1910_v61, %v1912_v59  ;;  %2030 = vmatpush1.bf16.msra.mxu0 %v1928_v60 }
 0x18c   : > { %1988 = vmatprep.subr.bf16.mxu1 %v1927_v63 }
 0x18d   : > { %1989 = vmatpush1.bf16.msra.mxu1 %v1926_v62  ;;  %v2165_v8 = vpop.permute.xlu0 %2164 }
 0x18e   : > { %v2167_v11 = vpop.permute.xlu1 %2166  ;;  %2725 = vmatmul.mubr.msk.bf16.vlgmr.msra.gmra.mrb[4].mxu0 %vm309_vm0, %v1814_v48 }
 0x18f   : > { %v2192_v15 = vsel %vm2190_vm7, %v2165_v8, %v2167_v11  ;;  %2250 = vmatprep.mubr.bf16.mxu0 %v3151_v0 }
 0x190   : > { %2218 = vmatprep.subr.bf16.mxu0 %v2192_v15  ;;  %2724 = vmatmul.mubr.msk.bf16.vlgmr.msra.gmra.mrb[4].mxu1 %vm309_vm0, %v1814_v48  ;;  %v2368_v48 = vrot.slane %v2359_v44, %v2367_v9 }
 0x191   : > { %v2163_v16 = vpop.permute.xlu0 %2162  ;;  %2291 = vmatprep.mubr.bf16.mxu1 %v3151_v0 }
 0x192   : > { %v2191_v17 = vsel %vm2190_vm7, %v2163_v16, %v2165_v8  ;;  %v2179_v18 = vpop.permute.xlu1 %2178 }
 0x193   : > { %2219 = vmatpush1.bf16.msra.mxu0 %v2191_v17  ;;  %v2380_v17 = vrot.slane %v2359_v44, %v2379_v56 }
 0x195   : > { %v2181_v19 = vpop.permute.xlu0 %2180 }
 0x196   : > { %v2177_v20 = vpop.permute.xlu1 %2176  ;;  %v2198_v21 = vsel %vm2190_vm7, %v2179_v18, %v2181_v19 }
 0x197   : > { %v2197_v22 = vsel %vm2190_vm7, %v2177_v20, %v2179_v18  ;;  %2220 = vmatprep.subr.bf16.mxu0 %v2198_v21  ;;  %v2384_v20 = vrot.slane %v2359_v44, %v2383_v58 }
 0x198   : > { %2221 = vmatpush1.bf16.msra.mxu0 %v2197_v22 }
 0x199   : > { %v2169_v25 = vpop.permute.xlu0 %2168 }
 0x19a   : > { %v2193_v26 = vsel %vm2190_vm7, %v2167_v11, %v2169_v25  ;;  %v2171_v27 = vpop.permute.xlu1 %2170 }
 0x19b   : > { %2740 = vmatmul.mubr.msk.bf16.vlgmr.msra.gmra.mrb[0].mxu0 %vm309_vm0, %v2087_v23  ;;  %v2194_v28 = vsel %vm2190_vm7, %v2169_v25, %v2171_v27 }
 0x19c   : > { %2259 = vmatprep.subr.bf16.mxu1 %v2194_v28  ;;  %2332 = vmatprep.mubr.bf16.mxu0 %v3151_v0 }
 0x19d   : > { %2260 = vmatpush1.bf16.msra.mxu1 %v2193_v26  ;;  %v2173_v29 = vpop.permute.xlu0 %2172 }
 0x19e   : > { %v2195_v1 = vsel %vm2190_vm7, %v2171_v27, %v2173_v29  ;;  %v2175_v3 = vpop.permute.xlu1 %2174 }
 0x19f   : > { %v2196_v30 = vsel %vm2190_vm7, %v2173_v29, %v2175_v3 }
 0x1a0   : > { %2300 = vmatprep.subr.bf16.mxu0 %v2196_v30 }
 0x1a1   : > { %2301 = vmatpush1.bf16.msra.mxu0 %v2195_v1  ;;  %v2183_v31 = vpop.permute.xlu0 %2182 }
 0x1a2   : > { %v2199_v32 = vsel %vm2190_vm7, %v2181_v19, %v2183_v31  ;;  %v2185_v2 = vpop.permute.xlu1 %2184 }
 0x1a3   : > { %v2200_v4 = vsel %vm2190_vm7, %v2183_v31, %v2185_v2 }
 0x1a4   : > { %2261 = vmatprep.subr.bf16.mxu1 %v2200_v4 }
 0x1a5   : > { %2262 = vmatpush1.bf16.msra.mxu1 %v2199_v32  ;;  %v2187_v33 = vpop.permute.xlu0 %2186 }
 0x1a6   : > { %v2201_v0 = vsel %vm2190_vm7, %v2185_v2, %v2187_v33  ;;  %v2189_v7 = vpop.permute.xlu1 %2188 }
 0x1a7   : > { %v2202_v35 = vsel %vm2190_vm7, %v2187_v33, %v2189_v7 }
 0x1a8   : > { %2741 = vmatmul.mubr.msk.bf16.vlgmr.msra.gmra.mrb[4].mxu1 %vm309_vm0, %v2087_v23  ;;  %2302 = vmatprep.subr.bf16.mxu0 %v2202_v35 }
 0x1a9   : > { %2303 = vmatpush1.bf16.msra.mxu0 %v2201_v0 }
 0x1ac   : > { %2742 = vmatmul.mubr.msk.bf16.vlgmr.msra.gmra.mrb[4].mxu0 %vm309_vm0, %v2087_v23 }
 0x1d2   : > { %v614_v5 = vpop.f32.mrb[0].mxu1 }
 0x1d3   : > { %v616_v36 = vpop.f32.mrb[1].mxu1 }
 0x1d4   : > { %v618_v6 = vpop.f32.mrb[2].mxu1 }
 0x1d5   : > { %v619_v12 = vpop.f32.mrb[3].mxu1 }
 0x1fc   : > { %v696_v37 = vpop.f32.mrb[8].mxu1 }
 0x1fd   : > { %v698_v38 = vpop.f32.mrb[9].mxu1 }
 0x1fe   : > { %v700_v39 = vpop.f32.mrb[10].mxu1 }
 0x1ff   : > { %v701_v10 = vpop.f32.mrb[11].mxu1 }
 0x26e   : > { %v2252_v42 = vpop.f32.mrb[0].mxu0 }
 0x26f   : > { %v3807_v14 = vadd.f32 %v2252_v42, %v614_v5  ;;  %v2254_v45 = vpop.f32.mrb[1].mxu0 }
 0x270   : > { %v3809_v13 = vadd.f32 %v2254_v45, %v616_v36  ;;  %v2256_v34 = vpop.f32.mrb[2].mxu0 }
 0x271   : > { %v2257_v46 = vpop.f32.mrb[3].mxu0  ;;  %v2391_v51 = vmul.f32 %v3807_v14, %v2364_v47 }
 0x272   : > { %v2392_v52 = vmul.f32 %v3809_v13, %v2368_v48 }
 0x273   : > { %v2405_v54 = vmul.f32 %v3807_v14, %v2391_v51 }
 0x274   : > { %v2406_v55 = vmul.f32 %v3809_v13, %v2392_v52  ;;  %v2397_v59 = vadd.f32 %v2392_v52, %v2391_v51 }
 0x276   : > { %v2411_v8 = vadd.f32 %v2406_v55, %v2405_v54 }
 0x27b   : > { %v2293_v57 = vpop.f32.mrb[4].mxu1 }
 0x27c   : > { %v2393_v60 = vmul.f32 %v2372_v40, %v2293_v57  ;;  %v2295_v61 = vpop.f32.mrb[5].mxu1 }
 0x27d   : > { %v2394_v62 = vmul.f32 %v2376_v53, %v2295_v61  ;;  %v2297_v63 = vpop.f32.mrb[6].mxu1 }
 0x27e   : > { %v2398_v11 = vadd.f32 %v2397_v59, %v2393_v60  ;;  %v2407_v15 = vmul.f32 %v2393_v60, %v2293_v57  ;;  %v2298_v16 = vpop.f32.mrb[7].mxu1 }
 0x27f   : > { %v2408_v18 = vmul.f32 %v2394_v62, %v2295_v61  ;;  %v2334_v19 = vpop.f32.mrb[4].mxu0 }
 0x280   : > { %v2412_v21 = vadd.f32 %v2411_v8, %v2407_v15  ;;  %v2399_v22 = vadd.f32 %v2398_v11, %v2394_v62  ;;  %v2754_v23 = vadd.f32 %v2334_v19, %v696_v37  ;;  %v2336_v25 = vpop.f32.mrb[5].mxu0 }
 0x281   : > { %v2755_v26 = vadd.f32 %v2336_v25, %v698_v38  ;;  %v2338_v27 = vpop.f32.mrb[6].mxu0 }
 0x282   : > { %v2413_v28 = vadd.f32 %v2412_v21, %v2408_v18  ;;  %v2395_v29 = vmul.f32 %v2754_v23, %v2380_v17  ;;  %v2339_v1 = vpop.f32.mrb[7].mxu0 }
 0x283   : > { %v2396_v3 = vmul.f32 %v2755_v26, %v2384_v20 }
 0x284   : > { %v2409_v30 = vmul.f32 %v2754_v23, %v2395_v29  ;;  %v2400_v31 = vadd.f32 %v2399_v22, %v2395_v29 }
 0x285   : > { %v2410_v32 = vmul.f32 %v2755_v26, %v2396_v3 }
 0x286   : > { %v2401_v2 = vadd.f32 %v2400_v31, %v2396_v3  ;;  %v2414_v4 = vadd.f32 %v2413_v28, %v2409_v30 }
 0x288   : > { %2402 = vadd.xlane.f32.xlu0 %v2401_v2  ;;  %v2415_v33 = vadd.f32 %v2414_v4, %v2410_v32 }
 0x28a   : > { %2416 = vadd.xlane.f32.xlu1 %v2415_v33 }
 0x315   : > { %v2403_v0 = vpop.xlane.xlu0 %2402 }
 0x316   : > { %v2404_v7 = vmul.f32 0.001953125, %v2403_v0 }
 0x317   : > { %v2417_v35 = vpop.xlane.xlu1 %2416 }
 0x318   : > { %v2418_v5 = vmul.f32 0.001953125, %v2417_v35  ;;  %v2419_v36 = vmul.f32 %v2404_v7, %v2404_v7  ;;  %v2421_v37 = vsub.f32 %v3807_v14, %v2404_v7  ;;  %v2422_v38 = vsub.f32 %v3809_v13, %v2404_v7 }
 0x319   : > { %v2423_v39 = vsub.f32 %v2293_v57, %v2404_v7  ;;  %v2424_v10 = vsub.f32 %v2295_v61, %v2404_v7  ;;  %v2425_v41 = vsub.f32 %v2754_v23, %v2404_v7  ;;  %v2426_v42 = vsub.f32 %v2755_v26, %v2404_v7 }
 0x31a   : > { %v2420_v6 = vsub.f32 %v2418_v5, %v2419_v36 }
 0x31c   : > { %v2427_v12 = vadd.f32 1e-05, %v2420_v6 }
 0x31e   : > { %2964 = vrsqrt.f32 %v2427_v12 }
 0x328   : > { %v2965_v24 = vpop.eup %2964 }
 0x329   : > { %v2429_v43 = vmul.f32 %v2965_v24, %v2421_v37  ;;  %v2430_v9 = vmul.f32 %v2965_v24, %v2422_v38  ;;  %v2431_v44 = vmul.f32 %v2965_v24, %v2423_v39  ;;  %v2432_v45 = vmul.f32 %v2965_v24, %v2424_v10 }
 0x32a   : > { %v2433_v34 = vmul.f32 %v2965_v24, %v2425_v41  ;;  %v2434_v46 = vmul.f32 %v2965_v24, %v2426_v42 }
 0x32b   : > { %vm2435_vm8 = vcmp.ge.f32.partialorder %v2429_v43, 0.0  ;;  %vm2436_vm9 = vcmp.ge.f32.partialorder %v2430_v9, 0.0  ;;  %vm2437_vm10 = vcmp.ge.f32.partialorder %v2431_v44, 0.0  ;;  %vm2438_vm11 = vcmp.ge.f32.partialorder %v2432_v45, 0.0 }
 0x32c   : > { %vm2439_vm12 = vcmp.ge.f32.partialorder %v2433_v34, 0.0  ;;  %vm2440_vm13 = vcmp.ge.f32.partialorder %v2434_v46, 0.0  ;;  %v2441_v14 = vmul.f32 0.02, %v2429_v43  ;;  %v2442_v13 = vmul.f32 0.02, %v2430_v9 }
 0x32d   : > { %v2443_v47 = vmul.f32 0.02, %v2431_v44  ;;  %v2444_v48 = vmul.f32 0.02, %v2432_v45  ;;  %v2445_v49 = vmul.f32 0.02, %v2433_v34 }
 0x32e   : > { %v2446_v50 = vmul.f32 0.02, %v2434_v46  ;;  %v2447_v51 = vsel %vm2435_vm8, %v2429_v43, %v2441_v14  ;;  %v2448_v52 = vsel %vm2436_vm9, %v2430_v9, %v2442_v13 }
 0x32f   : > { %v2449_v40 = vsel %vm2437_vm10, %v2431_v44, %v2443_v47  ;;  %v2450_v53 = vsel %vm2438_vm11, %v2432_v45, %v2444_v48  ;;  %v2451_v54 = vsel %vm2439_vm12, %v2433_v34, %v2445_v49  ;;  %v2749_v55 = vpack.c.bf16 %v2448_v52, %v2447_v51 }
 0x330   : > { %v2452_v56 = vsel %vm2440_vm13, %v2434_v46, %v2446_v50  ;;  %v2750_v57 = vpack.c.bf16 %v2450_v53, %v2449_v40 }
 0x331   : > { %v2751_v58 = vpack.c.bf16 %v2452_v56, %v2451_v54  ;;  %2477 = vst [vmem:[%s234_s11] sm:$0xff] %v2749_v55 }
 0x332   : > { %2478 = vst [vmem:[%s234_s11 + $0x8] sm:$0xff] %v2750_v57 }
 0x333   : > { %2479 = vst [vmem:[%s234_s11 + $0x10] sm:$0xff] %v2751_v58 }
 0x334   : > { %3065 = shalt.err (!%p3062_p1)
}
 0x335   : > { %s3066_s10 = scalar_lea.hbm %s3822_s4, 384  ;;  %s3070_s8 = scalar_lea.hbm %s3874_s3, 768 }
 0x336   : > { %p3067_p6 = scmp.ne.s32.totalorder %s3822_s4, %s3066_s10  ;;  %p3071_p11 = scmp.lt.u32.totalorder %s3822_s4, %s3874_s3 }
 0x337   : > { %p3072_p3 = scmp.lt.u32.totalorder %s3070_s8, %s3066_s10  ;;  %p3074_p4 = scmp.lt.u32.totalorder %s3066_s10, %s3822_s4 }
 0x338   : > { %p3068_p9 = pnand %p3067_p6, %p3890_p7 }
 0x339   : > { %p3073_p12 = por %p3072_p3, %p3071_p11 }
 0x33a   : > { %p3069_p13 = pneg %p3068_p9 }
 0x33b   : > { %p3075_p10 = por %p3074_p4, %p3073_p12 }
 0x33d   : > { %p3076_p2 = pnand %p3075_p10, %p3069_p13 }
 0x33f   : > { %3079 = shalt.err (!%p3076_p2)
}
 0x340   : > { %2847 = dma.vmem_to_hbm [thread:$0]  (%p3890_p7), %s3824_s26, 384, %s3822_s4, %s2481_s25  }
 0x341 PF: > { %s2509_s5 = sand.u32 1, %s3122_s12   ;;  %p3891_p8 = scmp.ne.s32.totalorder %s3881_s24, 0 }
 0x342   : > { %p3892_p0 = scmp.ge.s32.totalorder %s3142_s17, 2  ;;  %s2510_s30 = scalar_lea.sflag [#allocation5], %s2509_s5 }
 0x344   : > { %p2861_p5 = pnand %p3892_p0, %p3891_p8 }
 0x346   : > { %3117 = dma.done.wait (!%p2861_p5), %s2510_s30, 384  }
 0x347   : > { %3119 = vsyncadd (!%p2861_p5), %s2510_s30, 4294966912  ;;  %s18_s17 = sadd.s32 1, %s3142_s17   ;;  %s3893_s12 = smov %s3126_s13 }
 0x348   : > { %p15_p1 = scmp.ge.s32.totalorder %s18_s17, 4   ;;  %s3894_s13 = smov %s3130_s14 }
 0x349   : > { %s3895_s14 = smov %s3334_s27  ;;  %s3896_s15 = smov %s3138_s16 }
 0x34a   : > { %s3897_s16 = smov %s3899_s29  ;;  %17 = sbr.rel (!%p15_p1) target bundleno = 6 (0x6), region = 92 }
 0x351   :  { %2515 = vsyncpa [#allocation4], 1 }
 0x352   :  { %2517 = vsyncpa [#allocation4 + $0x1], 1 }
 0x353   :  { %2518 = vsyncpa [#allocation7], 1 }
 0x354   :  { %2519 = vsyncpa [#allocation5], 1 }
 0x355   :  { %2521 = vsyncpa [#allocation5 + $0x1], 1 }

// kernel: encoder_forward.6
= control target key start
LH: loop header
LB: loop body
LE: loop exit
PB: predicated region body
PF: predicated region fallthrough
CT: control target
= control target key end

     0   :  { %s2543_s0 = inlined_call_operand.hbm [shape: bf16[8,16,64], index: 0, kind: input, shape index: {}]   ;;  %s2544_s1 = inlined_call_operand.hbm [shape: f32[1,128], index: 1, kind: input, shape index: {}]   ;;  %s2545_s2 = inlined_call_operand.hbm [shape: bf16[2,64,256], index: 2, kind: input, shape index: {}]   ;;  %s2546_s3 = inlined_call_operand.hbm [shape: bf16[2,16,128], index: 3, kind: output, shape index: {}]  }
   0x1   :  { %2567 = sst [smem:[#allocation22_spill]] %s2543_s0 }
   0x2   :  { %2568 = sst [smem:[#allocation23_spill]] %s2546_s3 }
   0x3   :  { %8 = vsyncpa [#allocation4], 0 }
   0x4   :  { %10 = vsyncpa [#allocation4 + $0x1], 0 }
   0x5   :  { %11 = vsyncpa [#allocation7], 0 }
   0x6   :  { %12 = vsyncpa [#allocation5], 0 }
   0x7   :  { %14 = vsyncpa [#allocation5 + $0x1], 0  ;;  %s1990_s12 = smov 0   ;;  %s1992_s13 = smov 0  }
   0x8   :  { %s1994_s14 = smov 0   ;;  %s1996_s15 = smov 0  }
   0x9   :  { %s1998_s16 = smov 0   ;;  %s2000_s17 = smov 0  }
   0xa   :  { %s2002_s18 = smov 0   ;;  %s2004_s19 = smov 0  }
   0xb   :  { %s2006_s20 = smov 0   ;;  %s2008_s21 = smov 0  }
   0xc   :  { %s2010_s22 = smov 0   ;;  %s2012_s23 = smov 0  }
   0xd   :  { %s2014_s24 = smov 0   ;;  %s2016_s25 = smov 0  }
   0xe LB: > { %2569 = sst [smem:[#allocation14_spill]] %s1899_s12  ;;  %s29_s26 = sadd.s32 1, %s1943_s23  ;;  %s1951_s25 = sphi %s2016_s25, %s20_s25   ;;  %s1947_s24 = sphi %s2014_s24, %s2623_s24   ;;  %s1943_s23 = sphi %s2012_s23, %s2612_s23   ;;  %s1939_s22 = sphi %s2010_s22, %s2622_s22   ;;  %s1935_s21 = sphi %s2008_s21, %s2611_s21   ;;  %s1931_s20 = sphi %s2006_s20, %s2610_s20   ;;  %s1927_s19 = sphi %s2004_s19, %s2621_s19   ;;  %s1923_s18 = sphi %s2002_s18, %s2620_s18   ;;  %s1919_s17 = sphi %s2000_s17, %s2619_s17   ;;  %s1915_s16 = sphi %s1998_s16, %s2618_s16   ;;  %s1911_s15 = sphi %s1996_s15, %s2617_s15   ;;  %s1907_s14 = sphi %s1994_s14, %s2616_s14   ;;  %s1903_s13 = sphi %s1992_s13, %s2615_s13   ;;  %s1899_s12 = sphi %s1990_s12, %s2614_s12  }
   0xf   : > { %2570 = sst [smem:[#allocation15_spill]] %s1931_s20  ;;  %s39_s27 = sadd.s32 1, %s1931_s20 }
  0x10   : > { %2571 = sst [smem:[#allocation16_spill]] %s1943_s23  ;;  %p2062_p0 = scmp.ge.s32.totalorder %s29_s26, 2 }
  0x11   : > { %2572 = sst [smem:[#allocation17_spill]] %s1951_s25  ;;  %p46_p1 = scmp.ne.s32.totalorder %s1931_s20, %s1927_s19 }
  0x12   : > { %s2573_s28 = scalar_select %p2062_p0, 1, 0 }
  0x13   : > { %p2551_p2 = scmp.eq.s32.totalorder %s1951_s25, 0  ;;  %s2625_s26 = smov (%p2062_p0, %s29_s26), 0 }
  0x14   : > { %2574 = sst [smem:[#allocation18_spill]] %s2625_s26  ;;  %p2550_p4 = scmp.lt.s32.totalorder %s1951_s25, 4 }
  0x15   : > { %p48_p3 = por %p2551_p2, %p46_p1  ;;  %s2078_s29 = ssub.s32 %s1943_s23, %s2625_s26 }
  0x16   : > { %s162_s30 = sand.u32 1, %s1951_s25   ;;  %p37_p5 = scmp.eq.s32.totalorder %s2078_s29, 0 }
  0x17   : > { %s164_s4 = sand.u32 1, %s1931_s20   ;;  %s1284_s5 = sshll.u32 %s1943_s23, 6 }
  0x18   : > { %s2085_s6 = scalar_select %p37_p5, %s1931_s20, %s39_s27  }
  0x19   : > { %s1283_s7 = sshll.u32 %s164_s4, 5  ;;  %s2576_s0 = sld [smem:[#allocation22_spill]] }
  0x1a   : > { %2575 = sst [smem:[#allocation19_spill]] %s2085_s6  ;;  %p2094_p6 = pnand %p2550_p4, %p48_p3 }
  0x1b   : > { %s166_s26 = scalar_lea.vmem [#allocation3], %s1283_s7  ;;  %s2100_s4 = scalar_lea.sflag [#allocation4], %s162_s30 }
  0x1c   : > { %s172_s27 = sshll.u32 %s166_s26, 4  ;;  %p1711_p8 = pneg %p2094_p6  ;;  %s2098_s27 = int_to_ptr.vmem [resolvable:$true] %s172_s27 }
  0x1f   : > { %s2090_s10 = scalar_lea.hbm %s2576_s0, %s1284_s5  ;;  %s1714_s23 = scalar_lea.hbm %s2576_s0, 1024 }
  0x20   : > { %s1709_s8 = scalar_lea.hbm %s2090_s10, 512  ;;  %p1715_p11 = scmp.lt.u32.totalorder %s2090_s10, %s2576_s0 }
  0x21   : > { %p1710_p7 = scmp.ne.s32.totalorder %s2090_s10, %s1709_s8  ;;  %p1716_p12 = scmp.lt.u32.totalorder %s1714_s23, %s1709_s8 }
  0x22   : > { %p1718_p1 = scmp.lt.u32.totalorder %s1709_s8, %s2090_s10 }
  0x23   : > { %p1712_p9 = pnand %p1711_p8, %p1710_p7  ;;  %p1717_p13 = por %p1716_p12, %p1715_p11 }
  0x25   : > { %p1713_p10 = pneg %p1712_p9  ;;  %p1719_p3 = por %p1718_p1, %p1717_p13 }
  0x27   : > { %p1720_p5 = pnand %p1719_p3, %p1713_p10 }
  0x29   : > { %1723 = shalt.err (!%p1720_p5)
}
  0x2a   : > { %s1724_s26 = scalar_lea.vmem %s2098_s27, 512  ;;  %s1953_s30 = smov [#allocation3]  }
  0x2b   : > { %p1725_p7 = scmp.ne.s32.totalorder %s2098_s27, %s1724_s26  ;;  %s1729_s7 = sshll.u32 %s1953_s30, 4  ;;  %s1730_s7 = int_to_ptr.vmem [resolvable:$false] %s1729_s7 }
  0x2c   : > { %s1731_s20 = scalar_lea.vmem %s1730_s7, 1024  ;;  %p1732_p2 = scmp.lt.s32.totalorder %s2098_s27, %s1730_s7 }
  0x2d   : > { %p1727_p9 = pnand %p1725_p7, %p1711_p8  ;;  %p1733_p11 = scmp.lt.s32.totalorder %s1731_s20, %s1724_s26 }
  0x2f   : > { %p1728_p4 = pneg %p1727_p9  ;;  %p1734_p12 = por %p1733_p11, %p1732_p2 }
  0x31   : > { %p1735_p13 = pnand %p1734_p12, %p1728_p4 }
  0x33   : > { %1738 = shalt.err (!%p1735_p13)
}
  0x34   : > { %s2554_s23 = smov 128   ;;  %s1955_s6 = smov 64  }
  0x35   : > { %s1956_s8 = smov 4   ;;  %s2130_s5 = sadd.s32 4294967295, %s1951_s25  }
  0x36   : > { %1553 = dma.hbm_to_vmem [thread:$0]  (!%p2094_p6), %s2090_s10, 512, %s2098_s27, %s2100_s4, %s2554_s23, %s1955_s6, %s1956_s8  }
  0x37   : > { %p52_p2 = scmp.ne.s32.totalorder %s1927_s19, %s1923_s18  ;;  %p2552_p4 = scmp.eq.s32.totalorder %s2130_s5, 0 }
  0x38   : > { %p93_p8 = scmp.ne.s32.totalorder %s1919_s17, %s1915_s16  ;;  %p99_p1 = scmp.ne.s32.totalorder %s1915_s16, %s1911_s15 }
  0x39   : > { %p2139_p10 = por %p2552_p4, %p52_p2  ;;  %s1279_s11 = sadd.s32 4294967294, %s1951_s25  }
  0x3a   : > { %p2579_p3 = scmp.eq.s32.totalorder %s1951_s25, 0  ;;  %p2154_p5 = por %p99_p1, %p2552_p4 }
  0x3b   : > { %s2578_s9 = scalar_select %p2139_p10, 1, 0 }
  0x3c   : > { %p2148_p6 = por %p93_p8, %p2579_p3  ;;  %p124_p7 = scmp.ne.s32.totalorder %s1907_s14, %s1903_s13 }
  0x3d   : > { %s2581_s18 = scalar_select %p2154_p5, 1, 0 }
  0x3e   : > { %p125_p9 = scmp.eq.s32.totalorder %s2130_s5, 3  ;;  %p130_p11 = scmp.ne.s32.totalorder %s1903_s13, %s1899_s12 }
  0x3f   : > { %p131_p12 = scmp.eq.s32.totalorder %s1279_s11, 3  ;;  %p1280_p13 = scmp.ge.s32.totalorder %s1951_s25, 1 }
  0x40   : > { %p2164_p2 = por %p125_p9, %p124_p7  ;;  %p138_p8 = scmp.lt.s32.totalorder %s1951_s25, 5 }
  0x41   : > { %p2169_p3 = por %p131_p12, %p130_p11  ;;  %s1957_s30 = smov [#allocation6]  }
  0x42   : > { %s2582_s15 = scalar_select %p2164_p2, 1, 0 }
  0x43   : > { %s2584_s27 = scalar_select %p2169_p3, 1, 0 }
  0x44   : > { %2583 = sst [smem:[#allocation20_spill]] %s2582_s15  ;;  %p2173_p1 = pnand %p1280_p13, %p138_p8 }
  0x45   : > { %2585 = sst [smem:[#allocation21_spill]] %s2584_s27  ;;  %s151_s7 = sshll.u32 %s1957_s30, 4  ;;  %s152_s7 = int_to_ptr.vmem [resolvable:$true] %s151_s7 }
  0x46   : > { %s2586_s26 = scalar_select %p2173_p1, 1, 0 }
  0x47   : > { %p2587_p4 = scmp.lt.s32.totalorder %s1951_s25, 4  ;;  %p1546_p7 = pneg %p2173_p1 }
  0x48   : > { %p2589_p9 = scmp.eq.s32.totalorder %s2130_s5, 0  ;;  %s32_s8 = sadd.s32 1, %s1947_s24 }
  0x49   : > { %p2181_p5 = pnand %p2587_p4, %p2148_p6  ;;  %s184_s11 = sand.u32 1, %s1919_s17  }
  0x4a   : > { %p2189_p11 = pnand %p1546_p7, %p2589_p9  ;;  %s1285_s23 = sshll.u32 %s184_s11, 6 }
  0x4b   : > { %s2588_s20 = scalar_select %p2181_p5, 1, 0 }
  0x4c   : > { %s1739_s10 = scalar_lea.hbm %s2544_s1, 16  ;;  %p1741_p6 = pneg %p2189_p11 }
  0x4d   : > { %p1740_p4 = scmp.ne.s32.totalorder %s2544_s1, %s1739_s10  ;;  %p1746_p8 = scmp.lt.u32.totalorder %s1739_s10, %s2544_s1 }
  0x4f   : > { %p1742_p12 = pnand %p1741_p6, %p1740_p4 }
  0x51   : > { %p1743_p13 = pneg %p1742_p12 }
  0x53   : > { %p1748_p7 = pnand %p1746_p8, %p1743_p13 }
  0x55   : > { %1751 = shalt.err (!%p1748_p7)
}
  0x56   : > { %s1752_s15 = scalar_lea.vmem %s152_s7, 16  ;;  %s1759_s0 = scalar_lea.vmem %s152_s7, 32 }
  0x57   : > { %p1753_p9 = scmp.ne.s32.totalorder %s152_s7, %s1752_s15  ;;  %p1760_p10 = scmp.lt.s32.totalorder %s152_s7, %s152_s7 }
  0x58   : > { %p1761_p1 = scmp.lt.s32.totalorder %s1759_s0, %s1752_s15 }
  0x59   : > { %p1755_p3 = pnand %p1753_p9, %p1741_p6 }
  0x5a   : > { %p1762_p5 = por %p1761_p1, %p1760_p10 }
  0x5b   : > { %p1756_p2 = pneg %p1755_p3 }
  0x5d   : > { %p1763_p0 = pnand %p1762_p5, %p1756_p2 }
  0x5f   : > { %1766 = shalt.err (!%p1763_p0)
}
  0x60   : > { %1549 = dma.hbm_to_vmem [thread:$0]  (!%p2189_p11), %s2544_s1, 16, %s152_s7, [#allocation7]  }
  0x61   : > { %p2591_p3 = scmp.ne.s32.totalorder %s2573_s28, 0  ;;  %s1374_s3 = sshll.u32 %s1947_s24, 10 }
  0x62   : > { %s86_s25 = sadd.s32 1, %s1919_s17  ;;  %s114_s15 = sadd.s32 1, %s1907_s14 }
  0x63   : > { %s2627_s8 = smov (!%p2591_p3, %s32_s8), %s1947_s24  ;;  %s2222_s30 = scalar_lea.hbm %s2545_s2, %s1374_s3 }
  0x64   : > { %p34_p10 = scmp.ge.s32.totalorder %s2627_s8, 2  ;;  %s186_s28 = scalar_lea.vmem [#allocation8], %s1285_s23 }
  0x65   : > { %s193_s7 = sshll.u32 %s186_s28, 4  ;;  %s1767_s6 = scalar_lea.hbm %s2222_s30, 1024  ;;  %s2227_s7 = int_to_ptr.vmem [resolvable:$true] %s193_s7 }
  0x66   : > { %s2629_s8 = smov (%p34_p10, %s2627_s8), 0  ;;  %p1768_p2 = scmp.ne.s32.totalorder %s2222_s30, %s1767_s6 }
  0x67   : > { %s83_s10 = ssub.s32 %s1947_s24, %s2629_s8  ;;  %p2592_p1 = scmp.ne.s32.totalorder %s2588_s20, 0 }
  0x68   : > { %p84_p0 = scmp.eq.s32.totalorder %s83_s10, 0  ;;  %s111_s0 = sor.u32 %s83_s10, %s2078_s29 }
  0x69   : > { %p112_p5 = scmp.eq.s32.totalorder %s111_s0, 0  ;;  %p1769_p11 = pneg %p2592_p1 }
  0x6a   : > { %s2230_s12 = scalar_select %p84_p0, %s1919_s17, %s86_s25  }
  0x6b   : > { %s2233_s27 = scalar_select %p112_p5, %s1907_s14, %s114_s15  }
  0x6c   : > { %p1770_p4 = pnand %p1769_p11, %p1768_p2  ;;  %s1772_s11 = scalar_lea.hbm %s2545_s2, 2048 }
  0x6d   : > { %p1773_p12 = scmp.lt.u32.totalorder %s2222_s30, %s2545_s2  ;;  %p1774_p13 = scmp.lt.u32.totalorder %s1772_s11, %s1767_s6 }
  0x6e   : > { %p1771_p6 = pneg %p1770_p4  ;;  %p1776_p7 = scmp.lt.u32.totalorder %s1767_s6, %s2222_s30 }
  0x6f   : > { %p1775_p8 = por %p1774_p13, %p1773_p12 }
  0x71   : > { %p1777_p9 = por %p1776_p7, %p1775_p8 }
  0x73   : > { %p1778_p3 = pnand %p1777_p9, %p1771_p6 }
  0x75   : > { %1781 = shalt.err (!%p1778_p3)
}
  0x76   : > { %s1782_s25 = scalar_lea.vmem %s2227_s7, 1024  ;;  %s1958_s15 = smov [#allocation8]  }
  0x77   : > { %p1783_p10 = scmp.ne.s32.totalorder %s2227_s7, %s1782_s25  ;;  %s1787_s10 = sshll.u32 %s1958_s15, 4  ;;  %s1788_s10 = int_to_ptr.vmem [resolvable:$false] %s1787_s10 }
  0x78   : > { %s1789_s0 = scalar_lea.vmem %s1788_s10, 2048  ;;  %p1790_p2 = scmp.lt.s32.totalorder %s2227_s7, %s1788_s10 }
  0x79   : > { %p1785_p0 = pnand %p1783_p10, %p1769_p11  ;;  %p1791_p4 = scmp.lt.s32.totalorder %s1789_s0, %s1782_s25 }
  0x7b   : > { %p1786_p5 = pneg %p1785_p0  ;;  %p1792_p12 = por %p1791_p4, %p1790_p2 }
  0x7d   : > { %p1793_p13 = pnand %p1792_p12, %p1786_p5 }
  0x7f   : > { %1796 = shalt.err (!%p1793_p13)
}
  0x80   : > { %s1959_s6 = smov 8   ;;  %s2593_s23 = smov 128  }
  0x81   : > { %1556 = dma.hbm_to_vmem [thread:$0]  (!%p2592_p1), %s2222_s30, 1024, %s2227_s7, %s2100_s4, %s2593_s23, %s2593_s23, %s1959_s6  }
  0x82   : > { %p2594_p11 = scmp.ne.s32.totalorder %s2586_s26, 0 }
  0x83   : > { %s207_s3 = sand.u32 (!%p2594_p11), 1, %s2130_s5   ;;  %s209_s11 = sand.u32 (!%p2594_p11), 1, %s1927_s19  }
  0x84   : > { %205 = sbr.rel (%p2594_p11) target bundleno = 774 (0x306), region = 32  ;;  %s1289_s29 = sshll.u32 (!%p2594_p11), %s209_s11, 5 }
  0x85   : > { %s208_s28 = scalar_lea.sflag (!%p2594_p11), [#allocation4], %s207_s3  ;;  %s2267_s25 = scalar_lea.vmem (!%p2594_p11), [#allocation3], %s1289_s29 }
  0x86   : > { %p2595_p6 = scmp.ne.s32.totalorder (!%p2594_p11), %s2578_s9, 0 }
  0x8b   : > { %1882 = dma.done.wait (%p2595_p6), %s208_s28, 512  }
  0x8c   : > { %1884 = vsyncadd (%p2595_p6), %s208_s28, 4294966784  ;;  %p2596_p8 = scmp.eq.s32.totalorder %s2130_s5, 0 }
  0x8e   : > { %1886 = dma.done.wait (%p2596_p8), [#allocation7], 16   ;;  %p2597_p1 = pmov %p2596_p8 }
  0x8f   : > { %s222_s4 = sand.u32 1, %s1915_s16   ;;  %p2598_p7 = scmp.ne.s32.totalorder %s2581_s18, 0 }
  0x90   : > { %1888 = vsyncadd (%p2597_p1), [#allocation7], 4294967280  ;;  %s1291_s26 = sshll.u32 %s222_s4, 6 }
  0x91   : > { %s2278_s20 = scalar_lea.vmem [#allocation8], %s1291_s26 }
  0x92   : > { %1890 = dma.done.wait (%p2598_p7), %s208_s28, 1024  }
  0x93   : > { %1892 = vsyncadd (%p2598_p7), %s208_s28, 4294966272  ;;  %v1960_v0 = vmov 0.0   ;;  %v2287_v1 = vld [vmem:[%s2278_s20 + $0x10] ss:$8 sps:$4 sm:$0xff]   ;;  %v2290_v2 = vld [vmem:[%s2278_s20 + $0x14] ss:$8 sps:$4 sm:$0xff]  }
  0x94   : > { %1415 = vmatprep.subr.bf16.mxu1 %v1960_v0  ;;  %1463 = vmatprep.subr.bf16.mxu0 %v1960_v0  ;;  %s1961_s5 = smov 103   ;;  %v2294_v3 = vld [vmem:[%s2278_s20] ss:$8 sps:$4 sm:$0xff]   ;;  %v2297_v4 = vld [vmem:[%s2278_s20 + $0x4] ss:$8 sps:$4 sm:$0xff]   ;;  %vm1962_vm0 = vmmov 0  }
  0x95   : > { %717 = vrot.lane.b32.xlu1 %v2287_v1, %s1961_s5  ;;  %713 = vrot.lane.b32.xlu0 %v2294_v3, %s1961_s5  ;;  %v2301_v5 = vld [vmem:[%s2278_s20 + $0x24] ss:$8 sps:$4 sm:$0xff]   ;;  %v1703_v6 = vld [vmem:[%s2278_s20] ss:$8 sps:$4 sm:$0xff]   ;;  %s1963_s9 = smov 127   ;;  %vm286_vm1 = vcmask 523264  }
  0x96   : > { %v2306_v7 = vld [vmem:[%s2278_s20 + $0x20] ss:$8 sps:$4 sm:$0xff]   ;;  %1416 = vmatpush3.bf16.msra.mxu1 %v1703_v6  ;;  %v1704_v8 = vld [vmem:[%s2278_s20 + $0x10] ss:$8 sps:$4 sm:$0xff]   ;;  %v2313_v9 = vld [vmem:[%s2278_s20 + $0x34] ss:$8 sps:$4 sm:$0xff]   ;;  %1423 = vmatprep.mubr.msk.bf16.mxu1 %vm1962_vm0, %v1960_v0 }
  0x97   : > { %1417 = vmatprep.subr.bf16.mxu1 %v1960_v0  ;;  %1471 = vmatprep.mubr.msk.bf16.mxu0 %vm1962_vm0, %v1960_v0  ;;  %v2321_v10 = vld [vmem:[%s2278_s20 + $0x30] ss:$8 sps:$4 sm:$0xff]   ;;  %v1705_v11 = vld [vmem:[%s2278_s20 + $0x20] ss:$8 sps:$4 sm:$0xff]   ;;  %s1964_s18 = smov 102   ;;  %s1965_s30 = smov 123  }
  0x98   : > { %v1706_v12 = vld [vmem:[%s2278_s20 + $0x30] ss:$8 sps:$4 sm:$0xff]   ;;  %v253_v13 = vld [vmem:[%s2267_s25] sm:$0xf]  ;;  %s1966_s7 = smov 98   ;;  %s1967_s15 = smov 122  }
  0x99   : > { %719 = vrot.lane.b32.xlu1 %v2290_v2, %s1961_s5  ;;  %715 = vrot.lane.b32.xlu0 %v2297_v4, %s1961_s5  ;;  %s1968_s10 = smov 97   ;;  %vm729_vm2 = vcmask 842752   ;;  %vm390_vm3 = vcmask 1039360   ;;  %vm842_vm4 = vcmask 834560   ;;  %v1328_v30 = vld [vmem:[%s2267_s25 + $0x10] sm:$0xf] }
  0x9a   : > { %1418 = vmatpush3.bf16.msra.mxu1 %v1704_v8  ;;  %v1298_v49 = vld [vmem:[%s2267_s25 + $0x4] sm:$0xf]  ;;  %vm503_vm5 = vcmask 1006592   ;;  %v1338_v53 = vld [vmem:[%s2267_s25 + $0x14] sm:$0xf]  ;;  %vm955_vm6 = vcmask 801792  }
  0x9b   : > { %1419 = vmatprep.subr.bf16.mxu1 %v1960_v0  ;;  %vm616_vm7 = vcmask 998400   ;;  %vm1068_vm8 = vcmask 793600   ;;  %s249_s0 = sand.u32 1, %s1903_s13   ;;  %s1370_s23 = sshll.u32 %s1939_s22, 1 }
  0x9c   : > { %s1292_s6 = sshll.u32 %s249_s0, 2  ;;  %s2599_s3 = sld [smem:[#allocation20_spill]] }
  0x9d   : > { %723 = vrot.lane.b32.xlu1 %v2301_v5, %s1961_s5  ;;  %721 = vrot.lane.b32.xlu0 %v2306_v7, %s1961_s5  ;;  %s1161_s11 = sadd.s32 %s1935_s21, %s1370_s23  ;;  %s251_s28 = scalar_lea.vmem [#allocation9], %s1292_s6 }
  0x9e   : > { %1420 = vmatpush3.bf16.msra.mxu1 %v1705_v11  ;;  %s1371_s29 = sshll.u32 %s1161_s11, 6  ;;  %s2600_s20 = sld [smem:[#allocation23_spill]] }
  0x9f   : > { %1421 = vmatprep.subr.bf16.mxu1 %v1960_v0  ;;  %s1150_s21 = scalar_lea.sflag [#allocation5], %s249_s0 }
  0xa1   : > { %727 = vrot.lane.b32.xlu1 %v2313_v9, %s1961_s5  ;;  %725 = vrot.lane.b32.xlu0 %v2321_v10, %s1961_s5 }
  0xa2   : > { %1422 = vmatpush3.bf16.msra.mxu1 %v1706_v12  ;;  %v1308_v12 = vld [vmem:[%s2267_s25 + $0x8] sm:$0xf]  ;;  %p2602_p3 = scmp.ne.s32.totalorder %s2599_s3, 0 }
  0xa3   : > { %1427 = vmatprep.subr.bf16.mxu1 %v1960_v0 }
  0xa4   : > { %s2601_s5 = smov %s2600_s20 }
  0xa5   : > { %376 = vrot.lane.b32.xlu1 %v2297_v4, %s1963_s9  ;;  %374 = vrot.lane.b32.xlu0 %v2294_v3, %s1963_s9 }
  0xa6   : > { %1424 = vmatmul.mubr.msk.bf16.vlgmr.msra.gmra.mrb[0].mxu1 %vm286_vm1, %v253_v13 }
  0xa7   : > { %1435 = vmatprep.mubr.msk.bf16.mxu1 %vm1962_vm0, %v1960_v0 }
  0xa9   : > { %828 = vrot.lane.b32.xlu1 %v2297_v4, %s1964_s18  ;;  %826 = vrot.lane.b32.xlu0 %v2294_v3, %s1964_s18 }
  0xad   : > { %380 = vrot.lane.b32.xlu1 %v2290_v2, %s1963_s9  ;;  %378 = vrot.lane.b32.xlu0 %v2287_v1, %s1963_s9 }
  0xb1   : > { %832 = vrot.lane.b32.xlu1 %v2290_v2, %s1964_s18  ;;  %830 = vrot.lane.b32.xlu0 %v2287_v1, %s1964_s18 }
  0xb5   : > { %384 = vrot.lane.b32.xlu1 %v2301_v5, %s1963_s9  ;;  %382 = vrot.lane.b32.xlu0 %v2306_v7, %s1963_s9 }
  0xb9   : > { %836 = vrot.lane.b32.xlu1 %v2301_v5, %s1964_s18  ;;  %834 = vrot.lane.b32.xlu0 %v2306_v7, %s1964_s18 }
  0xbd   : > { %388 = vrot.lane.b32.xlu1 %v2313_v9, %s1963_s9  ;;  %386 = vrot.lane.b32.xlu0 %v2321_v10, %s1963_s9  ;;  %s2466_s9 = scalar_lea.hbm %s2600_s20, %s1371_s29 }
  0xc1   : > { %840 = vrot.lane.b32.xlu1 %v2313_v9, %s1964_s18  ;;  %838 = vrot.lane.b32.xlu0 %v2321_v10, %s1964_s18  ;;  %s1969_s18 = smov [#allocation9]  }
  0xc5   : > { %489 = vrot.lane.b32.xlu1 %v2297_v4, %s1965_s30  ;;  %487 = vrot.lane.b32.xlu0 %v2294_v3, %s1965_s30 }
  0xc9   : > { %941 = vrot.lane.b32.xlu1 %v2297_v4, %s1966_s7  ;;  %939 = vrot.lane.b32.xlu0 %v2294_v3, %s1966_s7 }
  0xcd   : > { %493 = vrot.lane.b32.xlu1 %v2290_v2, %s1965_s30  ;;  %491 = vrot.lane.b32.xlu0 %v2287_v1, %s1965_s30 }
  0xd1   : > { %945 = vrot.lane.b32.xlu1 %v2290_v2, %s1966_s7  ;;  %943 = vrot.lane.b32.xlu0 %v2287_v1, %s1966_s7 }
  0xd5   : > { %497 = vrot.lane.b32.xlu1 %v2301_v5, %s1965_s30  ;;  %495 = vrot.lane.b32.xlu0 %v2306_v7, %s1965_s30 }
  0xd9   : > { %949 = vrot.lane.b32.xlu1 %v2301_v5, %s1966_s7  ;;  %947 = vrot.lane.b32.xlu0 %v2306_v7, %s1966_s7 }
  0xdd   : > { %501 = vrot.lane.b32.xlu1 %v2313_v9, %s1965_s30  ;;  %499 = vrot.lane.b32.xlu0 %v2321_v10, %s1965_s30  ;;  %s1801_s30 = sshll.u32 %s1969_s18, 4  ;;  %s1802_s30 = int_to_ptr.vmem [resolvable:$false] %s1801_s30 }
  0xe1   : > { %953 = vrot.lane.b32.xlu1 %v2313_v9, %s1966_s7  ;;  %951 = vrot.lane.b32.xlu0 %v2321_v10, %s1966_s7  ;;  %s1803_s7 = scalar_lea.vmem %s1802_s30, 128 }
  0xe5   : > { %602 = vrot.lane.b32.xlu1 %v2297_v4, %s1967_s15  ;;  %600 = vrot.lane.b32.xlu0 %v2294_v3, %s1967_s15 }
  0xe9   : > { %1054 = vrot.lane.b32.xlu1 %v2297_v4, %s1968_s10  ;;  %1052 = vrot.lane.b32.xlu0 %v2294_v3, %s1968_s10 }
  0xed   : > { %606 = vrot.lane.b32.xlu1 %v2290_v2, %s1967_s15  ;;  %604 = vrot.lane.b32.xlu0 %v2287_v1, %s1967_s15 }
  0xf1   : > { %1058 = vrot.lane.b32.xlu1 %v2290_v2, %s1968_s10  ;;  %1056 = vrot.lane.b32.xlu0 %v2287_v1, %s1968_s10 }
  0xf5   : > { %610 = vrot.lane.b32.xlu1 %v2301_v5, %s1967_s15  ;;  %608 = vrot.lane.b32.xlu0 %v2306_v7, %s1967_s15 }
  0xf9   : > { %1062 = vrot.lane.b32.xlu1 %v2301_v5, %s1968_s10  ;;  %1060 = vrot.lane.b32.xlu0 %v2306_v7, %s1968_s10 }
  0xfd   : > { %614 = vrot.lane.b32.xlu1 %v2313_v9, %s1967_s15  ;;  %612 = vrot.lane.b32.xlu0 %v2321_v10, %s1967_s15 }
 0x101   : > { %1066 = vrot.lane.b32.xlu1 %v2313_v9, %s1968_s10  ;;  %1064 = vrot.lane.b32.xlu0 %v2321_v10, %s1968_s10 }
 0x107   : > { %v718_v14 = vpop.permute.xlu1 %717  ;;  %v714_v15 = vpop.permute.xlu0 %713 }
 0x10b   : > { %v720_v16 = vpop.permute.xlu1 %719  ;;  %v716_v17 = vpop.permute.xlu0 %715 }
 0x10c   : > { %v730_v18 = vsel %vm729_vm2, %v714_v15, %v716_v17  ;;  %v731_v21 = vsel %vm729_vm2, %v718_v14, %v720_v16  ;;  %v1348_v16 = vld [vmem:[%s2267_s25 + $0x18] sm:$0xf] }
 0x10d   : > { %1464 = vmatpush3.bf16.msra.mxu0 %v730_v18 }
 0x10e   : > { %1465 = vmatprep.subr.bf16.mxu0 %v1960_v0 }
 0x10f   : > { %v724_v19 = vpop.permute.xlu1 %723  ;;  %v722_v20 = vpop.permute.xlu0 %721 }
 0x110   : > { %v732_v24 = vsel %vm729_vm2, %v722_v20, %v724_v19 }
 0x111   : > { %1466 = vmatpush3.bf16.msra.mxu0 %v731_v21 }
 0x112   : > { %1467 = vmatprep.subr.bf16.mxu0 %v1960_v0 }
 0x113   : > { %v728_v22 = vpop.permute.xlu1 %727  ;;  %v726_v23 = vpop.permute.xlu0 %725 }
 0x114   : > { %v733_v28 = vsel %vm729_vm2, %v726_v23, %v728_v22 }
 0x115   : > { %1468 = vmatpush3.bf16.msra.mxu0 %v732_v24 }
 0x116   : > { %1469 = vmatprep.subr.bf16.mxu0 %v1960_v0 }
 0x117   : > { %v377_v25 = vpop.permute.xlu1 %376  ;;  %v375_v26 = vpop.permute.xlu0 %374 }
 0x118   : > { %v391_v27 = vsel %vm390_vm3, %v375_v26, %v377_v25 }
 0x119   : > { %1428 = vmatpush3.bf16.msra.mxu1 %v391_v27  ;;  %1470 = vmatpush3.bf16.msra.mxu0 %v733_v28 }
 0x11a   : > { %1475 = vmatprep.subr.bf16.mxu0 %v1960_v0  ;;  %1429 = vmatprep.subr.bf16.mxu1 %v1960_v0 }
 0x11b   : > { %v829_v29 = vpop.permute.xlu1 %828  ;;  %v827_v31 = vpop.permute.xlu0 %826 }
 0x11c   : > { %v843_v32 = vsel %vm842_vm4, %v827_v31, %v829_v29  ;;  %1472 = vmatmul.mubr.msk.bf16.vlgmr.msra.gmra.mrb[0].mxu0 %vm286_vm1, %v1328_v30 }
 0x11d   : > { %1476 = vmatpush3.bf16.msra.mxu0 %v843_v32  ;;  %1483 = vmatprep.mubr.msk.bf16.mxu0 %vm1962_vm0, %v1960_v0 }
 0x11e   : > { %1477 = vmatprep.subr.bf16.mxu0 %v1960_v0 }
 0x11f   : > { %v381_v33 = vpop.permute.xlu1 %380  ;;  %v379_v34 = vpop.permute.xlu0 %378 }
 0x120   : > { %v392_v35 = vsel %vm390_vm3, %v379_v34, %v381_v33 }
 0x121   : > { %1430 = vmatpush3.bf16.msra.mxu1 %v392_v35 }
 0x122   : > { %1431 = vmatprep.subr.bf16.mxu1 %v1960_v0 }
 0x123   : > { %v833_v36 = vpop.permute.xlu1 %832  ;;  %v831_v37 = vpop.permute.xlu0 %830 }
 0x124   : > { %v844_v38 = vsel %vm842_vm4, %v831_v37, %v833_v36 }
 0x125   : > { %1478 = vmatpush3.bf16.msra.mxu0 %v844_v38  ;;  %v1318_v38 = vld [vmem:[%s2267_s25 + $0xc] sm:$0xf] }
 0x126   : > { %1479 = vmatprep.subr.bf16.mxu0 %v1960_v0 }
 0x127   : > { %v385_v39 = vpop.permute.xlu1 %384  ;;  %v383_v40 = vpop.permute.xlu0 %382 }
 0x128   : > { %v393_v41 = vsel %vm390_vm3, %v383_v40, %v385_v39 }
 0x129   : > { %1432 = vmatpush3.bf16.msra.mxu1 %v393_v41  ;;  %v1358_v41 = vld [vmem:[%s2267_s25 + $0x1c] sm:$0xf]  ;;  %s1165_s25 = sshll.u32 %s251_s28, 4  ;;  %s2468_s25 = int_to_ptr.vmem [resolvable:$true] %s1165_s25 }
 0x12a   : > { %1433 = vmatprep.subr.bf16.mxu1 %v1960_v0  ;;  %s1797_s22 = scalar_lea.vmem %s2468_s25, 64  ;;  %p1804_p5 = scmp.lt.s32.totalorder %s2468_s25, %s1802_s30 }
 0x12b   : > { %v837_v42 = vpop.permute.xlu1 %836  ;;  %v835_v43 = vpop.permute.xlu0 %834  ;;  %p1798_p9 = scmp.ne.s32.totalorder %s2468_s25, %s1797_s22  ;;  %p1805_p2 = scmp.lt.s32.totalorder %s1803_s7, %s1797_s22 }
 0x12c   : > { %v845_v44 = vsel %vm842_vm4, %v835_v43, %v837_v42 }
 0x12d   : > { %1480 = vmatpush3.bf16.msra.mxu0 %v845_v44  ;;  %p1799_p10 = pnand %p1798_p9, %p2602_p3  ;;  %p1806_p4 = por %p1805_p2, %p1804_p5 }
 0x12e   : > { %1481 = vmatprep.subr.bf16.mxu0 %v1960_v0 }
 0x12f   : > { %v389_v45 = vpop.permute.xlu1 %388  ;;  %v387_v46 = vpop.permute.xlu0 %386  ;;  %p1800_p0 = pneg %p1799_p10 }
 0x130   : > { %v394_v47 = vsel %vm390_vm3, %v387_v46, %v389_v45  ;;  %v1368_v46 = vld [vmem:[#allocation6] ss:$0 sm:$0xff] }
 0x131   : > { %1434 = vmatpush3.bf16.msra.mxu1 %v394_v47  ;;  %p1807_p12 = pnand %p1806_p4, %p1800_p0 }
 0x132   : > { %1439 = vmatprep.subr.bf16.mxu1 %v1960_v0 }
 0x133   : > { %v841_v48 = vpop.permute.xlu1 %840  ;;  %v839_v50 = vpop.permute.xlu0 %838 }
 0x134   : > { %v846_v51 = vsel %vm842_vm4, %v839_v50, %v841_v48  ;;  %1436 = vmatmul.mubr.msk.bf16.vlgmr.msra.gmra.mrb[0].mxu1 %vm286_vm1, %v1298_v49 }
 0x135   : > { %1482 = vmatpush3.bf16.msra.mxu0 %v846_v51  ;;  %1447 = vmatprep.mubr.msk.bf16.mxu1 %vm1962_vm0, %v1960_v0 }
 0x136   : > { %1487 = vmatprep.subr.bf16.mxu0 %v1960_v0 }
 0x137   : > { %v490_v52 = vpop.permute.xlu1 %489  ;;  %v488_v54 = vpop.permute.xlu0 %487 }
 0x138   : > { %v504_v55 = vsel %vm503_vm5, %v488_v54, %v490_v52  ;;  %1484 = vmatmul.mubr.msk.bf16.vlgmr.msra.gmra.mrb[0].mxu0 %vm286_vm1, %v1338_v53 }
 0x139   : > { %1440 = vmatpush3.bf16.msra.mxu1 %v504_v55  ;;  %1495 = vmatprep.mubr.msk.bf16.mxu0 %vm1962_vm0, %v1960_v0 }
 0x13a   : > { %1441 = vmatprep.subr.bf16.mxu1 %v1960_v0 }
 0x13b   : > { %v942_v56 = vpop.permute.xlu1 %941  ;;  %v940_v57 = vpop.permute.xlu0 %939 }
 0x13c   : > { %v956_v58 = vsel %vm955_vm6, %v940_v57, %v942_v56 }
 0x13d   : > { %1488 = vmatpush3.bf16.msra.mxu0 %v956_v58 }
 0x13e   : > { %1489 = vmatprep.subr.bf16.mxu0 %v1960_v0 }
 0x13f   : > { %v494_v59 = vpop.permute.xlu1 %493  ;;  %v492_v60 = vpop.permute.xlu0 %491 }
 0x140   : > { %v505_v61 = vsel %vm503_vm5, %v492_v60, %v494_v59 }
 0x141   : > { %1442 = vmatpush3.bf16.msra.mxu1 %v505_v61 }
 0x142   : > { %1443 = vmatprep.subr.bf16.mxu1 %v1960_v0 }
 0x143   : > { %v946_v62 = vpop.permute.xlu1 %945  ;;  %v944_v63 = vpop.permute.xlu0 %943 }
 0x144   : > { %v957_v1 = vsel %vm955_vm6, %v944_v63, %v946_v62 }
 0x145   : > { %1490 = vmatpush3.bf16.msra.mxu0 %v957_v1 }
 0x146   : > { %1491 = vmatprep.subr.bf16.mxu0 %v1960_v0 }
 0x147   : > { %v498_v2 = vpop.permute.xlu1 %497  ;;  %v496_v3 = vpop.permute.xlu0 %495 }
 0x148   : > { %v506_v4 = vsel %vm503_vm5, %v496_v3, %v498_v2 }
 0x149   : > { %1444 = vmatpush3.bf16.msra.mxu1 %v506_v4 }
 0x14a   : > { %1445 = vmatprep.subr.bf16.mxu1 %v1960_v0 }
 0x14b   : > { %v950_v5 = vpop.permute.xlu1 %949  ;;  %v948_v6 = vpop.permute.xlu0 %947 }
 0x14c   : > { %v958_v7 = vsel %vm955_vm6, %v948_v6, %v950_v5 }
 0x14d   : > { %1492 = vmatpush3.bf16.msra.mxu0 %v958_v7 }
 0x14e   : > { %1493 = vmatprep.subr.bf16.mxu0 %v1960_v0 }
 0x14f   : > { %v502_v8 = vpop.permute.xlu1 %501  ;;  %v500_v9 = vpop.permute.xlu0 %499 }
 0x150   : > { %v507_v10 = vsel %vm503_vm5, %v500_v9, %v502_v8 }
 0x151   : > { %1446 = vmatpush3.bf16.msra.mxu1 %v507_v10 }
 0x152   : > { %1451 = vmatprep.subr.bf16.mxu1 %v1960_v0 }
 0x153   : > { %v954_v11 = vpop.permute.xlu1 %953  ;;  %v952_v13 = vpop.permute.xlu0 %951 }
 0x154   : > { %v959_v14 = vsel %vm955_vm6, %v952_v13, %v954_v11  ;;  %1448 = vmatmul.mubr.msk.bf16.vlgmr.msra.gmra.mrb[0].mxu1 %vm286_vm1, %v1308_v12 }
 0x155   : > { %1494 = vmatpush3.bf16.msra.mxu0 %v959_v14  ;;  %1459 = vmatprep.mubr.msk.bf16.mxu1 %vm1962_vm0, %v1960_v0 }
 0x156   : > { %1499 = vmatprep.subr.bf16.mxu0 %v1960_v0 }
 0x157   : > { %v603_v15 = vpop.permute.xlu1 %602  ;;  %v601_v17 = vpop.permute.xlu0 %600 }
 0x158   : > { %v617_v18 = vsel %vm616_vm7, %v601_v17, %v603_v15  ;;  %1496 = vmatmul.mubr.msk.bf16.vlgmr.msra.gmra.mrb[0].mxu0 %vm286_vm1, %v1348_v16 }
 0x159   : > { %1452 = vmatpush3.bf16.msra.mxu1 %v617_v18  ;;  %1507 = vmatprep.mubr.msk.bf16.mxu0 %vm1962_vm0, %v1960_v0 }
 0x15a   : > { %1453 = vmatprep.subr.bf16.mxu1 %v1960_v0 }
 0x15b   : > { %v1055_v19 = vpop.permute.xlu1 %1054  ;;  %v1053_v20 = vpop.permute.xlu0 %1052 }
 0x15c   : > { %v1069_v21 = vsel %vm1068_vm8, %v1053_v20, %v1055_v19 }
 0x15d   : > { %1500 = vmatpush3.bf16.msra.mxu0 %v1069_v21 }
 0x15e   : > { %1501 = vmatprep.subr.bf16.mxu0 %v1960_v0 }
 0x15f   : > { %v607_v22 = vpop.permute.xlu1 %606  ;;  %v605_v23 = vpop.permute.xlu0 %604 }
 0x160   : > { %v618_v24 = vsel %vm616_vm7, %v605_v23, %v607_v22 }
 0x161   : > { %1454 = vmatpush3.bf16.msra.mxu1 %v618_v24 }
 0x162   : > { %1455 = vmatprep.subr.bf16.mxu1 %v1960_v0 }
 0x163   : > { %v1059_v25 = vpop.permute.xlu1 %1058  ;;  %v1057_v26 = vpop.permute.xlu0 %1056 }
 0x164   : > { %v1070_v27 = vsel %vm1068_vm8, %v1057_v26, %v1059_v25 }
 0x165   : > { %1502 = vmatpush3.bf16.msra.mxu0 %v1070_v27 }
 0x166   : > { %1503 = vmatprep.subr.bf16.mxu0 %v1960_v0 }
 0x167   : > { %v611_v28 = vpop.permute.xlu1 %610  ;;  %v609_v29 = vpop.permute.xlu0 %608 }
 0x168   : > { %v619_v30 = vsel %vm616_vm7, %v609_v29, %v611_v28 }
 0x169   : > { %1456 = vmatpush3.bf16.msra.mxu1 %v619_v30 }
 0x16a   : > { %1457 = vmatprep.subr.bf16.mxu1 %v1960_v0 }
 0x16b   : > { %v1063_v31 = vpop.permute.xlu1 %1062  ;;  %v1061_v32 = vpop.permute.xlu0 %1060 }
 0x16c   : > { %v1071_v33 = vsel %vm1068_vm8, %v1061_v32, %v1063_v31 }
 0x16d   : > { %1504 = vmatpush3.bf16.msra.mxu0 %v1071_v33 }
 0x16e   : > { %1505 = vmatprep.subr.bf16.mxu0 %v1960_v0 }
 0x16f   : > { %v615_v34 = vpop.permute.xlu1 %614  ;;  %v613_v35 = vpop.permute.xlu0 %612 }
 0x170   : > { %v620_v36 = vsel %vm616_vm7, %v613_v35, %v615_v34 }
 0x171   : > { %1458 = vmatpush3.bf16.msra.mxu1 %v620_v36 }
 0x173   : > { %v1067_v37 = vpop.permute.xlu1 %1066  ;;  %v1065_v39 = vpop.permute.xlu0 %1064 }
 0x174   : > { %v1072_v40 = vsel %vm1068_vm8, %v1065_v39, %v1067_v37  ;;  %1460 = vmatmul.mubr.msk.bf16.vlgmr.msra.gmra.mrb[0].mxu1 %vm286_vm1, %v1318_v38 }
 0x175   : > { %1506 = vmatpush3.bf16.msra.mxu0 %v1072_v40 }
 0x178   : > { %1508 = vmatmul.mubr.msk.bf16.vlgmr.msra.gmra.mrb[0].mxu0 %vm286_vm1, %v1358_v41 }
 0x247   : > { %v662_v42 = vpop.f32.mrb[0].mxu1 }
 0x248   : > { %v1461_v43 = vpop.f32.mrb[1].mxu1 }
 0x249   : > { %v665_v44 = vpop.f32.mrb[2].mxu1 }
 0x24a   : > { %v1462_v45 = vpop.f32.mrb[3].mxu1 }
 0x24b   : > { %v1114_v0 = vpop.f32.mrb[0].mxu0 }
 0x24c   : > { %v1511_v47 = vadd.f32 %v1114_v0, %v662_v42  ;;  %v1509_v48 = vpop.f32.mrb[1].mxu0 }
 0x24d   : > { %v1117_v49 = vpop.f32.mrb[2].mxu0 }
 0x24e   : > { %v1510_v50 = vpop.f32.mrb[3].mxu0  ;;  %v1130_v51 = vmul.f32 %v1511_v47, %v1368_v46 }
 0x250   : > { %1131 = vadd.xlane.f32.xlu0 %v1130_v51  ;;  %v1134_v52 = vmul.f32 %v1511_v47, %v1130_v51 }
 0x252   : > { %1135 = vadd.xlane.f32.xlu1 %v1134_v52 }
 0x2dd   : > { %v1132_v53 = vpop.xlane.xlu0 %1131 }
 0x2de   : > { %v1133_v54 = vmul.f32 0.015625, %v1132_v53 }
 0x2df   : > { %v1136_v55 = vpop.xlane.xlu1 %1135 }
 0x2e0   : > { %v1138_v56 = vmul.f32 %v1133_v54, %v1133_v54  ;;  %v1137_v57 = vmul.f32 0.015625, %v1136_v55  ;;  %v1140_v60 = vsub.f32 %v1511_v47, %v1133_v54 }
 0x2e2   : > { %v1139_v58 = vsub.f32 %v1137_v57, %v1138_v56 }
 0x2e4   : > { %v1141_v59 = vadd.f32 1e-05, %v1139_v58 }
 0x2e6   : > { %1707 = vrsqrt.f32 %v1141_v59 }
 0x2f0   : > { %v1708_v61 = vpop.eup %1707 }
 0x2f1   : > { %v1143_v62 = vmul.f32 %v1708_v61, %v1140_v60 }
 0x2f3   : > { %vm1144_vm9 = vcmp.ge.f32.partialorder %v1143_v62, 0.0  ;;  %v1145_v63 = vmul.f32 0.02, %v1143_v62 }
 0x2f5   : > { %v1146_v1 = vsel %vm1144_vm9, %v1143_v62, %v1145_v63 }
 0x2f6   : > { %v1147_v2 = vpack.c.bf16 %v1146_v1, %v1146_v1 }
 0x2f8   : > { %1148 = vst [vmem:[%s251_s28] sm:$0xf] %v1147_v2 }
 0x2f9   : > { %1810 = shalt.err (!%p1807_p12)
}
 0x2fa   : > { %s1811_s15 = scalar_lea.hbm %s2466_s9, 64  ;;  %s1815_s6 = scalar_lea.hbm %s2601_s5, 256 }
 0x2fb   : > { %p1812_p13 = scmp.ne.s32.totalorder %s2466_s9, %s1811_s15  ;;  %p1816_p8 = scmp.lt.u32.totalorder %s2466_s9, %s2601_s5 }
 0x2fc   : > { %p1817_p1 = scmp.lt.u32.totalorder %s1815_s6, %s1811_s15  ;;  %p1819_p9 = scmp.lt.u32.totalorder %s1811_s15, %s2466_s9 }
 0x2fd   : > { %p1813_p11 = pnand %p1812_p13, %p2602_p3 }
 0x2fe   : > { %p1818_p7 = por %p1817_p1, %p1816_p8 }
 0x2ff   : > { %p1814_p6 = pneg %p1813_p11 }
 0x300   : > { %p1820_p10 = por %p1819_p9, %p1818_p7 }
 0x302   : > { %p1821_p0 = pnand %p1820_p10, %p1814_p6 }
 0x304   : > { %1824 = shalt.err (!%p1821_p0)
}
 0x305   : > { %1544 = dma.vmem_to_hbm [thread:$0]  (%p2602_p3), %s2468_s25, 64, %s2466_s9, %s1150_s21  }
 0x306 PF: > { %s2603_s29 = sld [smem:[#allocation17_spill]]  ;;  %s2604_s28 = sld [smem:[#allocation14_spill]] }
 0x307   : > { %s2605_s4 = sld [smem:[#allocation21_spill]] }
 0x30c   : > { %p1564_p5 = scmp.ge.s32.totalorder %s2603_s29, 2  ;;  %s1177_s26 = sand.u32 1, %s2604_s28  }
 0x30d   : > { %p2606_p2 = scmp.ne.s32.totalorder %s2605_s4, 0  ;;  %s1178_s20 = scalar_lea.sflag [#allocation5], %s1177_s26 }
 0x30f   : > { %p1558_p4 = pnand %p1564_p5, %p2606_p2 }
 0x311   : > { %1894 = dma.done.wait (!%p1558_p4), %s1178_s20, 64  }
 0x312   : > { %1896 = vsyncadd (!%p1558_p4), %s1178_s20, 4294967232  ;;  %s20_s25 = sadd.s32 1, %s2603_s29   ;;  %s2608_s3 = smov %s2230_s12 }
 0x313   : > { %p2496_p12 = scmp.ge.s32.totalorder %s20_s25, 6   ;;  %s2609_s9 = sld [smem:[#allocation15_spill]] }
 0x314   : > { %s2610_s20 = sld [smem:[#allocation19_spill]]  ;;  %s2611_s21 = sld [smem:[#allocation16_spill]] }
 0x315   : > { %s2612_s23 = sld [smem:[#allocation18_spill]]  ;;  %s2614_s12 = smov %s1903_s13 }
 0x316   : > { %s2615_s13 = smov %s1907_s14  ;;  %s2616_s14 = smov %s2233_s27 }
 0x317   : > { %s2617_s15 = smov %s1915_s16  ;;  %s2618_s16 = smov %s1919_s17 }
 0x318   : > { %s2619_s17 = smov %s2608_s3  ;;  %s2620_s18 = smov %s1927_s19 }
 0x319   : > { %s2621_s19 = smov %s2609_s9  ;;  %s2622_s22 = smov %s1947_s24 }
 0x31a   : > { %s2623_s24 = smov %s2629_s8  ;;  %19 = sbr.rel (!%p2496_p12) target bundleno = 14 (0xe), region = 99 }
 0x321   :  { %1183 = vsyncpa [#allocation4], 1 }
 0x322   :  { %1185 = vsyncpa [#allocation4 + $0x1], 1 }
 0x323   :  { %1186 = vsyncpa [#allocation7], 1 }
 0x324   :  { %1187 = vsyncpa [#allocation5], 1 }
 0x325   :  { %1189 = vsyncpa [#allocation5 + $0x1], 1 }

// kernel: encoder_forward.7
= control target key start
LH: loop header
LB: loop body
LE: loop exit
PB: predicated region body
PF: predicated region fallthrough
CT: control target
= control target key end

     0   :  { %8 = vsyncpa [#allocation3], 0  ;;  %s1227_s0 = inlined_call_operand.hbm [shape: bf16[2,1024], index: 0, kind: input, shape index: {}]   ;;  %s1228_s1 = inlined_call_operand.hbm [shape: bf16[1024,8], index: 1, kind: input, shape index: {}]   ;;  %s1229_s2 = inlined_call_operand.hbm [shape: f32[1,8], index: 2, kind: input, shape index: {}]   ;;  %s1230_s3 = inlined_call_operand.hbm [shape: f32[2,8], index: 3, kind: output, shape index: {}]  }
   0x1   :  { %9 = vsyncpa [#allocation6], 0 }
   0x2   :  { %10 = vsyncpa [#allocation4], 0  ;;  %s1139_s12 = smov [#allocation5]   ;;  %s1045_s16 = scalar_lea.hbm %s1228_s1, 8192 }
   0x3   :  { %s26_s13 = sshll.u32 %s1139_s12, 4  ;;  %p1046_p0 = scmp.ne.s32.totalorder %s1228_s1, %s1045_s16  ;;  %s27_s13 = int_to_ptr.vmem [resolvable:$true] %s26_s13 }
   0x4   :  { %p1049_p1 = scmp.lt.u32.totalorder %s1045_s16, %s1228_s1 }
   0x6   :  { %p1051_p2 = pnand %p1049_p1, %p1046_p0 }
   0x8   :  { %1054 = shalt.err (!%p1051_p2)
}
   0x9   :  { %s1055_s21 = scalar_lea.vmem %s27_s13, 8192  ;;  %p1060_p4 = scmp.lt.s32.totalorder %s27_s13, %s27_s13 }
   0xa   :  { %p1056_p3 = scmp.ne.s32.totalorder %s27_s13, %s1055_s21  ;;  %p1061_p5 = scmp.lt.s32.totalorder %s1055_s21, %s1055_s21 }
   0xc   :  { %p1062_p6 = por %p1061_p5, %p1060_p4 }
   0xe   :  { %p1063_p7 = pnand %p1062_p6, %p1056_p3 }
  0x10   :  { %1066 = shalt.err (!%p1063_p7)
}
  0x11   :  { %s1140_s22 = smov 64   ;;  %s1141_s23 = smov 4  }
  0x12   :  { %32 = dma.hbm_to_vmem [thread:$0]  %s1228_s1, 8192, %s27_s13, [#allocation6], %s1140_s22, %s1140_s22, %s1141_s23  }
  0x13   :  { %s1142_s26 = smov [#allocation2]   ;;  %s1143_s28 = smov [#allocation7]  }
  0x14   :  { %s17_s27 = sshll.u32 %s1142_s26, 4  ;;  %s39_s29 = sshll.u32 %s1143_s28, 4  ;;  %s18_s27 = int_to_ptr.vmem [resolvable:$true] %s17_s27  ;;  %s40_s29 = int_to_ptr.vmem [resolvable:$true] %s39_s29 }
  0x15   :  { %s1067_s5 = scalar_lea.hbm %s1227_s0, 128 }
  0x16   :  { %p1068_p8 = scmp.ne.s32.totalorder %s1227_s0, %s1067_s5  ;;  %p1071_p9 = scmp.lt.u32.totalorder %s1067_s5, %s1227_s0 }
  0x18   :  { %p1073_p10 = pnand %p1071_p9, %p1068_p8 }
  0x1a   :  { %1076 = shalt.err (!%p1073_p10)
}
  0x1b   :  { %s1077_s1 = scalar_lea.vmem %s18_s27, 128  ;;  %p1082_p12 = scmp.lt.s32.totalorder %s18_s27, %s18_s27 }
  0x1c   :  { %p1078_p11 = scmp.ne.s32.totalorder %s18_s27, %s1077_s1  ;;  %p1083_p13 = scmp.lt.s32.totalorder %s1077_s1, %s1077_s1 }
  0x1e   :  { %p1084_p0 = por %p1083_p13, %p1082_p12 }
  0x20   :  { %p1085_p1 = pnand %p1084_p0, %p1078_p11 }
  0x22   :  { %1088 = shalt.err (!%p1085_p1)
}
  0x23   :  { %20 = dma.hbm_to_vmem [thread:$0]  %s1227_s0, 128, %s18_s27, [#allocation3]  }
  0x24   :  { %s1089_s14 = scalar_lea.hbm %s1229_s2, 16 }
  0x25   :  { %p1090_p2 = scmp.ne.s32.totalorder %s1229_s2, %s1089_s14  ;;  %p1093_p3 = scmp.lt.u32.totalorder %s1089_s14, %s1229_s2 }
  0x27   :  { %p1095_p4 = pnand %p1093_p3, %p1090_p2 }
  0x29   :  { %1098 = shalt.err (!%p1095_p4)
}
  0x2a   :  { %s1099_s19 = scalar_lea.vmem %s40_s29, 16  ;;  %s1103_s20 = scalar_lea.vmem %s40_s29, 32 }
  0x2b   :  { %p1100_p5 = scmp.ne.s32.totalorder %s40_s29, %s1099_s19  ;;  %p1104_p6 = scmp.lt.s32.totalorder %s40_s29, %s40_s29 }
  0x2c   :  { %p1105_p7 = scmp.lt.s32.totalorder %s1103_s20, %s1099_s19 }
  0x2e   :  { %p1106_p8 = por %p1105_p7, %p1104_p6 }
  0x30   :  { %p1107_p9 = pnand %p1106_p8, %p1100_p5 }
  0x32   :  { %1110 = shalt.err (!%p1107_p9)
}
  0x33   :  { %42 = dma.hbm_to_vmem [thread:$0]  %s1229_s2, 16, %s40_s29, [#allocation6]  }
  0x34   :  { %1133 = dma.done.wait [#allocation3], 128  }
  0x35   :  { %1134 = vsyncadd [#allocation3], 4294967168 }
  0x36   :  { %1135 = dma.done.wait [#allocation6], 8208  }
  0x37   :  { %1136 = vsyncadd [#allocation6], 4294959088  ;;  %v976_v0 = vld [vmem:[#allocation5 + $0x40] sm:$0xff]   ;;  %v980_v4 = vld [vmem:[#allocation5 + $0x48] sm:$0xff]   ;;  %v1144_v22 = vmov 1966171168   ;;  %v194_v24 = vlaneseq }
  0x38   :  { %v977_v1 = vld [vmem:[#allocation5 + $0xc0] sm:$0xff]   ;;  %881 = vmatprep.subr.bf16.mxu0 %v976_v0  ;;  %v981_v5 = vld [vmem:[#allocation5 + $0xc8] sm:$0xff]   ;;  %v984_v8 = vld [vmem:[#allocation5 + $0x50] sm:$0xff]   ;;  %v192_v23 = vunpack.c.l.s4 %v1144_v22  ;;  %s1145_s2 = smov [#allocation8]   ;;  %vm797_vm0 = vcmask 58368  }
  0x39   :  { %v978_v2 = vld [vmem:[#allocation5] sm:$0xff]   ;;  %903 = vmatprep.subr.bf16.mxu1 %v977_v1  ;;  %v982_v6 = vld [vmem:[#allocation5 + $0x8] sm:$0xff]   ;;  %v985_v9 = vld [vmem:[#allocation5 + $0xd0] sm:$0xff]   ;;  %v195_v30 = vshrl.u32 %v194_v24, 7  ;;  %s805_s22 = sshll.u32 %s1145_s2, 4  ;;  %s806_s22 = int_to_ptr.vmem [resolvable:$true] %s805_s22 }
  0x3a   :  { %v979_v3 = vld [vmem:[#allocation5 + $0x80] sm:$0xff]   ;;  %882 = vmatpush3.bf16.msra.mxu0 %v978_v2  ;;  %v983_v7 = vld [vmem:[#allocation5 + $0x88] sm:$0xff]   ;;  %v986_v10 = vld [vmem:[#allocation5 + $0x10] sm:$0xff]   ;;  %v193_v29 = vunpack.c.0.s8 %v192_v23  ;;  %s1111_s23 = scalar_lea.vmem %s806_s22, 32  ;;  %p1116_p11 = scmp.lt.s32.totalorder %s806_s22, %s806_s22 }
  0x3b   :  { %904 = vmatpush3.bf16.msra.mxu1 %v979_v3  ;;  %883 = vmatprep.subr.bf16.mxu0 %v980_v4  ;;  %v987_v11 = vld [vmem:[#allocation5 + $0x90] sm:$0xff]   ;;  %v988_v12 = vld [vmem:[#allocation5 + $0x58] sm:$0xff]   ;;  %v992_v16 = vld [vmem:[#allocation5 + $0x60] sm:$0xff]   ;;  %p1112_p10 = scmp.ne.s32.totalorder %s806_s22, %s1111_s23  ;;  %p1117_p12 = scmp.lt.s32.totalorder %s1111_s23, %s1111_s23 }
  0x3c   :  { %905 = vmatprep.subr.bf16.mxu1 %v981_v5  ;;  %v989_v13 = vld [vmem:[#allocation5 + $0xd8] sm:$0xff]   ;;  %v993_v17 = vld [vmem:[#allocation5 + $0xe0] sm:$0xff]   ;;  %v996_v20 = vld [vmem:[#allocation5 + $0x68] sm:$0xff]   ;;  %v1202_v35 = vsub.s32 %v193_v29, %v195_v30 }
  0x3d   :  { %v990_v14 = vld [vmem:[#allocation5 + $0x18] sm:$0xff]   ;;  %v994_v18 = vld [vmem:[#allocation5 + $0x20] sm:$0xff]   ;;  %v997_v21 = vld [vmem:[#allocation5 + $0xe8] sm:$0xff]   ;;  %p1118_p13 = por %p1117_p12, %p1116_p11 }
  0x3e   :  { %884 = vmatpush3.bf16.msra.mxu0 %v982_v6  ;;  %v991_v15 = vld [vmem:[#allocation5 + $0x98] sm:$0xff]   ;;  %v995_v19 = vld [vmem:[#allocation5 + $0xa0] sm:$0xff]   ;;  %v998_v25 = vld [vmem:[#allocation5 + $0x28] sm:$0xff]  }
  0x3f   :  { %906 = vmatpush3.bf16.msra.mxu1 %v983_v7  ;;  %885 = vmatprep.subr.bf16.mxu0 %v984_v8  ;;  %v999_v26 = vld [vmem:[#allocation5 + $0xa8] sm:$0xff]   ;;  %v1000_v27 = vld [vmem:[#allocation5 + $0x70] sm:$0xff]   ;;  %v1004_v33 = vld [vmem:[#allocation5 + $0x78] sm:$0xff]   ;;  %p1119_p0 = pnand %p1118_p13, %p1112_p10 }
  0x40   :  { %907 = vmatprep.subr.bf16.mxu1 %v985_v9  ;;  %v1001_v28 = vld [vmem:[#allocation5 + $0xf0] sm:$0xff]   ;;  %v1005_v34 = vld [vmem:[#allocation5 + $0xf8] sm:$0xff]   ;;  %v1009_v41 = vld [vmem:[#allocation5 + $0x140] sm:$0xff]  }
  0x41   :  { %v1002_v31 = vld [vmem:[#allocation5 + $0x30] sm:$0xff]   ;;  %v1006_v36 = vld [vmem:[#allocation5 + $0x38] sm:$0xff]   ;;  %v1010_v42 = vld [vmem:[#allocation5 + $0x1c0] sm:$0xff]  }
  0x42   :  { %886 = vmatpush3.bf16.msra.mxu0 %v986_v10  ;;  %v1003_v32 = vld [vmem:[#allocation5 + $0xb0] sm:$0xff]   ;;  %v1007_v37 = vld [vmem:[#allocation5 + $0xb8] sm:$0xff]   ;;  %v1011_v47 = vld [vmem:[#allocation5 + $0x100] sm:$0xff]  }
  0x43   :  { %908 = vmatpush3.bf16.msra.mxu1 %v987_v11  ;;  %887 = vmatprep.subr.bf16.mxu0 %v988_v12  ;;  %v53_v38 = vld [vmem:[#allocation2] sm:$0xff]  ;;  %v1013_v50 = vld [vmem:[#allocation5 + $0x148] sm:$0xff]   ;;  %v1012_v52 = vld [vmem:[#allocation5 + $0x180] sm:$0xff]  }
  0x44   :  { %909 = vmatprep.subr.bf16.mxu1 %v989_v13  ;;  %v190_v39 = vcombine.high %v53_v38, %v53_v38  ;;  %v197_v40 = vrot.slane %v53_v38, %v1202_v35  ;;  %v1014_v54 = vld [vmem:[#allocation5 + $0x1c8] sm:$0xff]   ;;  %v1017_v57 = vld [vmem:[#allocation5 + $0x150] sm:$0xff]   ;;  %v1021_v61 = vld [vmem:[#allocation5 + $0x158] sm:$0xff]  }
  0x45   :  { %v1015_v55 = vld [vmem:[#allocation5 + $0x108] sm:$0xff]   ;;  %v1018_v59 = vld [vmem:[#allocation5 + $0x1d0] sm:$0xff]   ;;  %v1022_v63 = vld [vmem:[#allocation5 + $0x1d8] sm:$0xff]  }
  0x46   :  { %888 = vmatpush3.bf16.msra.mxu0 %v990_v14  ;;  %v205_v43 = vcombine.high %v197_v40, %v197_v40  ;;  %v213_v44 = vrot.slane %v197_v40, %v1202_v35  ;;  %v1207_v45 = vrot.slane %v190_v39, %v1202_v35  ;;  %v1016_v58 = vld [vmem:[#allocation5 + $0x188] sm:$0xff]   ;;  %v1019_v60 = vld [vmem:[#allocation5 + $0x110] sm:$0xff]   ;;  %v1023_v0 = vld [vmem:[#allocation5 + $0x118] sm:$0xff]  }
  0x47   :  { %910 = vmatpush3.bf16.msra.mxu1 %v991_v15  ;;  %889 = vmatprep.subr.bf16.mxu0 %v992_v16  ;;  %v1020_v62 = vld [vmem:[#allocation5 + $0x190] sm:$0xff]   ;;  %v1025_v1 = vld [vmem:[#allocation5 + $0x160] sm:$0xff]   ;;  %v1024_v2 = vld [vmem:[#allocation5 + $0x198] sm:$0xff]  }
  0x48   :  { %911 = vmatprep.subr.bf16.mxu1 %v993_v17  ;;  %v227_v46 = vrot.slane %v205_v43, %v1202_v35  ;;  %v206_v48 = vcombine.high %v1207_v45, %v1207_v45  ;;  %v235_v49 = vcombine.high %v213_v44, %v213_v44  ;;  %v1026_v3 = vld [vmem:[#allocation5 + $0x1e0] sm:$0xff]   ;;  %v1029_v5 = vld [vmem:[#allocation5 + $0x168] sm:$0xff]   ;;  %v1033_v9 = vld [vmem:[#allocation5 + $0x170] sm:$0xff]   ;;  %v220_v17 = vrot.slane %v1207_v45, %v1202_v35 }
  0x49   :  { %v1027_v4 = vld [vmem:[#allocation5 + $0x120] sm:$0xff]   ;;  %v1030_v7 = vld [vmem:[#allocation5 + $0x1e8] sm:$0xff]   ;;  %v1034_v11 = vld [vmem:[#allocation5 + $0x1f0] sm:$0xff]  }
  0x4a   :  { %890 = vmatpush3.bf16.msra.mxu0 %v994_v18  ;;  %663 = vmatprep.mubr.bf16.mxu0 %v227_v46  ;;  %v237_v51 = vcombine.high %v227_v46, %v227_v46  ;;  %v234_v53 = vrot.slane %v206_v48, %v1202_v35  ;;  %v1028_v6 = vld [vmem:[#allocation5 + $0x1a0] sm:$0xff]   ;;  %v1031_v8 = vld [vmem:[#allocation5 + $0x128] sm:$0xff]   ;;  %v1035_v12 = vld [vmem:[#allocation5 + $0x130] sm:$0xff]  }
  0x4b   :  { %912 = vmatpush3.bf16.msra.mxu1 %v995_v19  ;;  %891 = vmatprep.subr.bf16.mxu0 %v996_v20  ;;  %v1032_v10 = vld [vmem:[#allocation5 + $0x1a8] sm:$0xff]   ;;  %v1037_v13 = vld [vmem:[#allocation5 + $0x178] sm:$0xff]   ;;  %v1036_v14 = vld [vmem:[#allocation5 + $0x1b0] sm:$0xff]   ;;  %v236_v19 = vcombine.high %v220_v17, %v220_v17 }
  0x4c   :  { %913 = vmatprep.subr.bf16.mxu1 %v997_v21  ;;  %703 = vmatprep.mubr.bf16.mxu1 %v237_v51  ;;  %v238_v56 = vcombine.high %v234_v53, %v234_v53  ;;  %v1038_v15 = vld [vmem:[#allocation5 + $0x1f8] sm:$0xff]   ;;  %v815_v21 = vld [vmem:[#allocation7] ss:$0 sm:$0xff] }
  0x4d   :  { %v1039_v16 = vld [vmem:[#allocation5 + $0x138] sm:$0xff]  }
  0x4e   :  { %892 = vmatpush3.bf16.msra.mxu0 %v998_v25  ;;  %v1040_v18 = vld [vmem:[#allocation5 + $0x1b8] sm:$0xff]  }
  0x4f   :  { %914 = vmatpush3.bf16.msra.mxu1 %v999_v26  ;;  %893 = vmatprep.subr.bf16.mxu0 %v1000_v27 }
  0x50   :  { %915 = vmatprep.subr.bf16.mxu1 %v1001_v28 }
  0x52   :  { %894 = vmatpush3.bf16.msra.mxu0 %v1002_v31 }
  0x53   :  { %916 = vmatpush3.bf16.msra.mxu1 %v1003_v32  ;;  %895 = vmatprep.subr.bf16.mxu0 %v1004_v33 }
  0x54   :  { %917 = vmatprep.subr.bf16.mxu1 %v1005_v34 }
  0x56   :  { %896 = vmatpush3.bf16.msra.mxu0 %v1006_v36 }
  0x57   :  { %918 = vmatpush3.bf16.msra.mxu1 %v1007_v37  ;;  %925 = vmatprep.subr.bf16.mxu0 %v1009_v41 }
  0x58   :  { %947 = vmatprep.subr.bf16.mxu1 %v1010_v42 }
  0x59   :  { %664 = vmatmul.mubr.bf16.vlgmr.msra.gmra.mrb[0].mxu0 %v213_v44 }
  0x5a   :  { %926 = vmatpush3.bf16.msra.mxu0 %v1011_v47  ;;  %704 = vmatmul.mubr.bf16.vlgmr.msra.gmra.mrb[0].mxu1 %v235_v49 }
  0x5b   :  { %927 = vmatprep.subr.bf16.mxu0 %v1013_v50  ;;  %948 = vmatpush3.bf16.msra.mxu1 %v1012_v52 }
  0x5c   :  { %743 = vmatprep.mubr.bf16.mxu0 %v234_v53  ;;  %949 = vmatprep.subr.bf16.mxu1 %v1014_v54 }
  0x5d   :  { %783 = vmatprep.mubr.bf16.mxu1 %v238_v56 }
  0x5e   :  { %928 = vmatpush3.bf16.msra.mxu0 %v1015_v55 }
  0x5f   :  { %929 = vmatprep.subr.bf16.mxu0 %v1017_v57  ;;  %950 = vmatpush3.bf16.msra.mxu1 %v1016_v58 }
  0x60   :  { %951 = vmatprep.subr.bf16.mxu1 %v1018_v59 }
  0x62   :  { %930 = vmatpush3.bf16.msra.mxu0 %v1019_v60 }
  0x63   :  { %931 = vmatprep.subr.bf16.mxu0 %v1021_v61  ;;  %952 = vmatpush3.bf16.msra.mxu1 %v1020_v62 }
  0x64   :  { %953 = vmatprep.subr.bf16.mxu1 %v1022_v63 }
  0x66   :  { %932 = vmatpush3.bf16.msra.mxu0 %v1023_v0 }
  0x67   :  { %933 = vmatprep.subr.bf16.mxu0 %v1025_v1  ;;  %954 = vmatpush3.bf16.msra.mxu1 %v1024_v2 }
  0x68   :  { %955 = vmatprep.subr.bf16.mxu1 %v1026_v3 }
  0x6a   :  { %934 = vmatpush3.bf16.msra.mxu0 %v1027_v4 }
  0x6b   :  { %935 = vmatprep.subr.bf16.mxu0 %v1029_v5  ;;  %956 = vmatpush3.bf16.msra.mxu1 %v1028_v6 }
  0x6c   :  { %957 = vmatprep.subr.bf16.mxu1 %v1030_v7 }
  0x6e   :  { %936 = vmatpush3.bf16.msra.mxu0 %v1031_v8 }
  0x6f   :  { %937 = vmatprep.subr.bf16.mxu0 %v1033_v9  ;;  %958 = vmatpush3.bf16.msra.mxu1 %v1032_v10 }
  0x70   :  { %959 = vmatprep.subr.bf16.mxu1 %v1034_v11 }
  0x72   :  { %938 = vmatpush3.bf16.msra.mxu0 %v1035_v12 }
  0x73   :  { %939 = vmatprep.subr.bf16.mxu0 %v1037_v13  ;;  %960 = vmatpush3.bf16.msra.mxu1 %v1036_v14 }
  0x74   :  { %961 = vmatprep.subr.bf16.mxu1 %v1038_v15 }
  0x76   :  { %940 = vmatpush3.bf16.msra.mxu0 %v1039_v16 }
  0x77   :  { %962 = vmatpush3.bf16.msra.mxu1 %v1040_v18 }
  0x79   :  { %744 = vmatmul.mubr.bf16.vlgmr.msra.gmra.mrb[4].mxu0 %v220_v17 }
  0x7a   :  { %784 = vmatmul.mubr.bf16.vlgmr.msra.gmra.mrb[4].mxu1 %v236_v19 }
 0x12c   :  { %v897_v20 = vpop.f32.mrb[0].mxu0 }
 0x12d   :  { %v898_v22 = vpop.f32.mrb[1].mxu0  ;;  %v919_v23 = vpop.f32.mrb[0].mxu1 }
 0x12e   :  { %v899_v24 = vadd.f32 %v898_v22, %v897_v20  ;;  %v900_v25 = vpop.f32.mrb[2].mxu0  ;;  %v920_v26 = vpop.f32.mrb[1].mxu1 }
 0x12f   :  { %v901_v27 = vpop.f32.mrb[3].mxu0  ;;  %v921_v29 = vadd.f32 %v920_v26, %v919_v23  ;;  %v922_v30 = vpop.f32.mrb[2].mxu1 }
 0x130   :  { %v666_v28 = vadd.f32 %v899_v24, %v815_v21  ;;  %v923_v31 = vpop.f32.mrb[3].mxu1 }
 0x132   :  { %v706_v32 = vadd.f32 %v921_v29, %v666_v28 }
 0x14c   :  { %v941_v33 = vpop.f32.mrb[4].mxu0 }
 0x14d   :  { %v942_v34 = vpop.f32.mrb[5].mxu0  ;;  %v963_v35 = vpop.f32.mrb[4].mxu1 }
 0x14e   :  { %v943_v36 = vadd.f32 %v942_v34, %v941_v33  ;;  %v944_v37 = vpop.f32.mrb[6].mxu0  ;;  %v964_v38 = vpop.f32.mrb[5].mxu1 }
 0x14f   :  { %v945_v39 = vpop.f32.mrb[7].mxu0  ;;  %v965_v41 = vadd.f32 %v964_v38, %v963_v35  ;;  %v966_v42 = vpop.f32.mrb[6].mxu1 }
 0x150   :  { %v746_v40 = vadd.f32 %v943_v36, %v706_v32  ;;  %v967_v43 = vpop.f32.mrb[7].mxu1 }
 0x152   :  { %v786_v44 = vadd.f32 %v965_v41, %v746_v40 }
 0x154   :  { %v880_v45 = vmul.f32 -1.442695, %v786_v44 }
 0x156   :  { %1041 = vpow2.f32 %v880_v45 }
 0x160   :  { %v1042_v46 = vpop.eup %1041 }
 0x161   :  { %v794_v47 = vadd.f32 1.0, %v1042_v46 }
 0x163   :  { %1043 = vrcp.f32 %v794_v47 }
 0x16d   :  { %v1044_v48 = vpop.eup %1043 }
 0x16e   :  { %798 = vst.msk [vmem:[#allocation8] sm:$0x3] %vm797_vm0, %v1044_v48 }
 0x16f   :  { %1122 = shalt.err (!%p1119_p0)
}
 0x170   :  { %s1123_s26 = scalar_lea.hbm %s1230_s3, 32 }
 0x171   :  { %p1124_p1 = scmp.ne.s32.totalorder %s1230_s3, %s1123_s26  ;;  %p1127_p2 = scmp.lt.u32.totalorder %s1123_s26, %s1230_s3 }
 0x173   :  { %p1129_p3 = pnand %p1127_p2, %p1124_p1 }
 0x175   :  { %1132 = shalt.err (!%p1129_p3)
}
 0x176   :  { %808 = dma.vmem_to_hbm [thread:$0]  %s806_s22, 32, %s1230_s3, [#allocation4]  }
 0x177   :  { %1137 = dma.done.wait [#allocation4], 32  }
 0x178   :  { %1138 = vsyncadd [#allocation4], 4294967264 }
 0x179   :  { %812 = vsyncpa [#allocation3], 1 }
 0x17a   :  { %813 = vsyncpa [#allocation6], 1 }
 0x17b   :  { %814 = vsyncpa [#allocation4], 1 }

</bundles_post_ra>
